<compile_context>
chip_gen: v7x
topology: tpu7x:2x2x1
jax: 0.10.0
libtpu: 0.0.40
codegen_flags: <defaults>
</compile_context>

<pallas_src>
import functools
import math

import jax
import jax.numpy as jnp
from jax.experimental import pallas as pl
from jax.experimental.pallas import tpu as pltpu


# MXU operand dtype: bf16 inputs, f32 accumulation (preferred_element_type).
MXU_DTYPE = jnp.bfloat16
# Classifier logits are padded to a full lane tile for an unmasked store.
LOGITS_PAD = 128


# ----------------------------- config (small) ------------------------------
class BertConfig:
    def __init__(self):
        self.vocab_size = 100
        self.hidden_size = 128
        self.num_hidden_layers = 2
        self.num_attention_heads = 4
        self.intermediate_size = 256
        self.max_position_embeddings = 64
        self.type_vocab_size = 2
        self.layer_norm_eps = 1e-12
        self.num_labels = 2


# ----------------------------- kernel helpers -------------------------------
def _layernorm(x, g, b, eps):
    mean = jnp.mean(x, axis=-1, keepdims=True)
    var = jnp.mean((x - mean) * (x - mean), axis=-1, keepdims=True)
    return (x - mean) * jax.lax.rsqrt(var + eps) * g + b


def _gelu(x):
    # exact (erf) gelu, matching torch.nn.functional.gelu default.
    # (tanh approximation would relieve VALU on v5e/v6e but deviates from torch)
    return 0.5 * x * (1.0 + jax.lax.erf(x * (1.0 / math.sqrt(2.0))))


# -------------------- fully fused BERT forward kernel ------------------------
def _bert_fused_kernel(emb_ref, mask_ref, emb_g_ref, emb_b_ref,
                       qkv_w_ref, qkv_b_ref,
                       ao_w_ref, ao_b_ref, ao_g_ref, ao_bb_ref,
                       i_w_ref, i_b_ref,
                       o_w_ref, o_b_ref, o_g_ref, o_bb_ref,
                       pool_w_ref, pool_b_ref, cls_w_ref, cls_b_ref,
                       seq_ref, pooled_ref, logits_ref,
                       ctx_ref,
                       *, batch, seq_len, num_heads, head_dim, eps):
    H = num_heads * head_dim
    layer = pl.program_id(0)
    last_layer = pl.num_programs(0) - 1

    # ---- layer 0: embeddings sum + LayerNorm into the carried output block --
    @pl.when(layer == 0)
    def _():
        seq_ref[...] = _layernorm(emb_ref[...], emb_g_ref[...], emb_b_ref[...],
                                  eps).astype(seq_ref.dtype)

    h = seq_ref[...]                       # (B*S, H) f32, resident in VMEM

    # ---- fused QKV projection, batch folded into M (one (B*S, 3H) matmul) ---
    # 1/sqrt(head_dim) is pre-folded into the Q columns of qkv_w / qkv_b.
    qkv = jnp.dot(h.astype(MXU_DTYPE), qkv_w_ref[...],
                  preferred_element_type=jnp.float32) + qkv_b_ref[...]
    q = qkv[:, 0:H]
    k = qkv[:, H:2 * H]
    v = qkv[:, 2 * H:3 * H]
    mask = mask_ref[...]                   # (B, S) additive attention mask

    # ---- per-(batch, head) attention; ctx written lane-dense into scratch ---
    for b in range(batch):
        r0 = b * seq_len
        mb = mask[b:b + 1, :]              # (1, S)
        for hd in range(num_heads):
            c0 = hd * head_dim
            qh = q[r0:r0 + seq_len, c0:c0 + head_dim].astype(MXU_DTYPE)
            kh = k[r0:r0 + seq_len, c0:c0 + head_dim].astype(MXU_DTYPE)
            vh = v[r0:r0 + seq_len, c0:c0 + head_dim].astype(MXU_DTYPE)
            s = jax.lax.dot_general(qh, kh, (((1,), (1,)), ((), ())),
                                    preferred_element_type=jnp.float32)
            s = s + mb                     # (S, S) + (1, S)
            s = s - jnp.max(s, axis=-1, keepdims=True)
            p = jnp.exp(s)
            p = p * pl.reciprocal(jnp.sum(p, axis=-1, keepdims=True),
                                  approx=True)
            ctx_ref[r0:r0 + seq_len, c0:c0 + head_dim] = jnp.dot(
                p.astype(MXU_DTYPE), vh, preferred_element_type=jnp.float32)

    # ---- attention output projection (batch folded) + residual + LayerNorm --
    attn = jnp.dot(ctx_ref[...].astype(MXU_DTYPE), ao_w_ref[...],
                   preferred_element_type=jnp.float32) + ao_b_ref[...]
    attn_out = _layernorm(attn + h, ao_g_ref[...], ao_bb_ref[...], eps)

    # ---- FFN: intermediate (gelu) + output projection + add + LayerNorm -----
    inter = _gelu(jnp.dot(attn_out.astype(MXU_DTYPE), i_w_ref[...],
                          preferred_element_type=jnp.float32) + i_b_ref[...])
    ffn = jnp.dot(inter.astype(MXU_DTYPE), o_w_ref[...],
                  preferred_element_type=jnp.float32) + o_b_ref[...]
    new_h = _layernorm(ffn + attn_out, o_g_ref[...], o_bb_ref[...], eps)
    seq_ref[...] = new_h.astype(seq_ref.dtype)

    # ---- last layer: fused pooler (tanh linear on token 0) + classifier -----
    @pl.when(layer == last_layer)
    def _():
        first = jnp.concatenate(
            [new_h[b * seq_len:b * seq_len + 1, :] for b in range(batch)],
            axis=0)                                           # (B, H)
        pooled = jnp.tanh(jnp.dot(first.astype(MXU_DTYPE), pool_w_ref[...],
                                  preferred_element_type=jnp.float32)
                          + pool_b_ref[...])
        logits = jnp.dot(pooled.astype(MXU_DTYPE), cls_w_ref[...],
                         preferred_element_type=jnp.float32) + cls_b_ref[...]
        pooled_ref[...] = pooled.astype(pooled_ref.dtype)
        logits_ref[...] = logits.astype(logits_ref.dtype)     # (B, 128) padded


# ----------------------------- parameter setup ------------------------------
def init_params(cfg, key):
    H, I, L = cfg.hidden_size, cfg.intermediate_size, cfg.num_hidden_layers
    NL = cfg.num_labels
    dH = H // cfg.num_attention_heads
    scale = 1.0 / math.sqrt(dH)

    def nrm(k, shape):
        return 0.02 * jax.random.normal(k, shape, jnp.float32)

    ks = iter(jax.random.split(key, 9))

    qkv_w = nrm(next(ks), (L, H, 3 * H))
    qkv_b = jnp.zeros((L, 1, 3 * H), jnp.float32)
    # fold the 1/sqrt(head_dim) attention scale into the Q projection, once.
    qkv_w = qkv_w.at[:, :, :H].multiply(scale)
    qkv_b = qkv_b.at[:, :, :H].multiply(scale)

    cls_w = jnp.zeros((H, LOGITS_PAD), jnp.float32)
    cls_w = cls_w.at[:, :NL].set(nrm(next(ks), (H, NL)))

    return {
        "word_emb": nrm(next(ks), (cfg.vocab_size, H)),
        "pos_emb": nrm(next(ks), (cfg.max_position_embeddings, H)),
        "type_emb": nrm(next(ks), (cfg.type_vocab_size, H)),
        "emb_ln_g": jnp.ones((1, H), jnp.float32),
        "emb_ln_b": jnp.zeros((1, H), jnp.float32),
        # per-layer weights stacked on a leading L axis (bf16 MXU operands)
        "qkv_w": qkv_w.astype(MXU_DTYPE),
        "qkv_b": qkv_b,
        "ao_w": nrm(next(ks), (L, H, H)).astype(MXU_DTYPE),
        "ao_b": jnp.zeros((L, 1, H), jnp.float32),
        "ao_ln_g": jnp.ones((L, 1, H), jnp.float32),
        "ao_ln_b": jnp.zeros((L, 1, H), jnp.float32),
        "i_w": nrm(next(ks), (L, H, I)).astype(MXU_DTYPE),
        "i_b": jnp.zeros((L, 1, I), jnp.float32),
        "o_w": nrm(next(ks), (L, I, H)).astype(MXU_DTYPE),
        "o_b": jnp.zeros((L, 1, H), jnp.float32),
        "o_ln_g": jnp.ones((L, 1, H), jnp.float32),
        "o_ln_b": jnp.zeros((L, 1, H), jnp.float32),
        "pool_w": nrm(next(ks), (H, H)).astype(MXU_DTYPE),
        "pool_b": jnp.zeros((1, H), jnp.float32),
        "cls_w": cls_w.astype(MXU_DTYPE),
        "cls_b": jnp.zeros((1, LOGITS_PAD), jnp.float32),
    }


# -------------------------------- forward ----------------------------------
def bert_for_sequence_classification(params, cfg, input_ids,
                                     token_type_ids=None, attention_mask=None):
    B, S = input_ids.shape
    H, L = cfg.hidden_size, cfg.num_hidden_layers
    nH = cfg.num_attention_heads
    dH = H // nH
    eps = cfg.layer_norm_eps

    if attention_mask is None:
        attention_mask = jnp.ones_like(input_ids)
    if token_type_ids is None:
        token_type_ids = jnp.zeros_like(input_ids)

    # additive attention mask, (B, S)
    ext_mask = (1.0 - attention_mask.astype(jnp.float32)) * -10000.0

    # embedding table gathers stay in plain JAX (dynamic row gather);
    # TODO(synk): could move to scalar-prefetch + pl.Element gathers in-kernel.
    we = params["word_emb"][input_ids]                    # (B, S, H)
    pe = params["pos_emb"][:S][None, :, :]                # (1, S, H)
    te = params["type_emb"][token_type_ids]               # (B, S, H)
    emb_sum = (we + pe + te).reshape(B * S, H).astype(jnp.float32)

    def const_spec(arr):
        nd = arr.ndim
        return pl.BlockSpec(arr.shape, lambda l, _nd=nd: (0,) * _nd)

    def layer_spec(arr):  # stacked (L, ...) weights: one layer slice per step
        nd = arr.ndim
        return pl.BlockSpec((pl.Squeezed(),) + arr.shape[1:],
                            lambda l, _nd=nd: (l,) + (0,) * (_nd - 1))

    inputs = (emb_sum, ext_mask, params["emb_ln_g"], params["emb_ln_b"],
              params["qkv_w"], params["qkv_b"],
              params["ao_w"], params["ao_b"],
              params["ao_ln_g"], params["ao_ln_b"],
              params["i_w"], params["i_b"],
              params["o_w"], params["o_b"],
              params["o_ln_g"], params["o_ln_b"],
              params["pool_w"], params["pool_b"],
              params["cls_w"], params["cls_b"])

    in_specs = ([const_spec(emb_sum), const_spec(ext_mask),
                 const_spec(params["emb_ln_g"]), const_spec(params["emb_ln_b"])]
                + [layer_spec(params[k]) for k in
                   ("qkv_w", "qkv_b", "ao_w", "ao_b", "ao_ln_g", "ao_ln_b",
                    "i_w", "i_b", "o_w", "o_b", "o_ln_g", "o_ln_b")]
                + [const_spec(params["pool_w"]), const_spec(params["pool_b"]),
                   const_spec(params["cls_w"]), const_spec(params["cls_b"])])

    seq_flat, pooled, logits_pad = pl.pallas_call(
        functools.partial(_bert_fused_kernel, batch=B, seq_len=S,
                          num_heads=nH, head_dim=dH, eps=eps),
        out_shape=(jax.ShapeDtypeStruct((B * S, H), jnp.float32),
                   jax.ShapeDtypeStruct((B, H), jnp.float32),
                   jax.ShapeDtypeStruct((B, LOGITS_PAD), jnp.float32)),
        grid=(L,),
        in_specs=in_specs,
        out_specs=(pl.BlockSpec((B * S, H), lambda l: (0, 0)),
                   pl.BlockSpec((B, H), lambda l: (0, 0)),
                   pl.BlockSpec((B, LOGITS_PAD), lambda l: (0, 0))),
        scratch_shapes=[pltpu.VMEM((B * S, H), jnp.float32)],
        compiler_params=pltpu.CompilerParams(
            dimension_semantics=("arbitrary",),        # layers carry state
            vmem_limit_bytes=32 * 1024 * 1024),
    )(*inputs)

    seq_out = seq_flat.reshape(B, S, H)
    logits = logits_pad[:, :cfg.num_labels]
    return seq_out, pooled, logits


# --------------------------------- main -------------------------------------
if __name__ == "__main__":
    cfg = BertConfig()
    B, S = 2, 16

    key = jax.random.PRNGKey(0)
    k_param, k_ids, k_type = jax.random.split(key, 3)
    params = init_params(cfg, k_param)

    input_ids = jax.random.randint(k_ids, (B, S), 0, cfg.vocab_size,
                                   dtype=jnp.int32)
    token_type_ids = jax.random.randint(k_type, (B, S), 0, cfg.type_vocab_size,
                                        dtype=jnp.int32)
    attention_mask = jnp.ones((B, S), dtype=jnp.int32)

    fwd = jax.jit(lambda p, ids, tt, am:
                  bert_for_sequence_classification(p, cfg, ids, tt, am))
    seq_out, pooled, logits = fwd(params, input_ids, token_type_ids,
                                  attention_mask)
    jax.block_until_ready((seq_out, pooled, logits))

    assert seq_out.shape == (B, S, cfg.hidden_size)
    assert pooled.shape == (B, cfg.hidden_size)
    assert logits.shape == (B, cfg.num_labels)
    assert bool(jnp.all(jnp.isfinite(seq_out)))
    assert bool(jnp.all(jnp.isfinite(logits)))
    print("KERNEL_OK")
</pallas_src>

<mosaic_0001>
module attributes {stable_mosaic.version = 11 : i64} {
  func.func @_bert_fused_kernel(%arg0: i32, %arg1: memref<32x128xf32, #tpu.memory_space<vmem>>, %arg2: memref<2x16xf32, #tpu.memory_space<vmem>>, %arg3: memref<1x128xf32, #tpu.memory_space<vmem>>, %arg4: memref<1x128xf32, #tpu.memory_space<vmem>>, %arg5: memref<1x128x384xbf16, #tpu.memory_space<vmem>>, %arg6: memref<1x1x384xf32, #tpu.memory_space<vmem>>, %arg7: memref<1x128x128xbf16, #tpu.memory_space<vmem>>, %arg8: memref<1x1x128xf32, #tpu.memory_space<vmem>>, %arg9: memref<1x1x128xf32, #tpu.memory_space<vmem>>, %arg10: memref<1x1x128xf32, #tpu.memory_space<vmem>>, %arg11: memref<1x128x256xbf16, #tpu.memory_space<vmem>>, %arg12: memref<1x1x256xf32, #tpu.memory_space<vmem>>, %arg13: memref<1x256x128xbf16, #tpu.memory_space<vmem>>, %arg14: memref<1x1x128xf32, #tpu.memory_space<vmem>>, %arg15: memref<1x1x128xf32, #tpu.memory_space<vmem>>, %arg16: memref<1x1x128xf32, #tpu.memory_space<vmem>>, %arg17: memref<128x128xbf16, #tpu.memory_space<vmem>>, %arg18: memref<1x128xf32, #tpu.memory_space<vmem>>, %arg19: memref<128x128xbf16, #tpu.memory_space<vmem>>, %arg20: memref<1x128xf32, #tpu.memory_space<vmem>>, %arg21: memref<32x128xf32, #tpu.memory_space<vmem>>, %arg22: memref<2x128xf32, #tpu.memory_space<vmem>>, %arg23: memref<2x128xf32, #tpu.memory_space<vmem>>, %arg24: memref<32x128xf32, #tpu.memory_space<vmem>>) attributes {dimension_semantics = [#tpu.dimension_semantics<arbitrary>], iteration_bounds = array<i64: 2>, scalar_prefetch = 0 : i64, scratch_operands = 1 : i64, tpu.core_type = #tpu.core_type<tc>, window_params = [{pipeline_mode = #tpu.pipeline_mode<synchronous>, transform_indices = @transform_0, window_bounds = array<i64: 32, 128>}, {pipeline_mode = #tpu.pipeline_mode<synchronous>, transform_indices = @transform_1, window_bounds = array<i64: 2, 16>}, {pipeline_mode = #tpu.pipeline_mode<synchronous>, transform_indices = @transform_2, window_bounds = array<i64: 1, 128>}, {pipeline_mode = #tpu.pipeline_mode<synchronous>, transform_indices = @transform_3, window_bounds = array<i64: 1, 128>}, {transform_indices = @transform_4, window_bounds = array<i64: 1, 128, 384>}, {transform_indices = @transform_5, window_bounds = array<i64: 1, 1, 384>}, {transform_indices = @transform_6, window_bounds = array<i64: 1, 128, 128>}, {transform_indices = @transform_7, window_bounds = array<i64: 1, 1, 128>}, {transform_indices = @transform_8, window_bounds = array<i64: 1, 1, 128>}, {transform_indices = @transform_9, window_bounds = array<i64: 1, 1, 128>}, {transform_indices = @transform_10, window_bounds = array<i64: 1, 128, 256>}, {transform_indices = @transform_11, window_bounds = array<i64: 1, 1, 256>}, {transform_indices = @transform_12, window_bounds = array<i64: 1, 256, 128>}, {transform_indices = @transform_13, window_bounds = array<i64: 1, 1, 128>}, {transform_indices = @transform_14, window_bounds = array<i64: 1, 1, 128>}, {transform_indices = @transform_15, window_bounds = array<i64: 1, 1, 128>}, {pipeline_mode = #tpu.pipeline_mode<synchronous>, transform_indices = @transform_16, window_bounds = array<i64: 128, 128>}, {pipeline_mode = #tpu.pipeline_mode<synchronous>, transform_indices = @transform_17, window_bounds = array<i64: 1, 128>}, {pipeline_mode = #tpu.pipeline_mode<synchronous>, transform_indices = @transform_18, window_bounds = array<i64: 128, 128>}, {pipeline_mode = #tpu.pipeline_mode<synchronous>, transform_indices = @transform_19, window_bounds = array<i64: 1, 128>}, {pipeline_mode = #tpu.pipeline_mode<synchronous>, transform_indices = @transform_20, window_bounds = array<i64: 32, 128>}, {pipeline_mode = #tpu.pipeline_mode<synchronous>, transform_indices = @transform_21, window_bounds = array<i64: 2, 128>}, {pipeline_mode = #tpu.pipeline_mode<synchronous>, transform_indices = @transform_22, window_bounds = array<i64: 2, 128>}]} {
    %c0_i32 = arith.constant 0 : i32
    %0 = arith.cmpi eq, %arg0, %c0_i32 : i32
    %1 = arith.extui %0 : i1 to i32
    %c0_i32_0 = arith.constant 0 : i32
    %2 = arith.cmpi ne, %1, %c0_i32_0 : i32
    scf.if %2 {
      %c0_105 = arith.constant 0 : index
      %c0_106 = arith.constant 0 : index
      %289 = vector.load %arg1[%c0_105, %c0_106] : memref<32x128xf32, #tpu.memory_space<vmem>>, vector<32x128xf32>
      %c0_107 = arith.constant 0 : index
      %c0_108 = arith.constant 0 : index
      %290 = vector.load %arg3[%c0_107, %c0_108] : memref<1x128xf32, #tpu.memory_space<vmem>>, vector<1x128xf32>
      %c0_109 = arith.constant 0 : index
      %c0_110 = arith.constant 0 : index
      %291 = vector.load %arg4[%c0_109, %c0_110] : memref<1x128xf32, #tpu.memory_space<vmem>>, vector<1x128xf32>
      %cst_111 = arith.constant dense<0.000000e+00> : vector<32xf32>
      %292 = vector.multi_reduction <add>, %289, %cst_111 [1] : vector<32x128xf32> to vector<32xf32>
      %293 = vector.shape_cast %292 : vector<32xf32> to vector<32x1xf32>
      %cst_112 = arith.constant 1.280000e+02 : f32
      %294 = vector.broadcast %cst_112 : f32 to vector<32x1xf32>
      %295 = arith.divf %293, %294 : vector<32x1xf32>
      %296 = vector.broadcast %295 : vector<32x1xf32> to vector<32x128xf32>
      %297 = arith.subf %289, %296 : vector<32x128xf32>
      %298 = vector.broadcast %295 : vector<32x1xf32> to vector<32x128xf32>
      %299 = arith.subf %289, %298 : vector<32x128xf32>
      %300 = arith.mulf %297, %299 : vector<32x128xf32>
      %cst_113 = arith.constant dense<0.000000e+00> : vector<32xf32>
      %301 = vector.multi_reduction <add>, %300, %cst_113 [1] : vector<32x128xf32> to vector<32xf32>
      %302 = vector.shape_cast %301 : vector<32xf32> to vector<32x1xf32>
      %cst_114 = arith.constant 1.280000e+02 : f32
      %303 = vector.broadcast %cst_114 : f32 to vector<32x1xf32>
      %304 = arith.divf %302, %303 : vector<32x1xf32>
      %305 = vector.broadcast %295 : vector<32x1xf32> to vector<32x128xf32>
      %306 = arith.subf %289, %305 : vector<32x128xf32>
      %cst_115 = arith.constant 9.99999996E-13 : f32
      %307 = vector.broadcast %cst_115 : f32 to vector<32x1xf32>
      %308 = arith.addf %304, %307 : vector<32x1xf32>
      %309 = math.rsqrt %308 : vector<32x1xf32>
      %310 = vector.broadcast %309 : vector<32x1xf32> to vector<32x128xf32>
      %311 = arith.mulf %306, %310 : vector<32x128xf32>
      %312 = vector.broadcast %290 : vector<1x128xf32> to vector<32x128xf32>
      %313 = arith.mulf %311, %312 : vector<32x128xf32>
      %314 = vector.broadcast %291 : vector<1x128xf32> to vector<32x128xf32>
      %315 = arith.addf %313, %314 : vector<32x128xf32>
      %c0_116 = arith.constant 0 : index
      %c0_117 = arith.constant 0 : index
      %316 = vector.load %arg21[%c0_116, %c0_117] : memref<32x128xf32, #tpu.memory_space<vmem>>, vector<32x128xf32>
      tpu.vector_store %arg21[%c0_116, %c0_117], %315 {strides = array<i32>} : memref<32x128xf32, #tpu.memory_space<vmem>>, vector<32x128xf32>,
    } else {
    }
    %c0 = arith.constant 0 : index
    %c0_1 = arith.constant 0 : index
    %3 = vector.load %arg21[%c0, %c0_1] : memref<32x128xf32, #tpu.memory_space<vmem>>, vector<32x128xf32>
    %4 = arith.truncf %3 : vector<32x128xf32> to vector<32x128xbf16>
    %c0_2 = arith.constant 0 : index
    %c0_3 = arith.constant 0 : index
    %c0_4 = arith.constant 0 : index
    %5 = vector.load %arg5[%c0_2, %c0_3, %c0_4] : memref<1x128x384xbf16, #tpu.memory_space<vmem>>, vector<1x128x384xbf16>
    %6 = vector.shape_cast %5 : vector<1x128x384xbf16> to vector<128x384xbf16>
    %cst = arith.constant dense<0.000000e+00> : vector<32x384xf32>
    %7 = tpu.matmul %4, %6, %cst {dimension_numbers = #tpu.dot_dimension_numbers<[1], [0], [0], [1], [0, 0, 1, 1], [], []>} : vector<32x128xbf16>, vector<128x384xbf16>, vector<32x384xf32> -> vector<32x384xf32>
    %c0_5 = arith.constant 0 : index
    %c0_6 = arith.constant 0 : index
    %c0_7 = arith.constant 0 : index
    %8 = vector.load %arg6[%c0_5, %c0_6, %c0_7] : memref<1x1x384xf32, #tpu.memory_space<vmem>>, vector<1x1x384xf32>
    %9 = vector.shape_cast %8 : vector<1x1x384xf32> to vector<1x384xf32>
    %10 = vector.broadcast %9 : vector<1x384xf32> to vector<32x384xf32>
    %11 = arith.addf %7, %10 : vector<32x384xf32>
    %12 = vector.extract_strided_slice %11 {offsets = [0, 0], sizes = [32, 128], strides = [1, 1]} : vector<32x384xf32> to vector<32x128xf32>
    %13 = vector.extract_strided_slice %11 {offsets = [0, 128], sizes = [32, 128], strides = [1, 1]} : vector<32x384xf32> to vector<32x128xf32>
    %14 = vector.extract_strided_slice %11 {offsets = [0, 256], sizes = [32, 128], strides = [1, 1]} : vector<32x384xf32> to vector<32x128xf32>
    %c0_8 = arith.constant 0 : index
    %c0_9 = arith.constant 0 : index
    %15 = vector.load %arg2[%c0_8, %c0_9] : memref<2x16xf32, #tpu.memory_space<vmem>>, vector<2x16xf32>
    %16 = vector.extract_strided_slice %15 {offsets = [0, 0], sizes = [1, 16], strides = [1, 1]} : vector<2x16xf32> to vector<1x16xf32>
    %17 = vector.extract_strided_slice %12 {offsets = [0, 0], sizes = [16, 32], strides = [1, 1]} : vector<32x128xf32> to vector<16x32xf32>
    %18 = arith.truncf %17 : vector<16x32xf32> to vector<16x32xbf16>
    %19 = vector.extract_strided_slice %13 {offsets = [0, 0], sizes = [16, 32], strides = [1, 1]} : vector<32x128xf32> to vector<16x32xf32>
    %20 = arith.truncf %19 : vector<16x32xf32> to vector<16x32xbf16>
    %21 = vector.extract_strided_slice %14 {offsets = [0, 0], sizes = [16, 32], strides = [1, 1]} : vector<32x128xf32> to vector<16x32xf32>
    %22 = arith.truncf %21 : vector<16x32xf32> to vector<16x32xbf16>
    %cst_10 = arith.constant dense<0.000000e+00> : vector<16x16xf32>
    %23 = tpu.matmul %18, %20, %cst_10 {dimension_numbers = #tpu.dot_dimension_numbers<[1], [1], [0], [0], [0, 0, 1, 0], [], []>} : vector<16x32xbf16>, vector<16x32xbf16>, vector<16x16xf32> -> vector<16x16xf32>
    %24 = vector.broadcast %16 : vector<1x16xf32> to vector<16x16xf32>
    %25 = arith.addf %23, %24 : vector<16x16xf32>
    %cst_11 = arith.constant dense<0xFF800000> : vector<16xf32>
    %26 = vector.multi_reduction <maximumf>, %25, %cst_11 [1] : vector<16x16xf32> to vector<16xf32>
    %27 = vector.shape_cast %26 : vector<16xf32> to vector<16x1xf32>
    %28 = vector.broadcast %27 : vector<16x1xf32> to vector<16x16xf32>
    %29 = arith.subf %25, %28 : vector<16x16xf32>
    %30 = math.exp %29 : vector<16x16xf32>
    %cst_12 = arith.constant dense<0.000000e+00> : vector<16xf32>
    %31 = vector.multi_reduction <add>, %30, %cst_12 [1] : vector<16x16xf32> to vector<16xf32>
    %32 = vector.shape_cast %31 : vector<16xf32> to vector<16x1xf32>
    %33 = tpu.reciprocal %32 {approx = true} : vector<16x1xf32> -> vector<16x1xf32>
    %34 = vector.broadcast %33 : vector<16x1xf32> to vector<16x16xf32>
    %35 = arith.mulf %30, %34 : vector<16x16xf32>
    %36 = arith.truncf %35 : vector<16x16xf32> to vector<16x16xbf16>
    %cst_13 = arith.constant dense<0.000000e+00> : vector<16x32xf32>
    %37 = tpu.matmul %36, %22, %cst_13 {dimension_numbers = #tpu.dot_dimension_numbers<[1], [0], [0], [1], [0, 0, 1, 1], [], []>} : vector<16x16xbf16>, vector<16x32xbf16>, vector<16x32xf32> -> vector<16x32xf32>
    %c0_14 = arith.constant 0 : index
    %c0_15 = arith.constant 0 : index
    %38 = vector.load %arg24[%c0_14, %c0_15] : memref<32x128xf32, #tpu.memory_space<vmem>>, vector<16x32xf32>
    tpu.vector_store %arg24[%c0_14, %c0_15], %37 {strides = array<i32>} : memref<32x128xf32, #tpu.memory_space<vmem>>, vector<16x32xf32>,
    %39 = vector.extract_strided_slice %12 {offsets = [0, 32], sizes = [16, 32], strides = [1, 1]} : vector<32x128xf32> to vector<16x32xf32>
    %40 = arith.truncf %39 : vector<16x32xf32> to vector<16x32xbf16>
    %41 = vector.extract_strided_slice %13 {offsets = [0, 32], sizes = [16, 32], strides = [1, 1]} : vector<32x128xf32> to vector<16x32xf32>
    %42 = arith.truncf %41 : vector<16x32xf32> to vector<16x32xbf16>
    %43 = vector.extract_strided_slice %14 {offsets = [0, 32], sizes = [16, 32], strides = [1, 1]} : vector<32x128xf32> to vector<16x32xf32>
    %44 = arith.truncf %43 : vector<16x32xf32> to vector<16x32xbf16>
    %cst_16 = arith.constant dense<0.000000e+00> : vector<16x16xf32>
    %45 = tpu.matmul %40, %42, %cst_16 {dimension_numbers = #tpu.dot_dimension_numbers<[1], [1], [0], [0], [0, 0, 1, 0], [], []>} : vector<16x32xbf16>, vector<16x32xbf16>, vector<16x16xf32> -> vector<16x16xf32>
    %46 = vector.broadcast %16 : vector<1x16xf32> to vector<16x16xf32>
    %47 = arith.addf %45, %46 : vector<16x16xf32>
    %cst_17 = arith.constant dense<0xFF800000> : vector<16xf32>
    %48 = vector.multi_reduction <maximumf>, %47, %cst_17 [1] : vector<16x16xf32> to vector<16xf32>
    %49 = vector.shape_cast %48 : vector<16xf32> to vector<16x1xf32>
    %50 = vector.broadcast %49 : vector<16x1xf32> to vector<16x16xf32>
    %51 = arith.subf %47, %50 : vector<16x16xf32>
    %52 = math.exp %51 : vector<16x16xf32>
    %cst_18 = arith.constant dense<0.000000e+00> : vector<16xf32>
    %53 = vector.multi_reduction <add>, %52, %cst_18 [1] : vector<16x16xf32> to vector<16xf32>
    %54 = vector.shape_cast %53 : vector<16xf32> to vector<16x1xf32>
    %55 = tpu.reciprocal %54 {approx = true} : vector<16x1xf32> -> vector<16x1xf32>
    %56 = vector.broadcast %55 : vector<16x1xf32> to vector<16x16xf32>
    %57 = arith.mulf %52, %56 : vector<16x16xf32>
    %58 = arith.truncf %57 : vector<16x16xf32> to vector<16x16xbf16>
    %cst_19 = arith.constant dense<0.000000e+00> : vector<16x32xf32>
    %59 = tpu.matmul %58, %44, %cst_19 {dimension_numbers = #tpu.dot_dimension_numbers<[1], [0], [0], [1], [0, 0, 1, 1], [], []>} : vector<16x16xbf16>, vector<16x32xbf16>, vector<16x32xf32> -> vector<16x32xf32>
    %c0_20 = arith.constant 0 : index
    %c32 = arith.constant 32 : index
    %60 = vector.load %arg24[%c0_20, %c32] : memref<32x128xf32, #tpu.memory_space<vmem>>, vector<16x32xf32>
    tpu.vector_store %arg24[%c0_20, %c32], %59 {strides = array<i32>} : memref<32x128xf32, #tpu.memory_space<vmem>>, vector<16x32xf32>,
    %61 = vector.extract_strided_slice %12 {offsets = [0, 64], sizes = [16, 32], strides = [1, 1]} : vector<32x128xf32> to vector<16x32xf32>
    %62 = arith.truncf %61 : vector<16x32xf32> to vector<16x32xbf16>
    %63 = vector.extract_strided_slice %13 {offsets = [0, 64], sizes = [16, 32], strides = [1, 1]} : vector<32x128xf32> to vector<16x32xf32>
    %64 = arith.truncf %63 : vector<16x32xf32> to vector<16x32xbf16>
    %65 = vector.extract_strided_slice %14 {offsets = [0, 64], sizes = [16, 32], strides = [1, 1]} : vector<32x128xf32> to vector<16x32xf32>
    %66 = arith.truncf %65 : vector<16x32xf32> to vector<16x32xbf16>
    %cst_21 = arith.constant dense<0.000000e+00> : vector<16x16xf32>
    %67 = tpu.matmul %62, %64, %cst_21 {dimension_numbers = #tpu.dot_dimension_numbers<[1], [1], [0], [0], [0, 0, 1, 0], [], []>} : vector<16x32xbf16>, vector<16x32xbf16>, vector<16x16xf32> -> vector<16x16xf32>
    %68 = vector.broadcast %16 : vector<1x16xf32> to vector<16x16xf32>
    %69 = arith.addf %67, %68 : vector<16x16xf32>
    %cst_22 = arith.constant dense<0xFF800000> : vector<16xf32>
    %70 = vector.multi_reduction <maximumf>, %69, %cst_22 [1] : vector<16x16xf32> to vector<16xf32>
    %71 = vector.shape_cast %70 : vector<16xf32> to vector<16x1xf32>
    %72 = vector.broadcast %71 : vector<16x1xf32> to vector<16x16xf32>
    %73 = arith.subf %69, %72 : vector<16x16xf32>
    %74 = math.exp %73 : vector<16x16xf32>
    %cst_23 = arith.constant dense<0.000000e+00> : vector<16xf32>
    %75 = vector.multi_reduction <add>, %74, %cst_23 [1] : vector<16x16xf32> to vector<16xf32>
    %76 = vector.shape_cast %75 : vector<16xf32> to vector<16x1xf32>
    %77 = tpu.reciprocal %76 {approx = true} : vector<16x1xf32> -> vector<16x1xf32>
    %78 = vector.broadcast %77 : vector<16x1xf32> to vector<16x16xf32>
    %79 = arith.mulf %74, %78 : vector<16x16xf32>
    %80 = arith.truncf %79 : vector<16x16xf32> to vector<16x16xbf16>
    %cst_24 = arith.constant dense<0.000000e+00> : vector<16x32xf32>
    %81 = tpu.matmul %80, %66, %cst_24 {dimension_numbers = #tpu.dot_dimension_numbers<[1], [0], [0], [1], [0, 0, 1, 1], [], []>} : vector<16x16xbf16>, vector<16x32xbf16>, vector<16x32xf32> -> vector<16x32xf32>
    %c0_25 = arith.constant 0 : index
    %c64 = arith.constant 64 : index
    %82 = vector.load %arg24[%c0_25, %c64] : memref<32x128xf32, #tpu.memory_space<vmem>>, vector<16x32xf32>
    tpu.vector_store %arg24[%c0_25, %c64], %81 {strides = array<i32>} : memref<32x128xf32, #tpu.memory_space<vmem>>, vector<16x32xf32>,
    %83 = vector.extract_strided_slice %12 {offsets = [0, 96], sizes = [16, 32], strides = [1, 1]} : vector<32x128xf32> to vector<16x32xf32>
    %84 = arith.truncf %83 : vector<16x32xf32> to vector<16x32xbf16>
    %85 = vector.extract_strided_slice %13 {offsets = [0, 96], sizes = [16, 32], strides = [1, 1]} : vector<32x128xf32> to vector<16x32xf32>
    %86 = arith.truncf %85 : vector<16x32xf32> to vector<16x32xbf16>
    %87 = vector.extract_strided_slice %14 {offsets = [0, 96], sizes = [16, 32], strides = [1, 1]} : vector<32x128xf32> to vector<16x32xf32>
    %88 = arith.truncf %87 : vector<16x32xf32> to vector<16x32xbf16>
    %cst_26 = arith.constant dense<0.000000e+00> : vector<16x16xf32>
    %89 = tpu.matmul %84, %86, %cst_26 {dimension_numbers = #tpu.dot_dimension_numbers<[1], [1], [0], [0], [0, 0, 1, 0], [], []>} : vector<16x32xbf16>, vector<16x32xbf16>, vector<16x16xf32> -> vector<16x16xf32>
    %90 = vector.broadcast %16 : vector<1x16xf32> to vector<16x16xf32>
    %91 = arith.addf %89, %90 : vector<16x16xf32>
    %cst_27 = arith.constant dense<0xFF800000> : vector<16xf32>
    %92 = vector.multi_reduction <maximumf>, %91, %cst_27 [1] : vector<16x16xf32> to vector<16xf32>
    %93 = vector.shape_cast %92 : vector<16xf32> to vector<16x1xf32>
    %94 = vector.broadcast %93 : vector<16x1xf32> to vector<16x16xf32>
    %95 = arith.subf %91, %94 : vector<16x16xf32>
    %96 = math.exp %95 : vector<16x16xf32>
    %cst_28 = arith.constant dense<0.000000e+00> : vector<16xf32>
    %97 = vector.multi_reduction <add>, %96, %cst_28 [1] : vector<16x16xf32> to vector<16xf32>
    %98 = vector.shape_cast %97 : vector<16xf32> to vector<16x1xf32>
    %99 = tpu.reciprocal %98 {approx = true} : vector<16x1xf32> -> vector<16x1xf32>
    %100 = vector.broadcast %99 : vector<16x1xf32> to vector<16x16xf32>
    %101 = arith.mulf %96, %100 : vector<16x16xf32>
    %102 = arith.truncf %101 : vector<16x16xf32> to vector<16x16xbf16>
    %cst_29 = arith.constant dense<0.000000e+00> : vector<16x32xf32>
    %103 = tpu.matmul %102, %88, %cst_29 {dimension_numbers = #tpu.dot_dimension_numbers<[1], [0], [0], [1], [0, 0, 1, 1], [], []>} : vector<16x16xbf16>, vector<16x32xbf16>, vector<16x32xf32> -> vector<16x32xf32>
    %c0_30 = arith.constant 0 : index
    %c96 = arith.constant 96 : index
    %104 = vector.load %arg24[%c0_30, %c96] : memref<32x128xf32, #tpu.memory_space<vmem>>, vector<16x32xf32>
    tpu.vector_store %arg24[%c0_30, %c96], %103 {strides = array<i32>} : memref<32x128xf32, #tpu.memory_space<vmem>>, vector<16x32xf32>,
    %105 = vector.extract_strided_slice %15 {offsets = [1, 0], sizes = [1, 16], strides = [1, 1]} : vector<2x16xf32> to vector<1x16xf32>
    %106 = vector.extract_strided_slice %12 {offsets = [16, 0], sizes = [16, 32], strides = [1, 1]} : vector<32x128xf32> to vector<16x32xf32>
    %107 = arith.truncf %106 : vector<16x32xf32> to vector<16x32xbf16>
    %108 = vector.extract_strided_slice %13 {offsets = [16, 0], sizes = [16, 32], strides = [1, 1]} : vector<32x128xf32> to vector<16x32xf32>
    %109 = arith.truncf %108 : vector<16x32xf32> to vector<16x32xbf16>
    %110 = vector.extract_strided_slice %14 {offsets = [16, 0], sizes = [16, 32], strides = [1, 1]} : vector<32x128xf32> to vector<16x32xf32>
    %111 = arith.truncf %110 : vector<16x32xf32> to vector<16x32xbf16>
    %cst_31 = arith.constant dense<0.000000e+00> : vector<16x16xf32>
    %112 = tpu.matmul %107, %109, %cst_31 {dimension_numbers = #tpu.dot_dimension_numbers<[1], [1], [0], [0], [0, 0, 1, 0], [], []>} : vector<16x32xbf16>, vector<16x32xbf16>, vector<16x16xf32> -> vector<16x16xf32>
    %113 = vector.broadcast %105 : vector<1x16xf32> to vector<16x16xf32>
    %114 = arith.addf %112, %113 : vector<16x16xf32>
    %cst_32 = arith.constant dense<0xFF800000> : vector<16xf32>
    %115 = vector.multi_reduction <maximumf>, %114, %cst_32 [1] : vector<16x16xf32> to vector<16xf32>
    %116 = vector.shape_cast %115 : vector<16xf32> to vector<16x1xf32>
    %117 = vector.broadcast %116 : vector<16x1xf32> to vector<16x16xf32>
    %118 = arith.subf %114, %117 : vector<16x16xf32>
    %119 = math.exp %118 : vector<16x16xf32>
    %cst_33 = arith.constant dense<0.000000e+00> : vector<16xf32>
    %120 = vector.multi_reduction <add>, %119, %cst_33 [1] : vector<16x16xf32> to vector<16xf32>
    %121 = vector.shape_cast %120 : vector<16xf32> to vector<16x1xf32>
    %122 = tpu.reciprocal %121 {approx = true} : vector<16x1xf32> -> vector<16x1xf32>
    %123 = vector.broadcast %122 : vector<16x1xf32> to vector<16x16xf32>
    %124 = arith.mulf %119, %123 : vector<16x16xf32>
    %125 = arith.truncf %124 : vector<16x16xf32> to vector<16x16xbf16>
    %cst_34 = arith.constant dense<0.000000e+00> : vector<16x32xf32>
    %126 = tpu.matmul %125, %111, %cst_34 {dimension_numbers = #tpu.dot_dimension_numbers<[1], [0], [0], [1], [0, 0, 1, 1], [], []>} : vector<16x16xbf16>, vector<16x32xbf16>, vector<16x32xf32> -> vector<16x32xf32>
    %c16 = arith.constant 16 : index
    %c0_35 = arith.constant 0 : index
    %127 = vector.load %arg24[%c16, %c0_35] : memref<32x128xf32, #tpu.memory_space<vmem>>, vector<16x32xf32>
    tpu.vector_store %arg24[%c16, %c0_35], %126 {strides = array<i32>} : memref<32x128xf32, #tpu.memory_space<vmem>>, vector<16x32xf32>,
    %128 = vector.extract_strided_slice %12 {offsets = [16, 32], sizes = [16, 32], strides = [1, 1]} : vector<32x128xf32> to vector<16x32xf32>
    %129 = arith.truncf %128 : vector<16x32xf32> to vector<16x32xbf16>
    %130 = vector.extract_strided_slice %13 {offsets = [16, 32], sizes = [16, 32], strides = [1, 1]} : vector<32x128xf32> to vector<16x32xf32>
    %131 = arith.truncf %130 : vector<16x32xf32> to vector<16x32xbf16>
    %132 = vector.extract_strided_slice %14 {offsets = [16, 32], sizes = [16, 32], strides = [1, 1]} : vector<32x128xf32> to vector<16x32xf32>
    %133 = arith.truncf %132 : vector<16x32xf32> to vector<16x32xbf16>
    %cst_36 = arith.constant dense<0.000000e+00> : vector<16x16xf32>
    %134 = tpu.matmul %129, %131, %cst_36 {dimension_numbers = #tpu.dot_dimension_numbers<[1], [1], [0], [0], [0, 0, 1, 0], [], []>} : vector<16x32xbf16>, vector<16x32xbf16>, vector<16x16xf32> -> vector<16x16xf32>
    %135 = vector.broadcast %105 : vector<1x16xf32> to vector<16x16xf32>
    %136 = arith.addf %134, %135 : vector<16x16xf32>
    %cst_37 = arith.constant dense<0xFF800000> : vector<16xf32>
    %137 = vector.multi_reduction <maximumf>, %136, %cst_37 [1] : vector<16x16xf32> to vector<16xf32>
    %138 = vector.shape_cast %137 : vector<16xf32> to vector<16x1xf32>
    %139 = vector.broadcast %138 : vector<16x1xf32> to vector<16x16xf32>
    %140 = arith.subf %136, %139 : vector<16x16xf32>
    %141 = math.exp %140 : vector<16x16xf32>
    %cst_38 = arith.constant dense<0.000000e+00> : vector<16xf32>
    %142 = vector.multi_reduction <add>, %141, %cst_38 [1] : vector<16x16xf32> to vector<16xf32>
    %143 = vector.shape_cast %142 : vector<16xf32> to vector<16x1xf32>
    %144 = tpu.reciprocal %143 {approx = true} : vector<16x1xf32> -> vector<16x1xf32>
    %145 = vector.broadcast %144 : vector<16x1xf32> to vector<16x16xf32>
    %146 = arith.mulf %141, %145 : vector<16x16xf32>
    %147 = arith.truncf %146 : vector<16x16xf32> to vector<16x16xbf16>
    %cst_39 = arith.constant dense<0.000000e+00> : vector<16x32xf32>
    %148 = tpu.matmul %147, %133, %cst_39 {dimension_numbers = #tpu.dot_dimension_numbers<[1], [0], [0], [1], [0, 0, 1, 1], [], []>} : vector<16x16xbf16>, vector<16x32xbf16>, vector<16x32xf32> -> vector<16x32xf32>
    %c16_40 = arith.constant 16 : index
    %c32_41 = arith.constant 32 : index
    %149 = vector.load %arg24[%c16_40, %c32_41] : memref<32x128xf32, #tpu.memory_space<vmem>>, vector<16x32xf32>
    tpu.vector_store %arg24[%c16_40, %c32_41], %148 {strides = array<i32>} : memref<32x128xf32, #tpu.memory_space<vmem>>, vector<16x32xf32>,
    %150 = vector.extract_strided_slice %12 {offsets = [16, 64], sizes = [16, 32], strides = [1, 1]} : vector<32x128xf32> to vector<16x32xf32>
    %151 = arith.truncf %150 : vector<16x32xf32> to vector<16x32xbf16>
    %152 = vector.extract_strided_slice %13 {offsets = [16, 64], sizes = [16, 32], strides = [1, 1]} : vector<32x128xf32> to vector<16x32xf32>
    %153 = arith.truncf %152 : vector<16x32xf32> to vector<16x32xbf16>
    %154 = vector.extract_strided_slice %14 {offsets = [16, 64], sizes = [16, 32], strides = [1, 1]} : vector<32x128xf32> to vector<16x32xf32>
    %155 = arith.truncf %154 : vector<16x32xf32> to vector<16x32xbf16>
    %cst_42 = arith.constant dense<0.000000e+00> : vector<16x16xf32>
    %156 = tpu.matmul %151, %153, %cst_42 {dimension_numbers = #tpu.dot_dimension_numbers<[1], [1], [0], [0], [0, 0, 1, 0], [], []>} : vector<16x32xbf16>, vector<16x32xbf16>, vector<16x16xf32> -> vector<16x16xf32>
    %157 = vector.broadcast %105 : vector<1x16xf32> to vector<16x16xf32>
    %158 = arith.addf %156, %157 : vector<16x16xf32>
    %cst_43 = arith.constant dense<0xFF800000> : vector<16xf32>
    %159 = vector.multi_reduction <maximumf>, %158, %cst_43 [1] : vector<16x16xf32> to vector<16xf32>
    %160 = vector.shape_cast %159 : vector<16xf32> to vector<16x1xf32>
    %161 = vector.broadcast %160 : vector<16x1xf32> to vector<16x16xf32>
    %162 = arith.subf %158, %161 : vector<16x16xf32>
    %163 = math.exp %162 : vector<16x16xf32>
    %cst_44 = arith.constant dense<0.000000e+00> : vector<16xf32>
    %164 = vector.multi_reduction <add>, %163, %cst_44 [1] : vector<16x16xf32> to vector<16xf32>
    %165 = vector.shape_cast %164 : vector<16xf32> to vector<16x1xf32>
    %166 = tpu.reciprocal %165 {approx = true} : vector<16x1xf32> -> vector<16x1xf32>
    %167 = vector.broadcast %166 : vector<16x1xf32> to vector<16x16xf32>
    %168 = arith.mulf %163, %167 : vector<16x16xf32>
    %169 = arith.truncf %168 : vector<16x16xf32> to vector<16x16xbf16>
    %cst_45 = arith.constant dense<0.000000e+00> : vector<16x32xf32>
    %170 = tpu.matmul %169, %155, %cst_45 {dimension_numbers = #tpu.dot_dimension_numbers<[1], [0], [0], [1], [0, 0, 1, 1], [], []>} : vector<16x16xbf16>, vector<16x32xbf16>, vector<16x32xf32> -> vector<16x32xf32>
    %c16_46 = arith.constant 16 : index
    %c64_47 = arith.constant 64 : index
    %171 = vector.load %arg24[%c16_46, %c64_47] : memref<32x128xf32, #tpu.memory_space<vmem>>, vector<16x32xf32>
    tpu.vector_store %arg24[%c16_46, %c64_47], %170 {strides = array<i32>} : memref<32x128xf32, #tpu.memory_space<vmem>>, vector<16x32xf32>,
    %172 = vector.extract_strided_slice %12 {offsets = [16, 96], sizes = [16, 32], strides = [1, 1]} : vector<32x128xf32> to vector<16x32xf32>
    %173 = arith.truncf %172 : vector<16x32xf32> to vector<16x32xbf16>
    %174 = vector.extract_strided_slice %13 {offsets = [16, 96], sizes = [16, 32], strides = [1, 1]} : vector<32x128xf32> to vector<16x32xf32>
    %175 = arith.truncf %174 : vector<16x32xf32> to vector<16x32xbf16>
    %176 = vector.extract_strided_slice %14 {offsets = [16, 96], sizes = [16, 32], strides = [1, 1]} : vector<32x128xf32> to vector<16x32xf32>
    %177 = arith.truncf %176 : vector<16x32xf32> to vector<16x32xbf16>
    %cst_48 = arith.constant dense<0.000000e+00> : vector<16x16xf32>
    %178 = tpu.matmul %173, %175, %cst_48 {dimension_numbers = #tpu.dot_dimension_numbers<[1], [1], [0], [0], [0, 0, 1, 0], [], []>} : vector<16x32xbf16>, vector<16x32xbf16>, vector<16x16xf32> -> vector<16x16xf32>
    %179 = vector.broadcast %105 : vector<1x16xf32> to vector<16x16xf32>
    %180 = arith.addf %178, %179 : vector<16x16xf32>
    %cst_49 = arith.constant dense<0xFF800000> : vector<16xf32>
    %181 = vector.multi_reduction <maximumf>, %180, %cst_49 [1] : vector<16x16xf32> to vector<16xf32>
    %182 = vector.shape_cast %181 : vector<16xf32> to vector<16x1xf32>
    %183 = vector.broadcast %182 : vector<16x1xf32> to vector<16x16xf32>
    %184 = arith.subf %180, %183 : vector<16x16xf32>
    %185 = math.exp %184 : vector<16x16xf32>
    %cst_50 = arith.constant dense<0.000000e+00> : vector<16xf32>
    %186 = vector.multi_reduction <add>, %185, %cst_50 [1] : vector<16x16xf32> to vector<16xf32>
    %187 = vector.shape_cast %186 : vector<16xf32> to vector<16x1xf32>
    %188 = tpu.reciprocal %187 {approx = true} : vector<16x1xf32> -> vector<16x1xf32>
    %189 = vector.broadcast %188 : vector<16x1xf32> to vector<16x16xf32>
    %190 = arith.mulf %185, %189 : vector<16x16xf32>
    %191 = arith.truncf %190 : vector<16x16xf32> to vector<16x16xbf16>
    %cst_51 = arith.constant dense<0.000000e+00> : vector<16x32xf32>
    %192 = tpu.matmul %191, %177, %cst_51 {dimension_numbers = #tpu.dot_dimension_numbers<[1], [0], [0], [1], [0, 0, 1, 1], [], []>} : vector<16x16xbf16>, vector<16x32xbf16>, vector<16x32xf32> -> vector<16x32xf32>
    %c16_52 = arith.constant 16 : index
    %c96_53 = arith.constant 96 : index
    %193 = vector.load %arg24[%c16_52, %c96_53] : memref<32x128xf32, #tpu.memory_space<vmem>>, vector<16x32xf32>
    tpu.vector_store %arg24[%c16_52, %c96_53], %192 {strides = array<i32>} : memref<32x128xf32, #tpu.memory_space<vmem>>, vector<16x32xf32>,
    %c0_54 = arith.constant 0 : index
    %c0_55 = arith.constant 0 : index
    %194 = vector.load %arg24[%c0_54, %c0_55] : memref<32x128xf32, #tpu.memory_space<vmem>>, vector<32x128xf32>
    %195 = arith.truncf %194 : vector<32x128xf32> to vector<32x128xbf16>
    %c0_56 = arith.constant 0 : index
    %c0_57 = arith.constant 0 : index
    %c0_58 = arith.constant 0 : index
    %196 = vector.load %arg7[%c0_56, %c0_57, %c0_58] : memref<1x128x128xbf16, #tpu.memory_space<vmem>>, vector<1x128x128xbf16>
    %197 = vector.shape_cast %196 : vector<1x128x128xbf16> to vector<128x128xbf16>
    %cst_59 = arith.constant dense<0.000000e+00> : vector<32x128xf32>
    %198 = tpu.matmul %195, %197, %cst_59 {dimension_numbers = #tpu.dot_dimension_numbers<[1], [0], [0], [1], [0, 0, 1, 1], [], []>} : vector<32x128xbf16>, vector<128x128xbf16>, vector<32x128xf32> -> vector<32x128xf32>
    %c0_60 = arith.constant 0 : index
    %c0_61 = arith.constant 0 : index
    %c0_62 = arith.constant 0 : index
    %199 = vector.load %arg8[%c0_60, %c0_61, %c0_62] : memref<1x1x128xf32, #tpu.memory_space<vmem>>, vector<1x1x128xf32>
    %200 = vector.shape_cast %199 : vector<1x1x128xf32> to vector<1x128xf32>
    %201 = vector.broadcast %200 : vector<1x128xf32> to vector<32x128xf32>
    %202 = arith.addf %198, %201 : vector<32x128xf32>
    %203 = arith.addf %202, %3 : vector<32x128xf32>
    %c0_63 = arith.constant 0 : index
    %c0_64 = arith.constant 0 : index
    %c0_65 = arith.constant 0 : index
    %204 = vector.load %arg9[%c0_63, %c0_64, %c0_65] : memref<1x1x128xf32, #tpu.memory_space<vmem>>, vector<1x1x128xf32>
    %205 = vector.shape_cast %204 : vector<1x1x128xf32> to vector<1x128xf32>
    %c0_66 = arith.constant 0 : index
    %c0_67 = arith.constant 0 : index
    %c0_68 = arith.constant 0 : index
    %206 = vector.load %arg10[%c0_66, %c0_67, %c0_68] : memref<1x1x128xf32, #tpu.memory_space<vmem>>, vector<1x1x128xf32>
    %207 = vector.shape_cast %206 : vector<1x1x128xf32> to vector<1x128xf32>
    %cst_69 = arith.constant dense<0.000000e+00> : vector<32xf32>
    %208 = vector.multi_reduction <add>, %203, %cst_69 [1] : vector<32x128xf32> to vector<32xf32>
    %209 = vector.shape_cast %208 : vector<32xf32> to vector<32x1xf32>
    %cst_70 = arith.constant 1.280000e+02 : f32
    %210 = vector.broadcast %cst_70 : f32 to vector<32x1xf32>
    %211 = arith.divf %209, %210 : vector<32x1xf32>
    %212 = vector.broadcast %211 : vector<32x1xf32> to vector<32x128xf32>
    %213 = arith.subf %203, %212 : vector<32x128xf32>
    %214 = vector.broadcast %211 : vector<32x1xf32> to vector<32x128xf32>
    %215 = arith.subf %203, %214 : vector<32x128xf32>
    %216 = arith.mulf %213, %215 : vector<32x128xf32>
    %cst_71 = arith.constant dense<0.000000e+00> : vector<32xf32>
    %217 = vector.multi_reduction <add>, %216, %cst_71 [1] : vector<32x128xf32> to vector<32xf32>
    %218 = vector.shape_cast %217 : vector<32xf32> to vector<32x1xf32>
    %cst_72 = arith.constant 1.280000e+02 : f32
    %219 = vector.broadcast %cst_72 : f32 to vector<32x1xf32>
    %220 = arith.divf %218, %219 : vector<32x1xf32>
    %221 = vector.broadcast %211 : vector<32x1xf32> to vector<32x128xf32>
    %222 = arith.subf %203, %221 : vector<32x128xf32>
    %cst_73 = arith.constant 9.99999996E-13 : f32
    %223 = vector.broadcast %cst_73 : f32 to vector<32x1xf32>
    %224 = arith.addf %220, %223 : vector<32x1xf32>
    %225 = math.rsqrt %224 : vector<32x1xf32>
    %226 = vector.broadcast %225 : vector<32x1xf32> to vector<32x128xf32>
    %227 = arith.mulf %222, %226 : vector<32x128xf32>
    %228 = vector.broadcast %205 : vector<1x128xf32> to vector<32x128xf32>
    %229 = arith.mulf %227, %228 : vector<32x128xf32>
    %230 = vector.broadcast %207 : vector<1x128xf32> to vector<32x128xf32>
    %231 = arith.addf %229, %230 : vector<32x128xf32>
    %232 = arith.truncf %231 : vector<32x128xf32> to vector<32x128xbf16>
    %c0_74 = arith.constant 0 : index
    %c0_75 = arith.constant 0 : index
    %c0_76 = arith.constant 0 : index
    %233 = vector.load %arg11[%c0_74, %c0_75, %c0_76] : memref<1x128x256xbf16, #tpu.memory_space<vmem>>, vector<1x128x256xbf16>
    %234 = vector.shape_cast %233 : vector<1x128x256xbf16> to vector<128x256xbf16>
    %cst_77 = arith.constant dense<0.000000e+00> : vector<32x256xf32>
    %235 = tpu.matmul %232, %234, %cst_77 {dimension_numbers = #tpu.dot_dimension_numbers<[1], [0], [0], [1], [0, 0, 1, 1], [], []>} : vector<32x128xbf16>, vector<128x256xbf16>, vector<32x256xf32> -> vector<32x256xf32>
    %c0_78 = arith.constant 0 : index
    %c0_79 = arith.constant 0 : index
    %c0_80 = arith.constant 0 : index
    %236 = vector.load %arg12[%c0_78, %c0_79, %c0_80] : memref<1x1x256xf32, #tpu.memory_space<vmem>>, vector<1x1x256xf32>
    %237 = vector.shape_cast %236 : vector<1x1x256xf32> to vector<1x256xf32>
    %238 = vector.broadcast %237 : vector<1x256xf32> to vector<32x256xf32>
    %239 = arith.addf %235, %238 : vector<32x256xf32>
    %cst_81 = arith.constant 5.000000e-01 : f32
    %240 = vector.broadcast %cst_81 : f32 to vector<32x256xf32>
    %241 = arith.mulf %240, %239 : vector<32x256xf32>
    %cst_82 = arith.constant 0.707106769 : f32
    %242 = vector.broadcast %cst_82 : f32 to vector<32x256xf32>
    %243 = arith.mulf %239, %242 : vector<32x256xf32>
    %244 = math.erf %243 : vector<32x256xf32>
    %cst_83 = arith.constant 1.000000e+00 : f32
    %245 = vector.broadcast %cst_83 : f32 to vector<32x256xf32>
    %246 = arith.addf %245, %244 : vector<32x256xf32>
    %247 = arith.mulf %241, %246 : vector<32x256xf32>
    %248 = arith.truncf %247 : vector<32x256xf32> to vector<32x256xbf16>
    %c0_84 = arith.constant 0 : index
    %c0_85 = arith.constant 0 : index
    %c0_86 = arith.constant 0 : index
    %249 = vector.load %arg13[%c0_84, %c0_85, %c0_86] : memref<1x256x128xbf16, #tpu.memory_space<vmem>>, vector<1x256x128xbf16>
    %250 = vector.shape_cast %249 : vector<1x256x128xbf16> to vector<256x128xbf16>
    %cst_87 = arith.constant dense<0.000000e+00> : vector<32x128xf32>
    %251 = tpu.matmul %248, %250, %cst_87 {dimension_numbers = #tpu.dot_dimension_numbers<[1], [0], [0], [1], [0, 0, 1, 1], [], []>} : vector<32x256xbf16>, vector<256x128xbf16>, vector<32x128xf32> -> vector<32x128xf32>
    %c0_88 = arith.constant 0 : index
    %c0_89 = arith.constant 0 : index
    %c0_90 = arith.constant 0 : index
    %252 = vector.load %arg14[%c0_88, %c0_89, %c0_90] : memref<1x1x128xf32, #tpu.memory_space<vmem>>, vector<1x1x128xf32>
    %253 = vector.shape_cast %252 : vector<1x1x128xf32> to vector<1x128xf32>
    %254 = vector.broadcast %253 : vector<1x128xf32> to vector<32x128xf32>
    %255 = arith.addf %251, %254 : vector<32x128xf32>
    %256 = arith.addf %255, %231 : vector<32x128xf32>
    %c0_91 = arith.constant 0 : index
    %c0_92 = arith.constant 0 : index
    %c0_93 = arith.constant 0 : index
    %257 = vector.load %arg15[%c0_91, %c0_92, %c0_93] : memref<1x1x128xf32, #tpu.memory_space<vmem>>, vector<1x1x128xf32>
    %258 = vector.shape_cast %257 : vector<1x1x128xf32> to vector<1x128xf32>
    %c0_94 = arith.constant 0 : index
    %c0_95 = arith.constant 0 : index
    %c0_96 = arith.constant 0 : index
    %259 = vector.load %arg16[%c0_94, %c0_95, %c0_96] : memref<1x1x128xf32, #tpu.memory_space<vmem>>, vector<1x1x128xf32>
    %260 = vector.shape_cast %259 : vector<1x1x128xf32> to vector<1x128xf32>
    %cst_97 = arith.constant dense<0.000000e+00> : vector<32xf32>
    %261 = vector.multi_reduction <add>, %256, %cst_97 [1] : vector<32x128xf32> to vector<32xf32>
    %262 = vector.shape_cast %261 : vector<32xf32> to vector<32x1xf32>
    %cst_98 = arith.constant 1.280000e+02 : f32
    %263 = vector.broadcast %cst_98 : f32 to vector<32x1xf32>
    %264 = arith.divf %262, %263 : vector<32x1xf32>
    %265 = vector.broadcast %264 : vector<32x1xf32> to vector<32x128xf32>
    %266 = arith.subf %256, %265 : vector<32x128xf32>
    %267 = vector.broadcast %264 : vector<32x1xf32> to vector<32x128xf32>
    %268 = arith.subf %256, %267 : vector<32x128xf32>
    %269 = arith.mulf %266, %268 : vector<32x128xf32>
    %cst_99 = arith.constant dense<0.000000e+00> : vector<32xf32>
    %270 = vector.multi_reduction <add>, %269, %cst_99 [1] : vector<32x128xf32> to vector<32xf32>
    %271 = vector.shape_cast %270 : vector<32xf32> to vector<32x1xf32>
    %cst_100 = arith.constant 1.280000e+02 : f32
    %272 = vector.broadcast %cst_100 : f32 to vector<32x1xf32>
    %273 = arith.divf %271, %272 : vector<32x1xf32>
    %274 = vector.broadcast %264 : vector<32x1xf32> to vector<32x128xf32>
    %275 = arith.subf %256, %274 : vector<32x128xf32>
    %cst_101 = arith.constant 9.99999996E-13 : f32
    %276 = vector.broadcast %cst_101 : f32 to vector<32x1xf32>
    %277 = arith.addf %273, %276 : vector<32x1xf32>
    %278 = math.rsqrt %277 : vector<32x1xf32>
    %279 = vector.broadcast %278 : vector<32x1xf32> to vector<32x128xf32>
    %280 = arith.mulf %275, %279 : vector<32x128xf32>
    %281 = vector.broadcast %258 : vector<1x128xf32> to vector<32x128xf32>
    %282 = arith.mulf %280, %281 : vector<32x128xf32>
    %283 = vector.broadcast %260 : vector<1x128xf32> to vector<32x128xf32>
    %284 = arith.addf %282, %283 : vector<32x128xf32>
    %c0_102 = arith.constant 0 : index
    %c0_103 = arith.constant 0 : index
    %285 = vector.load %arg21[%c0_102, %c0_103] : memref<32x128xf32, #tpu.memory_space<vmem>>, vector<32x128xf32>
    tpu.vector_store %arg21[%c0_102, %c0_103], %284 {strides = array<i32>} : memref<32x128xf32, #tpu.memory_space<vmem>>, vector<32x128xf32>,
    %c1_i32 = arith.constant 1 : i32
    %286 = arith.cmpi eq, %arg0, %c1_i32 : i32
    %287 = arith.extui %286 : i1 to i32
    %c0_i32_104 = arith.constant 0 : i32
    %288 = arith.cmpi ne, %287, %c0_i32_104 : i32
    scf.if %288 {
      %289 = vector.extract_strided_slice %284 {offsets = [0, 0], sizes = [1, 128], strides = [1, 1]} : vector<32x128xf32> to vector<1x128xf32>
      %290 = vector.extract_strided_slice %284 {offsets = [16, 0], sizes = [1, 128], strides = [1, 1]} : vector<32x128xf32> to vector<1x128xf32>
      %291 = tpu.concatenate %289, %290 in 0 : vector<1x128xf32>, vector<1x128xf32> -> vector<2x128xf32>
      %292 = arith.truncf %291 : vector<2x128xf32> to vector<2x128xbf16>
      %c0_105 = arith.constant 0 : index
      %c0_106 = arith.constant 0 : index
      %293 = vector.load %arg17[%c0_105, %c0_106] : memref<128x128xbf16, #tpu.memory_space<vmem>>, vector<128x128xbf16>
      %cst_107 = arith.constant dense<0.000000e+00> : vector<2x128xf32>
      %294 = tpu.matmul %292, %293, %cst_107 {dimension_numbers = #tpu.dot_dimension_numbers<[1], [0], [0], [1], [0, 0, 1, 1], [], []>} : vector<2x128xbf16>, vector<128x128xbf16>, vector<2x128xf32> -> vector<2x128xf32>
      %c0_108 = arith.constant 0 : index
      %c0_109 = arith.constant 0 : index
      %295 = vector.load %arg18[%c0_108, %c0_109] : memref<1x128xf32, #tpu.memory_space<vmem>>, vector<1x128xf32>
      %296 = vector.broadcast %295 : vector<1x128xf32> to vector<2x128xf32>
      %297 = arith.addf %294, %296 : vector<2x128xf32>
      %298 = math.tanh %297 : vector<2x128xf32>
      %299 = arith.truncf %298 : vector<2x128xf32> to vector<2x128xbf16>
      %c0_110 = arith.constant 0 : index
      %c0_111 = arith.constant 0 : index
      %300 = vector.load %arg19[%c0_110, %c0_111] : memref<128x128xbf16, #tpu.memory_space<vmem>>, vector<128x128xbf16>
      %cst_112 = arith.constant dense<0.000000e+00> : vector<2x128xf32>
      %301 = tpu.matmul %299, %300, %cst_112 {dimension_numbers = #tpu.dot_dimension_numbers<[1], [0], [0], [1], [0, 0, 1, 1], [], []>} : vector<2x128xbf16>, vector<128x128xbf16>, vector<2x128xf32> -> vector<2x128xf32>
      %c0_113 = arith.constant 0 : index
      %c0_114 = arith.constant 0 : index
      %302 = vector.load %arg20[%c0_113, %c0_114] : memref<1x128xf32, #tpu.memory_space<vmem>>, vector<1x128xf32>
      %303 = vector.broadcast %302 : vector<1x128xf32> to vector<2x128xf32>
      %304 = arith.addf %301, %303 : vector<2x128xf32>
      %c0_115 = arith.constant 0 : index
      %c0_116 = arith.constant 0 : index
      %305 = vector.load %arg22[%c0_115, %c0_116] : memref<2x128xf32, #tpu.memory_space<vmem>>, vector<2x128xf32>
      tpu.vector_store %arg22[%c0_115, %c0_116], %298 {strides = array<i32>} : memref<2x128xf32, #tpu.memory_space<vmem>>, vector<2x128xf32>,
      %c0_117 = arith.constant 0 : index
      %c0_118 = arith.constant 0 : index
      %306 = vector.load %arg23[%c0_117, %c0_118] : memref<2x128xf32, #tpu.memory_space<vmem>>, vector<2x128xf32>
      tpu.vector_store %arg23[%c0_117, %c0_118], %304 {strides = array<i32>} : memref<2x128xf32, #tpu.memory_space<vmem>>, vector<2x128xf32>,
    } else {
    }
    return
  }
  func.func @transform_0(%arg0: i32) -> (i32, i32) {
    %c0_i32 = arith.constant 0 : i32
    %c0_i32_0 = arith.constant 0 : i32
    %c0_i32_1 = arith.constant 0 : i32
    return %c0_i32, %c0_i32_0 : i32, i32
  }
  func.func @transform_1(%arg0: i32) -> (i32, i32) {
    %c0_i32 = arith.constant 0 : i32
    %c0_i32_0 = arith.constant 0 : i32
    %c0_i32_1 = arith.constant 0 : i32
    return %c0_i32, %c0_i32_0 : i32, i32
  }
  func.func @transform_2(%arg0: i32) -> (i32, i32) {
    %c0_i32 = arith.constant 0 : i32
    %c0_i32_0 = arith.constant 0 : i32
    %c0_i32_1 = arith.constant 0 : i32
    return %c0_i32, %c0_i32_0 : i32, i32
  }
  func.func @transform_3(%arg0: i32) -> (i32, i32) {
    %c0_i32 = arith.constant 0 : i32
    %c0_i32_0 = arith.constant 0 : i32
    %c0_i32_1 = arith.constant 0 : i32
    return %c0_i32, %c0_i32_0 : i32, i32
  }
  func.func @transform_4(%arg0: i32) -> (i32, i32, i32) {
    %c0_i32 = arith.constant 0 : i32
    %c0_i32_0 = arith.constant 0 : i32
    %c0_i32_1 = arith.constant 0 : i32
    return %arg0, %c0_i32, %c0_i32_0 : i32, i32, i32
  }
  func.func @transform_5(%arg0: i32) -> (i32, i32, i32) {
    %c0_i32 = arith.constant 0 : i32
    %c0_i32_0 = arith.constant 0 : i32
    %c0_i32_1 = arith.constant 0 : i32
    return %arg0, %c0_i32, %c0_i32_0 : i32, i32, i32
  }
  func.func @transform_6(%arg0: i32) -> (i32, i32, i32) {
    %c0_i32 = arith.constant 0 : i32
    %c0_i32_0 = arith.constant 0 : i32
    %c0_i32_1 = arith.constant 0 : i32
    return %arg0, %c0_i32, %c0_i32_0 : i32, i32, i32
  }
  func.func @transform_7(%arg0: i32) -> (i32, i32, i32) {
    %c0_i32 = arith.constant 0 : i32
    %c0_i32_0 = arith.constant 0 : i32
    %c0_i32_1 = arith.constant 0 : i32
    return %arg0, %c0_i32, %c0_i32_0 : i32, i32, i32
  }
  func.func @transform_8(%arg0: i32) -> (i32, i32, i32) {
    %c0_i32 = arith.constant 0 : i32
    %c0_i32_0 = arith.constant 0 : i32
    %c0_i32_1 = arith.constant 0 : i32
    return %arg0, %c0_i32, %c0_i32_0 : i32, i32, i32
  }
  func.func @transform_9(%arg0: i32) -> (i32, i32, i32) {
    %c0_i32 = arith.constant 0 : i32
    %c0_i32_0 = arith.constant 0 : i32
    %c0_i32_1 = arith.constant 0 : i32
    return %arg0, %c0_i32, %c0_i32_0 : i32, i32, i32
  }
  func.func @transform_10(%arg0: i32) -> (i32, i32, i32) {
    %c0_i32 = arith.constant 0 : i32
    %c0_i32_0 = arith.constant 0 : i32
    %c0_i32_1 = arith.constant 0 : i32
    return %arg0, %c0_i32, %c0_i32_0 : i32, i32, i32
  }
  func.func @transform_11(%arg0: i32) -> (i32, i32, i32) {
    %c0_i32 = arith.constant 0 : i32
    %c0_i32_0 = arith.constant 0 : i32
    %c0_i32_1 = arith.constant 0 : i32
    return %arg0, %c0_i32, %c0_i32_0 : i32, i32, i32
  }
  func.func @transform_12(%arg0: i32) -> (i32, i32, i32) {
    %c0_i32 = arith.constant 0 : i32
    %c0_i32_0 = arith.constant 0 : i32
    %c0_i32_1 = arith.constant 0 : i32
    return %arg0, %c0_i32, %c0_i32_0 : i32, i32, i32
  }
  func.func @transform_13(%arg0: i32) -> (i32, i32, i32) {
    %c0_i32 = arith.constant 0 : i32
    %c0_i32_0 = arith.constant 0 : i32
    %c0_i32_1 = arith.constant 0 : i32
    return %arg0, %c0_i32, %c0_i32_0 : i32, i32, i32
  }
  func.func @transform_14(%arg0: i32) -> (i32, i32, i32) {
    %c0_i32 = arith.constant 0 : i32
    %c0_i32_0 = arith.constant 0 : i32
    %c0_i32_1 = arith.constant 0 : i32
    return %arg0, %c0_i32, %c0_i32_0 : i32, i32, i32
  }
  func.func @transform_15(%arg0: i32) -> (i32, i32, i32) {
    %c0_i32 = arith.constant 0 : i32
    %c0_i32_0 = arith.constant 0 : i32
    %c0_i32_1 = arith.constant 0 : i32
    return %arg0, %c0_i32, %c0_i32_0 : i32, i32, i32
  }
  func.func @transform_16(%arg0: i32) -> (i32, i32) {
    %c0_i32 = arith.constant 0 : i32
    %c0_i32_0 = arith.constant 0 : i32
    %c0_i32_1 = arith.constant 0 : i32
    return %c0_i32, %c0_i32_0 : i32, i32
  }
  func.func @transform_17(%arg0: i32) -> (i32, i32) {
    %c0_i32 = arith.constant 0 : i32
    %c0_i32_0 = arith.constant 0 : i32
    %c0_i32_1 = arith.constant 0 : i32
    return %c0_i32, %c0_i32_0 : i32, i32
  }
  func.func @transform_18(%arg0: i32) -> (i32, i32) {
    %c0_i32 = arith.constant 0 : i32
    %c0_i32_0 = arith.constant 0 : i32
    %c0_i32_1 = arith.constant 0 : i32
    return %c0_i32, %c0_i32_0 : i32, i32
  }
  func.func @transform_19(%arg0: i32) -> (i32, i32) {
    %c0_i32 = arith.constant 0 : i32
    %c0_i32_0 = arith.constant 0 : i32
    %c0_i32_1 = arith.constant 0 : i32
    return %c0_i32, %c0_i32_0 : i32, i32
  }
  func.func @transform_20(%arg0: i32) -> (i32, i32) {
    %c0_i32 = arith.constant 0 : i32
    %c0_i32_0 = arith.constant 0 : i32
    %c0_i32_1 = arith.constant 0 : i32
    return %c0_i32, %c0_i32_0 : i32, i32
  }
  func.func @transform_21(%arg0: i32) -> (i32, i32) {
    %c0_i32 = arith.constant 0 : i32
    %c0_i32_0 = arith.constant 0 : i32
    %c0_i32_1 = arith.constant 0 : i32
    return %c0_i32, %c0_i32_0 : i32, i32
  }
  func.func @transform_22(%arg0: i32) -> (i32, i32) {
    %c0_i32 = arith.constant 0 : i32
    %c0_i32_0 = arith.constant 0 : i32
    %c0_i32_1 = arith.constant 0 : i32
    return %c0_i32, %c0_i32_0 : i32, i32
  }
}

</mosaic_0001>

<bundles_post_ra>
// kernel: _lambda_.1
= control target key start
LH: loop header
LB: loop body
LE: loop exit
PB: predicated region body
PF: predicated region fallthrough
CT: control target
= control target key end

     0   :  { %s5615_s0 = inlined_call_operand.vmem [shape: f32[32,128], index: 0, kind: input, shape index: {}]   ;;  %s5616_s1 = inlined_call_operand.vmem [shape: f32[2,16], index: 1, kind: input, shape index: {}]   ;;  %s5617_s2 = inlined_call_operand.vmem [shape: f32[1,128], index: 2, kind: input, shape index: {}]   ;;  %s5618_s3 = inlined_call_operand.vmem [shape: f32[1,128], index: 3, kind: input, shape index: {}]   ;;  %s5619_s4 = inlined_call_operand.vmem [shape: bf16[2,128,384], index: 4, kind: input, shape index: {}]   ;;  %s5620_s5 = inlined_call_operand.hbm [shape: f32[2,1,384], index: 5, kind: input, shape index: {}]   ;;  %s5621_s6 = inlined_call_operand.hbm [shape: bf16[2,128,128], index: 6, kind: input, shape index: {}]   ;;  %s5622_s7 = inlined_call_operand.vmem [shape: f32[2,1,128], index: 7, kind: input, shape index: {}]   ;;  %s5623_s8 = inlined_call_operand.vmem [shape: f32[2,1,128], index: 8, kind: input, shape index: {}]   ;;  %s5624_s9 = inlined_call_operand.vmem [shape: f32[2,1,128], index: 9, kind: input, shape index: {}]   ;;  %s5625_s10 = inlined_call_operand.vmem [shape: bf16[2,128,256], index: 10, kind: input, shape index: {}]   ;;  %s5626_s11 = inlined_call_operand.vmem [shape: f32[2,1,256], index: 11, kind: input, shape index: {}]   ;;  %s5627_s12 = inlined_call_operand.hbm [shape: bf16[2,256,128], index: 12, kind: input, shape index: {}]   ;;  %s5628_s13 = inlined_call_operand.vmem [shape: f32[2,1,128], index: 13, kind: input, shape index: {}]   ;;  %s5629_s14 = inlined_call_operand.hbm [shape: f32[2,1,128], index: 14, kind: input, shape index: {}]   ;;  %s5630_s15 = inlined_call_operand.hbm [shape: f32[2,1,128], index: 15, kind: input, shape index: {}]   ;;  %s5631_s16 = inlined_call_operand.vmem [shape: bf16[128,128], index: 16, kind: input, shape index: {}]   ;;  %s5632_s17 = inlined_call_operand.hbm [shape: f32[1,128], index: 17, kind: input, shape index: {}]   ;;  %s5633_s18 = inlined_call_operand.vmem [shape: bf16[128,128], index: 18, kind: input, shape index: {}]   ;;  %s5634_s19 = inlined_call_operand.vmem [shape: f32[1,128], index: 19, kind: input, shape index: {}]   ;;  %s5635_s20 = inlined_call_operand.hbm [shape: f32[32,128], index: 20, kind: output, shape index: {0}]   ;;  %s5636_s21 = inlined_call_operand.hbm [shape: f32[2,128], index: 21, kind: output, shape index: {1}]   ;;  %s5637_s22 = inlined_call_operand.hbm [shape: f32[2,128], index: 22, kind: output, shape index: {2}]  }
   0x1   :  { %5661 = sst [smem:[#allocation27_spill]] %s5615_s0 }
   0x2   :  { %5662 = sst [smem:[#allocation28_spill]] %s5616_s1 }
   0x3   :  { %5663 = sst [smem:[#allocation29_spill]] %s5617_s2 }
   0x4   :  { %5664 = sst [smem:[#allocation30_spill]] %s5618_s3 }
   0x5   :  { %5665 = sst [smem:[#allocation31_spill]] %s5619_s4 }
   0x6   :  { %5666 = sst [smem:[#allocation32_spill]] %s5620_s5 }
   0x7   :  { %5667 = sst [smem:[#allocation33_spill]] %s5621_s6 }
   0x8   :  { %5668 = sst [smem:[#allocation34_spill]] %s5624_s9 }
   0x9   :  { %5669 = sst [smem:[#allocation35_spill]] %s5625_s10 }
   0xa   :  { %5670 = sst [smem:[#allocation36_spill]] %s5626_s11 }
   0xb   :  { %5671 = sst [smem:[#allocation37_spill]] %s5627_s12 }
   0xc   :  { %5672 = sst [smem:[#allocation38_spill]] %s5628_s13 }
   0xd   :  { %5673 = sst [smem:[#allocation39_spill]] %s5629_s14 }
   0xe   :  { %5674 = sst [smem:[#allocation40_spill]] %s5630_s15 }
   0xf   :  { %5675 = sst [smem:[#allocation41_spill]] %s5631_s16 }
  0x10   :  { %5676 = sst [smem:[#allocation42_spill]] %s5633_s18 }
  0x11   :  { %5677 = sst [smem:[#allocation43_spill]] %s5634_s19 }
  0x12   :  { %5678 = sst [smem:[#allocation44_spill]] %s5635_s20 }
  0x13   :  { %5679 = sst [smem:[#allocation45_spill]] %s5636_s21 }
  0x14   :  { %5680 = sst [smem:[#allocation46_spill]] %s5637_s22 }
  0x15   :  { %28 = vsyncpa [#allocation4], 0 }
  0x16   :  { %30 = vsyncpa [#allocation4 + $0x1], 0 }
  0x17   :  { %31 = vsyncpa [#allocation7], 0 }
  0x18   :  { %33 = vsyncpa [#allocation7 + $0x1], 0 }
  0x19   :  { %34 = vsyncpa [#allocation10], 0 }
  0x1a   :  { %36 = vsyncpa [#allocation10 + $0x1], 0 }
  0x1b   :  { %37 = vsyncpa [#allocation13], 0 }
  0x1c   :  { %38 = vsyncpa [#allocation5], 0 }
  0x1d   :  { %39 = vsyncpa [#allocation16], 0  ;;  %s4698_s3 = smov 0   ;;  %s4700_s28 = smov 0  }
  0x1e   :  { %s4702_s29 = smov 0   ;;  %s4704_s30 = smov 0  }
  0x1f LB: > { %5681 = sst [smem:[#allocation24_spill]] %s4556_s29  ;;  %s4719_s4 = sadd.s32 1, %s4560_s30   ;;  %s4560_s30 = sphi %s4704_s30, %s5729_s30   ;;  %s4556_s29 = sphi %s4702_s29, %s5731_s29   ;;  %s4552_s28 = sphi %s4700_s28, %s5733_s28   ;;  %s4548_s3 = sphi %s4698_s3, %s5732_s3  }
  0x20   : > { %5682 = sst [smem:[#allocation25_spill]] %s4719_s4  ;;  %s162_s0 = sadd.s32 1, %s4556_s29 }
  0x21   : > { %s159_s23 = ssub.s32 %s4560_s30, %s4719_s4  ;;  %p169_p0 = scmp.ne.s32.totalorder %s4556_s29, %s4552_s28 }
  0x22   : > { %p160_p1 = scmp.eq.s32.totalorder %s159_s23, 0  ;;  %p170_p2 = scmp.eq.s32.totalorder %s4560_s30, 0 }
  0x23   : > { %p3988_p3 = scmp.lt.s32.totalorder %s4560_s30, 2  ;;  %s4732_s5 = sand.u32 1, %s4556_s29  }
  0x24   : > { %s4729_s1 = scalar_select %p160_p1, %s4556_s29, %s162_s0  }
  0x25   : > { %p171_p4 = por %p170_p2, %p169_p0  ;;  %s5646_s24 = sand.u32 1, %s4560_s30  }
  0x26   : > { %5683 = sst [smem:[#allocation26_spill]] %s4729_s1  ;;  %s3528_s6 = sshll.u32 %s4732_s5, 6 }
  0x27   : > { %p4736_p5 = pnand %p3988_p3, %p171_p4  ;;  %s3660_s26 = sshll.u32 %s4560_s30, 10 }
  0x28   : > { %s5685_s4 = sld [smem:[#allocation33_spill]]  ;;  %s669_s0 = scalar_lea.vmem [#allocation6], %s3528_s6 }
  0x29   : > { %s5684_s25 = scalar_select %p4736_p5, 1, 0 }
  0x2a   : > { %s676_s1 = sshll.u32 %s669_s0, 4  ;;  %s4750_s29 = scalar_lea.sflag [#allocation7], %s5646_s24  ;;  %s4746_s1 = int_to_ptr.vmem [resolvable:$true] %s676_s1 }
  0x2b   : > { %p4756_p7 = pneg %p4736_p5 }
  0x2d   : > { %s5686_s20 = scalar_select %p4756_p7, 1, 0 }
  0x2e   : > { %s4744_s23 = scalar_lea.hbm %s5685_s4, %s3660_s26  ;;  %s4255_s6 = scalar_lea.hbm %s5685_s4, 2048 }
  0x2f   : > { %s4250_s22 = scalar_lea.hbm %s4744_s23, 1024  ;;  %p4256_p10 = scmp.lt.u32.totalorder %s4744_s23, %s5685_s4 }
  0x30   : > { %p4251_p6 = scmp.ne.s32.totalorder %s4744_s23, %s4250_s22  ;;  %p4257_p11 = scmp.lt.u32.totalorder %s4255_s6, %s4250_s22 }
  0x31   : > { %p4259_p13 = scmp.lt.u32.totalorder %s4250_s22, %s4744_s23 }
  0x32   : > { %p4253_p8 = pnand %p4756_p7, %p4251_p6  ;;  %p4258_p12 = por %p4257_p11, %p4256_p10 }
  0x34   : > { %p4254_p9 = pneg %p4253_p8  ;;  %p4260_p0 = por %p4259_p13, %p4258_p12 }
  0x36   : > { %p4261_p1 = pnand %p4260_p0, %p4254_p9 }
  0x38   : > { %4264 = shalt.err (!%p4261_p1)
}
  0x39   : > { %s4265_s24 = scalar_lea.vmem %s4746_s1, 1024  ;;  %s4562_s26 = smov [#allocation6]  }
  0x3a   : > { %p4266_p2 = scmp.ne.s32.totalorder %s4746_s1, %s4265_s24  ;;  %s4270_s2 = sshll.u32 %s4562_s26, 4  ;;  %s4271_s2 = int_to_ptr.vmem [resolvable:$false] %s4270_s2 }
  0x3b   : > { %s4272_s27 = scalar_lea.vmem %s4271_s2, 2048  ;;  %p4273_p6 = scmp.lt.s32.totalorder %s4746_s1, %s4271_s2 }
  0x3c   : > { %p4268_p3 = pnand %p4266_p2, %p4756_p7  ;;  %p4274_p8 = scmp.lt.s32.totalorder %s4272_s27, %s4265_s24 }
  0x3e   : > { %p4269_p4 = pneg %p4268_p3  ;;  %p4275_p10 = por %p4274_p8, %p4273_p6 }
  0x40   : > { %p4276_p11 = pnand %p4275_p10, %p4269_p4 }
  0x42   : > { %4279 = shalt.err (!%p4276_p11)
}
  0x43   : > { %s5650_s22 = smov 64   ;;  %s5651_s6 = smov 4  }
  0x44   : > { %3977 = dma.hbm_to_vmem [thread:$0]  (!%p4736_p5), %s4744_s23, 1024, %s4746_s1, %s4750_s29, %s5650_s22, %s5650_s22, %s5651_s6  }
  0x45   : > { %s3534_s24 = sshll.u32 %s4560_s30, 4  ;;  %s749_s0 = scalar_lea.vmem [#allocation9], %s4732_s5 }
  0x46   : > { %s756_s26 = sshll.u32 %s749_s0, 4  ;;  %s5687_s14 = sld [smem:[#allocation39_spill]]  ;;  %s757_s26 = int_to_ptr.vmem [resolvable:$true] %s756_s26 }
  0x47   : > { %s5688_s21 = sand.u32 1, %s4560_s30  }
  0x48   : > { %s4794_s19 = scalar_lea.sflag [#allocation10], %s5688_s21 }
  0x4c   : > { %s4790_s4 = scalar_lea.hbm %s5687_s14, %s3534_s24  ;;  %s4285_s0 = scalar_lea.hbm %s5687_s14, 32 }
  0x4d   : > { %s4280_s18 = scalar_lea.hbm %s4790_s4, 16  ;;  %p4286_p0 = scmp.lt.u32.totalorder %s4790_s4, %s5687_s14 }
  0x4e   : > { %p4281_p9 = scmp.ne.s32.totalorder %s4790_s4, %s4280_s18  ;;  %p4287_p1 = scmp.lt.u32.totalorder %s4285_s0, %s4280_s18 }
  0x4f   : > { %p4289_p3 = scmp.lt.u32.totalorder %s4280_s18, %s4790_s4 }
  0x50   : > { %p4283_p12 = pnand %p4281_p9, %p4756_p7  ;;  %p4288_p2 = por %p4287_p1, %p4286_p0 }
  0x52   : > { %p4284_p13 = pneg %p4283_p12  ;;  %p4290_p4 = por %p4289_p3, %p4288_p2 }
  0x54   : > { %p4291_p6 = pnand %p4290_p4, %p4284_p13 }
  0x56   : > { %4294 = shalt.err (!%p4291_p6)
}
  0x57   : > { %s4295_s21 = scalar_lea.vmem %s757_s26, 16  ;;  %s4565_s22 = smov [#allocation9]  }
  0x58   : > { %p4296_p8 = scmp.ne.s32.totalorder %s757_s26, %s4295_s21  ;;  %s4300_s6 = sshll.u32 %s4565_s22, 4  ;;  %s4301_s6 = int_to_ptr.vmem [resolvable:$false] %s4300_s6 }
  0x59   : > { %s4302_s1 = scalar_lea.vmem %s4301_s6, 32  ;;  %p4303_p9 = scmp.lt.s32.totalorder %s757_s26, %s4301_s6 }
  0x5a   : > { %p4298_p10 = pnand %p4296_p8, %p4756_p7  ;;  %p4304_p12 = scmp.lt.s32.totalorder %s4302_s1, %s4295_s21 }
  0x5c   : > { %p4299_p11 = pneg %p4298_p10  ;;  %p4305_p5 = por %p4304_p12, %p4303_p9 }
  0x5e   : > { %p4306_p0 = pnand %p4305_p5, %p4299_p11 }
  0x60   : > { %4309 = shalt.err (!%p4306_p0)
}
  0x61   : > { %p5689_p1 = scmp.ne.s32.totalorder %s5684_s25, 0  ;;  %s5690_s15 = sld [smem:[#allocation40_spill]] }
  0x62   : > { %s4822_s23 = sadd.s32 4294967295, %s4560_s30   ;;  %p175_p5 = scmp.ne.s32.totalorder %s4552_s28, %s4548_s3 }
  0x63   : > { %3983 = dma.hbm_to_vmem [thread:$0]  (!%p5689_p1), %s4790_s4, 16, %s757_s26, %s4794_s19  }
  0x64   : > { %p5655_p13 = scmp.eq.s32.totalorder %s4822_s23, 0  ;;  %p3524_p2 = scmp.ge.s32.totalorder %s4560_s30, 1 }
  0x65   : > { %p593_p3 = scmp.lt.s32.totalorder %s4560_s30, 3  ;;  %s4566_s26 = smov [#allocation12]  }
  0x66   : > { %p4831_p4 = por %p5655_p13, %p175_p5  ;;  %s621_s0 = sshll.u32 %s4566_s26, 4  ;;  %s622_s0 = int_to_ptr.vmem [resolvable:$true] %s621_s0 }
  0x67   : > { %s4819_s6 = scalar_lea.hbm %s5690_s15, %s3534_s24  ;;  %p4836_p8 = pnand %p3524_p2, %p593_p3 }
  0x68   : > { %s5691_s4 = scalar_select %p4831_p4, 1, 0 }
  0x69   : > { %s5692_s24 = scalar_select %p4836_p8, 1, 0 }
  0x6a   : > { %p3967_p10 = pneg %p4836_p8  ;;  %s3937_s3 = smul.u32 3, %s4732_s5 }
  0x6b   : > { %s3938_s21 = smul.u32 48, %s4560_s30  ;;  %s5694_s22 = sld [smem:[#allocation32_spill]] }
  0x6c   : > { %p4846_p11 = pnand %p3967_p10, %p5655_p13  ;;  %s4310_s26 = scalar_lea.hbm %s5632_s17, 16 }
  0x6d   : > { %p4311_p9 = scmp.ne.s32.totalorder %s5632_s17, %s4310_s26  ;;  %p4317_p2 = scmp.lt.u32.totalorder %s4310_s26, %s5632_s17 }
  0x6e   : > { %p4312_p12 = pneg %p4846_p11 }
  0x70   : > { %p4313_p0 = pnand %p4312_p12, %p4311_p9 }
  0x71   : > { %s4854_s14 = scalar_lea.hbm %s5694_s22, %s3938_s21 }
  0x72   : > { %p4314_p5 = pneg %p4313_p0 }
  0x74   : > { %p4319_p3 = pnand %p4317_p2, %p4314_p5 }
  0x76   : > { %4322 = shalt.err (!%p4319_p3)
}
  0x77   : > { %s4323_s21 = scalar_lea.vmem %s622_s0, 16  ;;  %s4330_s13 = scalar_lea.vmem %s622_s0, 32 }
  0x78   : > { %p4324_p10 = scmp.ne.s32.totalorder %s622_s0, %s4323_s21  ;;  %p4331_p4 = scmp.lt.s32.totalorder %s622_s0, %s622_s0 }
  0x79   : > { %p4332_p8 = scmp.lt.s32.totalorder %s4330_s13, %s4323_s21 }
  0x7a   : > { %p4326_p6 = pnand %p4324_p10, %p4312_p12 }
  0x7b   : > { %p4333_p1 = por %p4332_p8, %p4331_p4 }
  0x7c   : > { %p4327_p13 = pneg %p4326_p6 }
  0x7e   : > { %p4334_p7 = pnand %p4333_p1, %p4327_p13 }
  0x80   : > { %4337 = shalt.err (!%p4334_p7)
}
  0x81   : > { %3970 = dma.hbm_to_vmem [thread:$0]  (!%p4846_p11), %s5632_s17, 16, %s622_s0, [#allocation13]  }
  0x82   : > { %s650_s9 = scalar_lea.vmem [#allocation3], %s3937_s3  ;;  %s3661_s2 = sshll.u32 %s4560_s30, 11 }
  0x83   : > { %s658_s16 = sshll.u32 %s650_s9, 4  ;;  %s5695_s12 = sld [smem:[#allocation37_spill]]  ;;  %s4873_s16 = int_to_ptr.vmem [resolvable:$true] %s658_s16 }
  0x84   : > { %s647_s26 = scalar_lea.sflag [#allocation4], %s4732_s5  ;;  %s4338_s21 = scalar_lea.hbm %s4854_s14, 48 }
  0x85   : > { %p4339_p7 = scmp.ne.s32.totalorder %s4854_s14, %s4338_s21  ;;  %p5696_p1 = scmp.ne.s32.totalorder %s5686_s20, 0 }
  0x86   : > { %s4343_s0 = scalar_lea.hbm %s5694_s22, 96  ;;  %p4344_p6 = scmp.lt.u32.totalorder %s4854_s14, %s5694_s22 }
  0x87   : > { %p4341_p13 = pnand %p4339_p7, %p5696_p1  ;;  %p4345_p8 = scmp.lt.u32.totalorder %s4343_s0, %s4338_s21 }
  0x88   : > { %p4347_p9 = scmp.lt.u32.totalorder %s4338_s21, %s4854_s14 }
  0x89   : > { %s4878_s27 = scalar_lea.hbm %s5695_s12, %s3661_s2  ;;  %p4342_p4 = pneg %p4341_p13 }
  0x8a   : > { %p4346_p11 = por %p4345_p8, %p4344_p6 }
  0x8c   : > { %p4348_p12 = por %p4347_p9, %p4346_p11 }
  0x8e   : > { %p4349_p0 = pnand %p4348_p12, %p4342_p4 }
  0x90   : > { %4352 = shalt.err (!%p4349_p0)
}
  0x91   : > { %s4353_s30 = scalar_lea.vmem %s4873_s16, 48  ;;  %s4567_s9 = smov [#allocation3]  }
  0x92   : > { %p4354_p5 = scmp.ne.s32.totalorder %s4873_s16, %s4353_s30  ;;  %s4358_s2 = sshll.u32 %s4567_s9, 4  ;;  %s4359_s2 = int_to_ptr.vmem [resolvable:$false] %s4358_s2 }
  0x93   : > { %s4360_s1 = scalar_lea.vmem %s4359_s2, 96  ;;  %p4361_p10 = scmp.lt.s32.totalorder %s4873_s16, %s4359_s2 }
  0x94   : > { %p4356_p2 = pnand %p4354_p5, %p5696_p1  ;;  %p4362_p7 = scmp.lt.s32.totalorder %s4360_s1, %s4353_s30 }
  0x96   : > { %p4357_p3 = pneg %p4356_p2  ;;  %p4363_p13 = por %p4362_p7, %p4361_p10 }
  0x98   : > { %p4364_p6 = pnand %p4363_p13, %p4357_p3 }
  0x9a   : > { %4367 = shalt.err (!%p4364_p6)
}
  0x9b   : > { %p5697_p4 = scmp.ne.s32.totalorder %s5684_s25, 0  ;;  %s5698_s18 = sshll.u32 %s4732_s5, 7 }
  0x9c   : > { %s723_s21 = scalar_lea.vmem [#allocation8], %s5698_s18  ;;  %s766_s10 = scalar_lea.vmem [#allocation11], %s4732_s5 }
  0x9d   : > { %3974 = dma.hbm_to_vmem [thread:$0]  (!%p5697_p4), %s4854_s14, 48, %s4873_s16, %s647_s26  }
  0x9e   : > { %s730_s13 = sshll.u32 %s723_s21, 4  ;;  %s4907_s0 = sshll.u32 %s766_s10, 4  ;;  %s4904_s13 = int_to_ptr.vmem [resolvable:$true] %s730_s13  ;;  %s774_s0 = int_to_ptr.vmem [resolvable:$true] %s4907_s0 }
  0x9f   : > { %s4368_s3 = scalar_lea.hbm %s4878_s27, 2048  ;;  %s4373_s9 = scalar_lea.hbm %s5695_s12, 4096 }
  0xa0   : > { %p4369_p8 = scmp.ne.s32.totalorder %s4878_s27, %s4368_s3  ;;  %p4374_p12 = scmp.lt.u32.totalorder %s4878_s27, %s5695_s12 }
  0xa1   : > { %p4375_p0 = scmp.lt.u32.totalorder %s4373_s9, %s4368_s3  ;;  %p4377_p2 = scmp.lt.u32.totalorder %s4368_s3, %s4878_s27 }
  0xa2   : > { %p4371_p11 = pnand %p4369_p8, %p5696_p1 }
  0xa3   : > { %p4376_p5 = por %p4375_p0, %p4374_p12 }
  0xa4   : > { %p4372_p9 = pneg %p4371_p11 }
  0xa5   : > { %p4378_p3 = por %p4377_p2, %p4376_p5 }
  0xa7   : > { %p4379_p10 = pnand %p4378_p3, %p4372_p9 }
  0xa9   : > { %4382 = shalt.err (!%p4379_p10)
}
  0xaa   : > { %s4383_s14 = scalar_lea.vmem %s4904_s13, 2048  ;;  %s4568_s5 = smov [#allocation8]  }
  0xab   : > { %p4384_p7 = scmp.ne.s32.totalorder %s4904_s13, %s4383_s14  ;;  %s4388_s16 = sshll.u32 %s4568_s5, 4  ;;  %s4389_s16 = int_to_ptr.vmem [resolvable:$false] %s4388_s16 }
  0xac   : > { %s4390_s26 = scalar_lea.vmem %s4389_s16, 4096  ;;  %p4391_p8 = scmp.lt.s32.totalorder %s4904_s13, %s4389_s16 }
  0xad   : > { %p4386_p13 = pnand %p4384_p7, %p5696_p1  ;;  %p4392_p11 = scmp.lt.s32.totalorder %s4390_s26, %s4383_s14 }
  0xaf   : > { %p4387_p6 = pneg %p4386_p13  ;;  %p4393_p12 = por %p4392_p11, %p4391_p8 }
  0xb1   : > { %p4394_p0 = pnand %p4393_p12, %p4387_p6 }
  0xb3   : > { %4397 = shalt.err (!%p4394_p0)
}
  0xb4   : > { %s5699_s18 = smov 4   ;;  %s5700_s21 = smov 64  }
  0xb5   : > { %3980 = dma.hbm_to_vmem [thread:$0]  (!%p5697_p4), %s4878_s27, 2048, %s4904_s13, %s4750_s29, %s5700_s21, %s5700_s21, %s5699_s18  }
  0xb6   : > { %s4398_s10 = scalar_lea.hbm %s4819_s6, 16  ;;  %s4403_s30 = scalar_lea.hbm %s5690_s15, 32 }
  0xb7   : > { %p4399_p9 = scmp.ne.s32.totalorder %s4819_s6, %s4398_s10  ;;  %p4404_p3 = scmp.lt.u32.totalorder %s4819_s6, %s5690_s15 }
  0xb8   : > { %p4405_p10 = scmp.lt.u32.totalorder %s4403_s30, %s4398_s10  ;;  %p4407_p13 = scmp.lt.u32.totalorder %s4398_s10, %s4819_s6 }
  0xb9   : > { %p4401_p5 = pnand %p4399_p9, %p5696_p1 }
  0xba   : > { %p4406_p7 = por %p4405_p10, %p4404_p3 }
  0xbb   : > { %p4402_p2 = pneg %p4401_p5 }
  0xbc   : > { %p4408_p6 = por %p4407_p13, %p4406_p7 }
  0xbe   : > { %p4409_p8 = pnand %p4408_p6, %p4402_p2 }
  0xc0   : > { %4412 = shalt.err (!%p4409_p8)
}
  0xc1   : > { %s4413_s29 = scalar_lea.vmem %s774_s0, 16  ;;  %s4569_s27 = smov [#allocation11]  }
  0xc2   : > { %p4414_p11 = scmp.ne.s32.totalorder %s774_s0, %s4413_s29  ;;  %s4418_s13 = sshll.u32 %s4569_s27, 4  ;;  %s4419_s13 = int_to_ptr.vmem [resolvable:$false] %s4418_s13 }
  0xc3   : > { %s4420_s1 = scalar_lea.vmem %s4419_s13, 32  ;;  %p4421_p9 = scmp.lt.s32.totalorder %s774_s0, %s4419_s13 }
  0xc4   : > { %p4416_p12 = pnand %p4414_p11, %p5696_p1  ;;  %p4422_p5 = scmp.lt.s32.totalorder %s4420_s1, %s4413_s29 }
  0xc6   : > { %p4417_p0 = pneg %p4416_p12  ;;  %p4423_p4 = por %p4422_p5, %p4421_p9 }
  0xc8   : > { %p4424_p3 = pnand %p4423_p4, %p4417_p0 }
  0xca   : > { %4427 = shalt.err (!%p4424_p3)
}
  0xcb   : > { %p5701_p10 = scmp.ne.s32.totalorder %s5684_s25, 0  ;;  %p5702_p2 = scmp.ne.s32.totalorder %s5692_s24, 0 }
  0xcc   : > { %s4956_s20 = sand.u32 (!%p5702_p2), 1, %s4552_s28   ;;  %p5703_p1 = scmp.ne.s32.totalorder (!%p5702_p2), %s5691_s4, 0 }
  0xcd   : > { %3986 = dma.hbm_to_vmem [thread:$0]  (!%p5701_p10), %s4819_s6, 16, %s774_s0, %s4794_s19  }
  0xce   : > { %782 = sbr.rel (%p5702_p2) target bundleno = 3774 (0xebe), region = 100  ;;  %s785_s5 = scalar_lea.sflag (!%p5702_p2), [#allocation4], %s4956_s20 }
  0xcf   : > { %s3939_s14 = smul.u32 (!%p5702_p2), 3, %s4956_s20 }
  0xd1   : > { %s4960_s16 = scalar_lea.vmem (!%p5702_p2), [#allocation3], %s3939_s14 }
  0xd5   : > { %4523 = dma.done.wait (%p5703_p1), %s785_s5, 48  }
  0xd6   : > { %4525 = vsyncadd (%p5703_p1), %s785_s5, 4294967248  ;;  %s793_s19 = sand.u32 1, %s4822_s23   ;;  %s3537_s25 = sshll.u32 %s4956_s20, 6 }
  0xd7   : > { %s794_s6 = scalar_lea.sflag [#allocation7], %s793_s19  ;;  %s4968_s24 = scalar_lea.vmem [#allocation6], %s3537_s25 }
  0xd8   : > { %4527 = dma.done.wait (%p5703_p1), %s794_s6, 3072  }
  0xd9   : > { %4529 = vsyncadd (%p5703_p1), %s794_s6, 4294964224  ;;  %s3538_s0 = sshll.u32 %s4956_s20, 7  ;;  %s812_s18 = scalar_lea.sflag [#allocation10], %s793_s19 }
  0xda   : > { %s4975_s26 = scalar_lea.vmem [#allocation8], %s3538_s0 }
  0xdb   : > { %4531 = dma.done.wait (%p5703_p1), %s812_s18, 32  }
  0xdc   : > { %4533 = vsyncadd (%p5703_p1), %s812_s18, 4294967264  ;;  %p5704_p4 = scmp.eq.s32.totalorder %s4822_s23, 0 }
  0xde   : > { %4535 = dma.done.wait (%p5704_p4), [#allocation13], 16   ;;  %p5705_p7 = pmov %p5704_p4 }
  0xdf   : > { %p926_p13 = scmp.lt.s32.totalorder %s4822_s23, 1  ;;  %s5706_s14 = sld [smem:[#allocation34_spill]] }
  0xe0   : > { %4537 = vsyncadd (%p5705_p7), [#allocation13], 4294967280  ;;  %s5707_s6 = sld [smem:[#allocation31_spill]]  ;;  %s5708_s12 = sld [smem:[#allocation35_spill]] }
  0xe1   : > { %s4989_s3 = scalar_select %p926_p13, %s4822_s23, 1 }
  0xe2   : > { %s5709_s2 = sld [smem:[#allocation36_spill]]  ;;  %s5710_s1 = sld [smem:[#allocation38_spill]] }
  0xe3   : > { %s3940_s4 = smul.u32 192, %s4989_s3  ;;  %s3662_s18 = sshll.u32 %s4989_s3, 7 }
  0xe4   : > { %s3543_s11 = sshll.u32 %s4989_s3, 1  ;;  %p5711_p6 = scmp.ne.s32.totalorder %s4822_s23, 0 }
  0xe5   : > { %s939_s5 = scalar_lea.vmem %s5706_s14, %s4989_s3  ;;  %s5712_s25 = sld [smem:[#allocation27_spill]] (!%p5711_p6) }
  0xe6   : > { %s5007_s0 = scalar_lea.vmem %s5707_s6, %s3940_s4  ;;  %s5013_s15 = scalar_lea.vmem %s5708_s12, %s3662_s18 }
  0xe7   : > { %956 = sbr.rel (%p5711_p6) target bundleno = 556 (0x22c), region = 128  ;;  %s5713_s30 = sld [smem:[#allocation29_spill]] (!%p5711_p6) }
  0xe8   : > { %s5019_s29 = scalar_lea.vmem %s5709_s2, %s3543_s11  ;;  %s951_s14 = scalar_lea.vmem %s5710_s1, %s4989_s3 }
  0xe9   : > { %s5714_s1 = sld [smem:[#allocation30_spill]] (!%p5711_p6) }
  0xeb   : > { %v957_v0 = vld [vmem:[%s5712_s25] sm:$0xff] (!%p5711_p6)  ;;  %v959_v1 = vld [vmem:[%s5712_s25 + $0x10] sm:$0xff] (!%p5711_p6)  ;;  %v958_v2 = vld [vmem:[%s5712_s25 + $0x8] sm:$0xff] (!%p5711_p6) }
  0xec   : > { %963 = vadd.xlane.f32.xlu0 (!%p5711_p6), %v957_v0  ;;  %967 = vadd.xlane.f32.xlu1 (!%p5711_p6), %v959_v1  ;;  %v960_v3 = vld [vmem:[%s5712_s25 + $0x18] sm:$0xff] (!%p5711_p6) }
  0xed   : > { %v3545_v33 = vld [vmem:[%s5713_s30] ss:$0 sm:$0xff] (!%p5711_p6) }
  0xef   : > { %v3546_v35 = vld [vmem:[%s5714_s1] ss:$0 sm:$0xff] }
  0xf0   : > { %965 = vadd.xlane.f32.xlu0 %v958_v2  ;;  %969 = vadd.xlane.f32.xlu1 %v960_v3 }
 0x179   : > { %v964_v4 = vpop.xlane.xlu0 %963  ;;  %v968_v5 = vpop.xlane.xlu1 %967 }
 0x17a   : > { %v972_v6 = vmul.f32 0.0078125, %v964_v4  ;;  %v974_v7 = vmul.f32 0.0078125, %v968_v5 }
 0x17c   : > { %v976_v8 = vsub.f32 %v957_v0, %v972_v6  ;;  %v978_v9 = vsub.f32 %v959_v1, %v974_v7 }
 0x17d   : > { %v966_v10 = vpop.xlane.xlu0 %965  ;;  %v970_v11 = vpop.xlane.xlu1 %969 }
 0x17e   : > { %v973_v12 = vmul.f32 0.0078125, %v966_v10  ;;  %v980_v13 = vmul.f32 %v976_v8, %v976_v8  ;;  %v975_v14 = vmul.f32 0.0078125, %v970_v11  ;;  %v982_v17 = vmul.f32 %v978_v9, %v978_v9 }
 0x180   : > { %v977_v15 = vsub.f32 %v958_v2, %v973_v12  ;;  %984 = vadd.xlane.f32.xlu0 %v980_v13  ;;  %v979_v16 = vsub.f32 %v960_v3, %v975_v14 }
 0x182   : > { %v981_v18 = vmul.f32 %v977_v15, %v977_v15  ;;  %v983_v19 = vmul.f32 %v979_v16, %v979_v16 }
 0x184   : > { %988 = vadd.xlane.f32.xlu0 %v982_v17  ;;  %986 = vadd.xlane.f32.xlu1 %v981_v18 }
 0x188   : > { %990 = vadd.xlane.f32.xlu1 %v983_v19 }
 0x20d   : > { %v985_v20 = vpop.xlane.xlu0 %984 }
 0x20e   : > { %v992_v21 = vmul.f32 0.0078125, %v985_v20 }
 0x210   : > { %v996_v22 = vadd.f32 1e-12, %v992_v21 }
 0x211   : > { %v987_v23 = vpop.xlane.xlu1 %986  ;;  %v989_v24 = vpop.xlane.xlu0 %988 }
 0x212   : > { %4044 = vrsqrt.f32 %v996_v22  ;;  %v993_v25 = vmul.f32 0.0078125, %v987_v23  ;;  %v994_v26 = vmul.f32 0.0078125, %v989_v24 }
 0x214   : > { %v997_v27 = vadd.f32 1e-12, %v993_v25  ;;  %v998_v28 = vadd.f32 1e-12, %v994_v26 }
 0x215   : > { %v991_v29 = vpop.xlane.xlu1 %990 }
 0x216   : > { %4046 = vrsqrt.f32 %v997_v27  ;;  %v995_v30 = vmul.f32 0.0078125, %v991_v29 }
 0x217   : > { %4048 = vrsqrt.f32 %v998_v28 }
 0x218   : > { %v999_v31 = vadd.f32 1e-12, %v995_v30 }
 0x21a   : > { %4050 = vrsqrt.f32 %v999_v31 }
 0x21c   : > { %v4045_v32 = vpop.eup %4044 }
 0x21d   : > { %v1004_v34 = vmul.f32 %v4045_v32, %v976_v8 }
 0x21f   : > { %v1014_v36 = vmul.f32 %v3545_v33, %v1004_v34 }
 0x220   : > { %v4047_v37 = vpop.eup %4046 }
 0x221   : > { %v4049_v38 = vpop.eup %4048  ;;  %v1024_v39 = vadd.f32 %v3546_v35, %v1014_v36  ;;  %v1005_v40 = vmul.f32 %v4047_v37, %v977_v15 }
 0x222   : > { %v1006_v41 = vmul.f32 %v4049_v38, %v978_v9 }
 0x223   : > { %1028 = vst [vmem:[#allocation14] sm:$0xff] %v1024_v39  ;;  %v1015_v42 = vmul.f32 %v3545_v33, %v1005_v40 }
 0x224   : > { %v4051_v43 = vpop.eup %4050  ;;  %v1016_v44 = vmul.f32 %v3545_v33, %v1006_v41 }
 0x225   : > { %v1025_v45 = vadd.f32 %v3546_v35, %v1015_v42  ;;  %v1007_v46 = vmul.f32 %v4051_v43, %v979_v16 }
 0x226   : > { %v1026_v47 = vadd.f32 %v3546_v35, %v1016_v44 }
 0x227   : > { %1029 = vst [vmem:[#allocation14 + $0x8] sm:$0xff] %v1025_v45  ;;  %v1017_v48 = vmul.f32 %v3545_v33, %v1007_v46 }
 0x228   : > { %1030 = vst [vmem:[#allocation14 + $0x10] sm:$0xff] %v1026_v47 }
 0x229   : > { %v1027_v49 = vadd.f32 %v3546_v35, %v1017_v48 }
 0x22b   : > { %1031 = vst [vmem:[#allocation14 + $0x18] sm:$0xff] %v1027_v49 }
 0x22c PF: > { %v4052_v50 = vld [vmem:[%s5007_s0 + $0x4] ss:$12 sps:$4 sm:$0xff]   ;;  %v4054_v51 = vld [vmem:[%s5007_s0] ss:$12 sps:$4 sm:$0xff]   ;;  %v4570_v52 = vmov 0   ;;  %v4571_v9 = vmov 0.0   ;;  %v1072_v18 = vlaneseq  ;;  %s5716_s9 = scalar_lea.vmem %s5622_s7, %s4989_s3  ;;  %s5717_s27 = scalar_lea.vmem %s5623_s8, %s4989_s3 }
 0x22d   : > { %1247 = vmatprep.mubr.bf16.mxu0 %v4570_v52  ;;  %1215 = vmatprep.subr.bf16.mxu0 %v4052_v50  ;;  %v4055_v53 = vld [vmem:[%s5007_s0 + $0x1c] ss:$12 sps:$4 sm:$0xff]   ;;  %v4057_v54 = vld [vmem:[%s5007_s0 + $0x18] ss:$12 sps:$4 sm:$0xff]   ;;  %v4058_v55 = vld [vmem:[%s5007_s0 + $0x34] ss:$12 sps:$4 sm:$0xff]  }
 0x22e   : > { %1216 = vmatpush1.bf16.msra.mxu0 %v4054_v51  ;;  %v4060_v56 = vld [vmem:[%s5007_s0 + $0x30] ss:$12 sps:$4 sm:$0xff]   ;;  %v4061_v57 = vld [vmem:[%s5007_s0 + $0x4c] ss:$12 sps:$4 sm:$0xff]   ;;  %v4063_v59 = vld [vmem:[%s5007_s0 + $0x48] ss:$12 sps:$4 sm:$0xff]  }
 0x22f   : > { %1217 = vmatprep.subr.bf16.mxu0 %v4055_v53  ;;  %v1032_v58 = vld [vmem:[#allocation14] sm:$0xff]  ;;  %v1033_v60 = vld [vmem:[#allocation14 + $0x8] sm:$0xff]  ;;  %v4067_v0 = vld [vmem:[%s5007_s0 + $0x7c] ss:$12 sps:$4 sm:$0xff]   ;;  %vm4572_vm0 = vmmov 0   ;;  %v5077_v19 = vshrl.u32 %v1072_v18, 7 }
 0x230   : > { %v4064_v61 = vld [vmem:[%s5007_s0 + $0x64] ss:$12 sps:$4 sm:$0xff]   ;;  %v1036_v62 = vpack.c.bf16 %v1033_v60, %v1032_v58  ;;  %v4066_v63 = vld [vmem:[%s5007_s0 + $0x60] ss:$12 sps:$4 sm:$0xff]   ;;  %v4075_v5 = vld [vmem:[%s5007_s0 + $0xa8] ss:$12 sps:$4 sm:$0xff]  }
 0x231   : > { %v4069_v1 = vld [vmem:[%s5007_s0 + $0x78] ss:$12 sps:$4 sm:$0xff]   ;;  %v4070_v2 = vld [vmem:[%s5007_s0 + $0x94] ss:$12 sps:$4 sm:$0xff]   ;;  %v4072_v3 = vld [vmem:[%s5007_s0 + $0x90] ss:$12 sps:$4 sm:$0xff]  }
 0x232   : > { %1218 = vmatpush1.bf16.msra.mxu0 %v4057_v54  ;;  %3777 = vmatprep.mubr.bf16.mxu1 %v1036_v62  ;;  %v4073_v4 = vld [vmem:[%s5007_s0 + $0xac] ss:$12 sps:$4 sm:$0xff]   ;;  %v1034_v6 = vld [vmem:[#allocation14 + $0x10] sm:$0xff]  ;;  %v1035_v7 = vld [vmem:[#allocation14 + $0x18] sm:$0xff]  ;;  %v5080_v20 = vsub.s32 0, %v5077_v19  ;;  %v5086_v22 = vsub.s32 1, %v5077_v19 }
 0x233   : > { %1219 = vmatprep.subr.bf16.mxu0 %v4058_v55  ;;  %v1037_v8 = vpack.c.bf16 %v1035_v7, %v1034_v6  ;;  %v4076_v10 = vld [vmem:[%s5007_s0 + $0x8] ss:$12 sps:$4 sm:$0xff]   ;;  %v4077_v11 = vld [vmem:[%s5007_s0 + $0x20] ss:$12 sps:$4 sm:$0xff]   ;;  %v4078_v12 = vld [vmem:[%s5007_s0 + $0x38] ss:$12 sps:$4 sm:$0xff]  }
 0x234   : > { %3761 = vmatprep.subr.bf16.mxu1 %v4076_v10  ;;  %v4079_v13 = vld [vmem:[%s5007_s0 + $0x50] ss:$12 sps:$4 sm:$0xff]   ;;  %v4080_v14 = vld [vmem:[%s5007_s0 + $0x68] ss:$12 sps:$4 sm:$0xff]   ;;  %v4081_v15 = vld [vmem:[%s5007_s0 + $0x80] ss:$12 sps:$4 sm:$0xff]  }
 0x235   : > { %3762 = vmatpush3.bf16.msra.mxu1 %v4076_v10  ;;  %v4082_v16 = vld [vmem:[%s5007_s0 + $0x98] ss:$12 sps:$4 sm:$0xff]   ;;  %v4083_v17 = vld [vmem:[%s5007_s0 + $0xb0] ss:$12 sps:$4 sm:$0xff]   ;;  %vm1325_vm1 = vcmask 261120   ;;  %s4574_s0 = smov 96  }
 0x236   : > { %1220 = vmatpush1.bf16.msra.mxu0 %v4060_v56  ;;  %3763 = vmatprep.subr.bf16.mxu1 %v4077_v11  ;;  %v5083_v21 = vld [vmem:[%s4960_s16] sm:$0x7]  ;;  %s4573_s16 = smov 64   ;;  %s4575_s4 = smov 32   ;;  %v1082_v54 = vsub.s32 2, %v5077_v19  ;;  %vm1373_vm2 = vcmask 130048  }
 0x237   : > { %1221 = vmatprep.subr.bf16.mxu0 %v4061_v57  ;;  %v1075_v23 = vrot.slane %v5083_v21, %v5080_v20  ;;  %v1079_v25 = vrot.slane %v5083_v21, %v5086_v22  ;;  %s5715_s12 = sld [smem:[#allocation28_spill]]  ;;  %vm1575_vm3 = vcmask 523520   ;;  %vm1707_vm4 = vcmask 785920   ;;  %s5720_s3 = scalar_lea.vmem [#allocation9], %s4956_s20 }
 0x238   : > { %v1083_v56 = vrot.slane %v5083_v21, %v1082_v54  ;;  %vm1839_vm5 = vcmask 1048320   ;;  %p3633_p8 = scmp.ne.s32.totalorder %s4822_s23, 1 }
 0x239   : > { %3764 = vmatpush3.bf16.msra.mxu1 %v4077_v11  ;;  %s5722_s13 = sld [smem:[#allocation41_spill]] (!%p3633_p8)  ;;  %vm4577_vm6 = vmmov (!%p3633_p8), 0   ;;  %vm3030_vm7 = vcmask (!%p3633_p8), 1040384   ;;  %s5724_s6 = sld [smem:[#allocation43_spill]] (!%p3633_p8) }
 0x23a   : > { %1222 = vmatpush1.bf16.msra.mxu0 %v4063_v59  ;;  %3765 = vmatprep.subr.bf16.mxu1 %v4078_v12 }
 0x23b   : > { %1223 = vmatprep.subr.bf16.mxu0 %v4064_v61 }
 0x23d   : > { %3766 = vmatpush3.bf16.msra.mxu1 %v4078_v12 }
 0x23e   : > { %1224 = vmatpush1.bf16.msra.mxu0 %v4066_v63  ;;  %3767 = vmatprep.subr.bf16.mxu1 %v4079_v13 }
 0x23f   : > { %1225 = vmatprep.subr.bf16.mxu0 %v4067_v0 }
 0x241   : > { %3768 = vmatpush3.bf16.msra.mxu1 %v4079_v13 }
 0x242   : > { %1226 = vmatpush1.bf16.msra.mxu0 %v4069_v1  ;;  %3769 = vmatprep.subr.bf16.mxu1 %v4080_v14 }
 0x243   : > { %1227 = vmatprep.subr.bf16.mxu0 %v4070_v2 }
 0x245   : > { %3770 = vmatpush3.bf16.msra.mxu1 %v4080_v14 }
 0x246   : > { %1228 = vmatpush1.bf16.msra.mxu0 %v4072_v3  ;;  %3771 = vmatprep.subr.bf16.mxu1 %v4081_v15 }
 0x247   : > { %1229 = vmatprep.subr.bf16.mxu0 %v4073_v4 }
 0x249   : > { %3772 = vmatpush3.bf16.msra.mxu1 %v4081_v15  ;;  %v1317_v15 = vld [vmem:[%s5715_s12] sm:$0x3]  ;;  %s5723_s12 = sld [smem:[#allocation42_spill]] (!%p3633_p8) }
 0x24a   : > { %1230 = vmatpush1.bf16.msra.mxu0 %v4075_v5  ;;  %3773 = vmatprep.subr.bf16.mxu1 %v4082_v16 }
 0x24b   : > { %3781 = vmatprep.subr.bf16.mxu0 %v4571_v9 }
 0x24d   : > { %1248 = vmatmul.mubr.bf16.vlgmr.msra.gmra.mrb[0].mxu0 %v1036_v62  ;;  %3774 = vmatpush3.bf16.msra.mxu1 %v4082_v16  ;;  %v1324_v16 = vrot.slane %v1317_v15, %v5080_v20 }
 0x24e   : > { %1257 = vmatprep.mubr.bf16.mxu0 %v4570_v52  ;;  %3775 = vmatprep.subr.bf16.mxu1 %v4083_v17 }
 0x251   : > { %3776 = vmatpush3.bf16.msra.mxu1 %v4083_v17 }
 0x252   : > { %3793 = vmatprep.subr.bf16.mxu1 %v4571_v9 }
 0x254   : > { %3778 = vmatmul.mubr.bf16.vlgmr.msra.gmra.mrb[0].mxu1 %v1037_v8 }
 0x255   : > { %1258 = vmatmul.mubr.bf16.gmra.mrb[4].mxu0 %v1037_v8  ;;  %3795 = vmatprep.mubr.msk.bf16.mxu1 %vm4572_vm0, %v4571_v9 }
 0x256   : > { %3783 = vmatprep.mubr.msk.bf16.mxu0 %vm4572_vm0, %v4571_v9 }
 0x320   : > { %v1249_v24 = vpop.f32.mrb[0].mxu0 }
 0x321   : > { %v1251_v26 = vpop.f32.mrb[1].mxu0  ;;  %v1250_v28 = vadd.f32 %v1249_v24, %v1075_v23 }
 0x322   : > { %v1253_v27 = vpop.f32.mrb[2].mxu0  ;;  %v1252_v31 = vadd.f32 %v1251_v26, %v1079_v25 }
 0x323   : > { %v1254_v29 = vadd.f32 %v1253_v27, %v1075_v23  ;;  %v1255_v30 = vpop.f32.mrb[3].mxu0 }
 0x324   : > { %v1256_v32 = vadd.f32 %v1255_v30, %v1079_v25 }
 0x325   : > { %v1318_v33 = vpack.c.bf16 %v1254_v29, %v1250_v28 }
 0x326   : > { %v1319_v34 = vpack.c.bf16 %v1256_v32, %v1252_v31 }
 0x327   : > { %v3779_v57 = vpop.f32.mrb[0].mxu1 }
 0x328   : > { %1580 = vrot.lane.b32.xlu1 %v1319_v34, %s4573_s16  ;;  %1447 = vrot.lane.b32.xlu0 %v1319_v34, %s4574_s0  ;;  %v1330_v35 = vsel %vm1325_vm1, %v1319_v34, 0  ;;  %v1259_v36 = vpop.f32.mrb[4].mxu0  ;;  %v1311_v59 = vadd.f32 %v3779_v57, %v1083_v56  ;;  %v1302_v60 = vpop.f32.mrb[1].mxu1 }
 0x329   : > { %3782 = vmatpush3.bf16.xpose.msra.mxu0 %v1330_v35  ;;  %v1260_v37 = vadd.f32 %v1259_v36, %v1075_v23  ;;  %v1261_v38 = vpop.f32.mrb[5].mxu0  ;;  %v1303_v62 = vadd.f32 %v1302_v60, %v1083_v56  ;;  %v3780_v63 = vpop.f32.mrb[2].mxu1 }
 0x32a   : > { %v1262_v39 = vadd.f32 %v1261_v38, %v1079_v25  ;;  %v1263_v40 = vpop.f32.mrb[6].mxu0  ;;  %3787 = vmatprep.subr.bf16.mxu0 %v4571_v9  ;;  %v1314_v0 = vadd.f32 %v3780_v63, %v1083_v56  ;;  %v1305_v1 = vpop.f32.mrb[3].mxu1 }
 0x32b   : > { %v1264_v41 = vadd.f32 %v1263_v40, %v1075_v23  ;;  %v1265_v42 = vpop.f32.mrb[7].mxu0  ;;  %v1306_v2 = vadd.f32 %v1305_v1, %v1083_v56 }
 0x32c   : > { %1578 = vrot.lane.b32.xlu1 %v1318_v33, %s4573_s16  ;;  %1444 = vrot.lane.b32.xlu0 %v1318_v33, %s4574_s0  ;;  %v1266_v43 = vadd.f32 %v1265_v42, %v1079_v25  ;;  %v5128_v4 = vpack.c.bf16 %v1314_v0, %v1311_v59 }
 0x32d   : > { %v1842_v44 = vpack.c.bf16 %v1264_v41, %v1260_v37  ;;  %v5130_v5 = vpack.c.bf16 %v1306_v2, %v1303_v62 }
 0x32e   : > { %v1843_v45 = vpack.c.bf16 %v1266_v43, %v1262_v39 }
 0x330   : > { %1710 = vrot.lane.b32.xlu1 %v1318_v33, %s4575_s4  ;;  %1712 = vrot.lane.b32.xlu0 %v1319_v34, %s4575_s4  ;;  %v1853_v61 = vsel %vm1325_vm1, %v1843_v45, 0 }
 0x331   : > { %3784 = vmatmul.mubr.msk.bf16.vlgmr.msra.gmra.mrb[8].mxu0 %vm1325_vm1, %v1318_v33 }
 0x332   : > { %3789 = vmatprep.mubr.msk.bf16.mxu0 %vm4572_vm0, %v4571_v9  ;;  %3788 = vmatpush3.bf16.msra.mxu0 %v5130_v5 }
 0x333   : > { %3799 = vmatprep.subr.bf16.mxu0 %v4571_v9 }
 0x334   : > { %1969 = vrot.lane.b32.xlu0 %v1843_v45, %s4574_s0  ;;  %1966 = vrot.lane.b32.xlu1 %v1842_v44, %s4574_s0 }
 0x338   : > { %2101 = vrot.lane.b32.xlu0 %v1843_v45, %s4573_s16  ;;  %2099 = vrot.lane.b32.xlu1 %v1842_v44, %s4573_s16 }
 0x33c   : > { %2232 = vrot.lane.b32.xlu0 %v1843_v45, %s4575_s4  ;;  %2230 = vrot.lane.b32.xlu1 %v1842_v44, %s4575_s4 }
 0x39a   : > { %v1448_v46 = vpop.permute.xlu0 %1447  ;;  %v1581_v48 = vpop.permute.xlu1 %1580 }
 0x39b   : > { %v1453_v47 = vsel %vm1325_vm1, %v1448_v46, 0  ;;  %v1586_v50 = vsel %vm1325_vm1, %v1581_v48, 0 }
 0x39c   : > { %3794 = vmatpush3.bf16.xpose.msra.mxu1 %v1453_v47 }
 0x39d   : > { %3805 = vmatprep.subr.bf16.mxu1 %v4571_v9 }
 0x39e   : > { %v1445_v49 = vpop.permute.xlu0 %1444  ;;  %v1579_v53 = vpop.permute.xlu1 %1578 }
 0x3a2   : > { %v1713_v51 = vpop.permute.xlu0 %1712  ;;  %v1711_v58 = vpop.permute.xlu1 %1710 }
 0x3a3   : > { %3796 = vmatmul.mubr.msk.bf16.vlgmr.msra.gmra.mrb[4].mxu1 %vm1325_vm1, %v1445_v49  ;;  %v1718_v55 = vsel %vm1325_vm1, %v1713_v51, 0 }
 0x3a4   : > { %3806 = vmatpush3.bf16.xpose.msra.mxu1 %v1586_v50  ;;  %3807 = vmatprep.mubr.msk.bf16.mxu1 %vm4572_vm0, %v4571_v9  ;;  %v1848_v50 = vrot.slane %v1317_v15, %v5086_v22 }
 0x3a5   : > { %3817 = vmatprep.subr.bf16.mxu1 %v4571_v9 }
 0x3a6   : > { %v1970_v3 = vpop.permute.xlu0 %1969  ;;  %v1967_v8 = vpop.permute.xlu1 %1966 }
 0x3a7   : > { %v1975_v6 = vsel %vm1325_vm1, %v1970_v3, 0 }
 0x3aa   : > { %v2102_v7 = vpop.permute.xlu0 %2101  ;;  %v2100_v12 = vpop.permute.xlu1 %2099 }
 0x3ab   : > { %3808 = vmatmul.mubr.msk.bf16.vlgmr.msra.gmra.mrb[8].mxu1 %vm1325_vm1, %v1579_v53  ;;  %v2107_v10 = vsel %vm1325_vm1, %v2102_v7, 0 }
 0x3ac   : > { %3818 = vmatpush3.bf16.xpose.msra.mxu1 %v1718_v55  ;;  %3819 = vmatprep.mubr.msk.bf16.mxu1 %vm4572_vm0, %v4571_v9 }
 0x3ad   : > { %3829 = vmatprep.subr.bf16.mxu1 %v4571_v9 }
 0x3ae   : > { %v2233_v11 = vpop.permute.xlu0 %2232  ;;  %v2231_v14 = vpop.permute.xlu1 %2230 }
 0x3af   : > { %v2238_v13 = vsel %vm1325_vm1, %v2233_v11, 0 }
 0x3b3   : > { %3820 = vmatmul.mubr.msk.bf16.vlgmr.msra.gmra.mrb[12].mxu1 %vm1325_vm1, %v1711_v58 }
 0x3b4   : > { %3830 = vmatpush3.bf16.xpose.msra.mxu1 %v1853_v61  ;;  %3831 = vmatprep.mubr.msk.bf16.mxu1 %vm4572_vm0, %v4571_v9 }
 0x3b5   : > { %3841 = vmatprep.subr.bf16.mxu1 %v4571_v9 }
 0x3bb   : > { %3832 = vmatmul.mubr.msk.bf16.vlgmr.msra.gmra.mrb[16].mxu1 %vm1325_vm1, %v1842_v44 }
 0x3bc   : > { %3842 = vmatpush3.bf16.xpose.msra.mxu1 %v1975_v6  ;;  %3843 = vmatprep.mubr.msk.bf16.mxu1 %vm4572_vm0, %v4571_v9 }
 0x3bd   : > { %3853 = vmatprep.subr.bf16.mxu1 %v4571_v9 }
 0x3c3   : > { %3844 = vmatmul.mubr.msk.bf16.vlgmr.msra.gmra.mrb[20].mxu1 %vm1325_vm1, %v1967_v8 }
 0x3c4   : > { %3854 = vmatpush3.bf16.xpose.msra.mxu1 %v2107_v10  ;;  %3855 = vmatprep.mubr.msk.bf16.mxu1 %vm4572_vm0, %v4571_v9 }
 0x3c5   : > { %3865 = vmatprep.subr.bf16.mxu1 %v4571_v9 }
 0x3cb   : > { %3856 = vmatmul.mubr.msk.bf16.vlgmr.msra.gmra.mrb[24].mxu1 %vm1325_vm1, %v2100_v12 }
 0x3cc   : > { %3866 = vmatpush3.bf16.xpose.msra.mxu1 %v2238_v13  ;;  %3867 = vmatprep.mubr.msk.bf16.mxu1 %vm4572_vm0, %v4571_v9 }
 0x3d3   : > { %3868 = vmatmul.mubr.msk.bf16.vlgmr.msra.gmra.mrb[28].mxu1 %vm1325_vm1, %v2231_v14 }
 0x404   : > { %v1366_v17 = vpop.f32.mrb[8].mxu0 }
 0x405   : > { %v5153_v18 = vadd.f32 %v1366_v17, %v1324_v16  ;;  %v3785_v19 = vpop.f32.mrb[9].mxu0 }
 0x406   : > { %v1369_v21 = vpop.f32.mrb[10].mxu0 }
 0x407   : > { %v1370_v23 = vadd.f32 %v1369_v21, %v1324_v16  ;;  %v3786_v24 = vpop.f32.mrb[11].mxu0  ;;  %v1374_v25 = vsel %vm1373_vm2, %v5153_v18, -inf }
 0x408   : > { %1375 = vmax.xlane.f32.xlu0 %v1374_v25 }
 0x409   : > { %v1377_v26 = vsel %vm1373_vm2, %v1370_v23, -inf }
 0x40a   : > { %1378 = vmax.xlane.f32.xlu1 %v1377_v26 }
 0x476   : > { %v1489_v27 = vpop.f32.mrb[4].mxu1 }
 0x477   : > { %v5158_v28 = vadd.f32 %v1489_v27, %v1324_v16  ;;  %v3797_v29 = vpop.f32.mrb[5].mxu1 }
 0x478   : > { %v1492_v30 = vpop.f32.mrb[6].mxu1 }
 0x479   : > { %v5160_v31 = vadd.f32 %v1492_v30, %v1324_v16  ;;  %v3798_v32 = vpop.f32.mrb[7].mxu1  ;;  %v1496_v33 = vsel %vm1373_vm2, %v5158_v28, -inf }
 0x47a   : > { %1497 = vmax.xlane.f32.xlu0 %v1496_v33 }
 0x47b   : > { %v1499_v34 = vsel %vm1373_vm2, %v5160_v31, -inf }
 0x47e   : > { %v1622_v35 = vpop.f32.mrb[8].mxu1  ;;  %1500 = vmax.xlane.f32.xlu0 %v1499_v34 }
 0x47f   : > { %v5166_v36 = vadd.f32 %v1622_v35, %v1324_v16  ;;  %v3809_v37 = vpop.f32.mrb[9].mxu1 }
 0x480   : > { %v1625_v38 = vpop.f32.mrb[10].mxu1 }
 0x481   : > { %v5168_v39 = vadd.f32 %v1625_v38, %v1324_v16  ;;  %v3810_v40 = vpop.f32.mrb[11].mxu1  ;;  %v1629_v41 = vsel %vm1373_vm2, %v5166_v36, -inf }
 0x482   : > { %1630 = vmax.xlane.f32.xlu1 %v1629_v41 }
 0x483   : > { %v1632_v42 = vsel %vm1373_vm2, %v5168_v39, -inf }
 0x484   : > { %1633 = vmax.xlane.f32.xlu0 %v1632_v42 }
 0x486   : > { %v1754_v43 = vpop.f32.mrb[12].mxu1 }
 0x487   : > { %v5174_v44 = vadd.f32 %v1754_v43, %v1324_v16  ;;  %v3821_v45 = vpop.f32.mrb[13].mxu1 }
 0x488   : > { %v1757_v46 = vpop.f32.mrb[14].mxu1 }
 0x489   : > { %v5176_v47 = vadd.f32 %v1757_v46, %v1324_v16  ;;  %v3822_v48 = vpop.f32.mrb[15].mxu1  ;;  %v1761_v49 = vsel %vm1373_vm2, %v5174_v44, -inf }
 0x48a   : > { %1762 = vmax.xlane.f32.xlu1 %v1761_v49 }
 0x48b   : > { %v1764_v51 = vsel %vm1373_vm2, %v5176_v47, -inf }
 0x48c   : > { %1765 = vmax.xlane.f32.xlu0 %v1764_v51 }
 0x48e   : > { %v1889_v53 = vpop.f32.mrb[16].mxu1 }
 0x48f   : > { %v5183_v54 = vadd.f32 %v1889_v53, %v1848_v50  ;;  %v3833_v55 = vpop.f32.mrb[17].mxu1 }
 0x490   : > { %v1892_v56 = vpop.f32.mrb[18].mxu1 }
 0x491   : > { %v5185_v57 = vadd.f32 %v1892_v56, %v1848_v50  ;;  %v3834_v58 = vpop.f32.mrb[19].mxu1  ;;  %v1896_v33 = vsel %vm1373_vm2, %v5183_v54, -inf }
 0x493   : > { %v1899_v59 = vsel %vm1373_vm2, %v5185_v57, -inf }
 0x494   : > { %1900 = vmax.xlane.f32.xlu0 %v1899_v59 }
 0x495   : > { %v1376_v29 = vpop.xlane.xlu0 %1375 }
 0x496   : > { %v2011_v60 = vpop.f32.mrb[20].mxu1  ;;  %v1380_v30 = vsub.f32 %v5153_v18, %v1376_v29 }
 0x497   : > { %v5189_v61 = vadd.f32 %v2011_v60, %v1848_v50  ;;  %v1379_v62 = vpop.xlane.xlu1 %1378  ;;  %v3845_v63 = vpop.f32.mrb[21].mxu1 }
 0x498   : > { %v1381_v0 = vsub.f32 %v1370_v23, %v1379_v62  ;;  %v2014_v1 = vpop.f32.mrb[22].mxu1  ;;  %v1382_v32 = vmul.f32 1.442695, %v1380_v30 }
 0x499   : > { %v5191_v2 = vadd.f32 %v2014_v1, %v1848_v50  ;;  %v3846_v3 = vpop.f32.mrb[23].mxu1  ;;  %v2018_v34 = vsel %vm1373_vm2, %v5189_v61, -inf }
 0x49a   : > { %v1384_v6 = vmul.f32 1.442695, %v1381_v0 }
 0x49b   : > { %1520 = vrot.lane.b32.xlu1 %v5130_v5, %s4574_s0  ;;  %v2021_v7 = vsel %vm1373_vm2, %v5191_v2, -inf }
 0x49c   : > { %4132 = vpow2.f32 %v1384_v6  ;;  %2022 = vmax.xlane.f32.xlu0 %v2021_v7 }
 0x49d   : > { %4134 = vpow2.f32 %v1382_v32 }
 0x49e   : > { %v2143_v8 = vpop.f32.mrb[24].mxu1 }
 0x49f   : > { %v5197_v10 = vadd.f32 %v2143_v8, %v1848_v50  ;;  %v3857_v11 = vpop.f32.mrb[25].mxu1 }
 0x4a0   : > { %v2146_v12 = vpop.f32.mrb[26].mxu1 }
 0x4a1   : > { %v5199_v13 = vadd.f32 %v2146_v12, %v1848_v50  ;;  %v3858_v14 = vpop.f32.mrb[27].mxu1  ;;  %v2150_v35 = vsel %vm1373_vm2, %v5197_v10, -inf }
 0x4a3   : > { %v2153_v15 = vsel %vm1373_vm2, %v5199_v13, -inf }
 0x4a4   : > { %2154 = vmax.xlane.f32.xlu0 %v2153_v15 }
 0x4a6   : > { %v5203_v16 = vpop.eup %4132  ;;  %v2274_v17 = vpop.f32.mrb[28].mxu1 }
 0x4a7   : > { %v5205_v19 = vadd.f32 %v2274_v17, %v1848_v50  ;;  %v3869_v21 = vpop.f32.mrb[29].mxu1  ;;  %v1389_v23 = vsel %vm1373_vm2, %v5203_v16, 0.0  ;;  %v5220_v37 = vpop.eup %4134 }
 0x4a8   : > { %v2277_v24 = vpop.f32.mrb[30].mxu1  ;;  %1390 = vadd.xlane.f32.xlu0 %v1389_v23  ;;  %v1386_v38 = vsel %vm1373_vm2, %v5220_v37, 0.0 }
 0x4a9   : > { %v5209_v25 = vadd.f32 %v2277_v24, %v1848_v50  ;;  %v3870_v26 = vpop.f32.mrb[31].mxu1  ;;  %v2281_v18 = vsel %vm1373_vm2, %v5205_v19, -inf }
 0x4ab   : > { %v2284_v27 = vsel %vm1373_vm2, %v5209_v25, -inf }
 0x4ac   : > { %2285 = vmax.xlane.f32.xlu0 %v2284_v27 }
 0x4bf   : > { %1897 = vmax.xlane.f32.xlu1 %v1896_v33 }
 0x4c3   : > { %2019 = vmax.xlane.f32.xlu1 %v2018_v34 }
 0x4c7   : > { %2151 = vmax.xlane.f32.xlu1 %v2150_v35 }
 0x4cb   : > { %1387 = vadd.xlane.f32.xlu1 %v1386_v38 }
 0x4cf   : > { %2282 = vmax.xlane.f32.xlu1 %v2281_v18 }
 0x507   : > { %v1498_v40 = vpop.xlane.xlu0 %1497 }
 0x508   : > { %v1502_v41 = vsub.f32 %v5158_v28, %v1498_v40 }
 0x50a   : > { %v1504_v42 = vmul.f32 1.442695, %v1502_v41 }
 0x50b   : > { %v1501_v43 = vpop.xlane.xlu0 %1500 }
 0x50c   : > { %4136 = vpow2.f32 %v1504_v42  ;;  %v1503_v45 = vsub.f32 %v5160_v31, %v1501_v43 }
 0x50e   : > { %v1506_v46 = vmul.f32 1.442695, %v1503_v45 }
 0x50f   : > { %v1631_v28 = vpop.xlane.xlu1 %1630 }
 0x510   : > { %4138 = vpow2.f32 %v1506_v46  ;;  %v1635_v31 = vsub.f32 %v5166_v36, %v1631_v28 }
 0x511   : > { %v1634_v53 = vpop.xlane.xlu0 %1633 }
 0x512   : > { %v1636_v56 = vsub.f32 %v5168_v39, %v1634_v53  ;;  %v1637_v58 = vmul.f32 1.442695, %v1635_v31 }
 0x514   : > { %v1639_v62 = vmul.f32 1.442695, %v1636_v56  ;;  %4140 = vpow2.f32 %v1637_v58 }
 0x516   : > { %v5228_v48 = vpop.eup %4136  ;;  %4142 = vpow2.f32 %v1639_v62 }
 0x517   : > { %v1508_v49 = vsel %vm1373_vm2, %v5228_v48, 0.0  ;;  %v1763_v55 = vpop.xlane.xlu1 %1762 }
 0x518   : > { %1509 = vadd.xlane.f32.xlu1 %v1508_v49  ;;  %v1767_v59 = vsub.f32 %v5174_v44, %v1763_v55 }
 0x519   : > { %v1766_v60 = vpop.xlane.xlu0 %1765 }
 0x51a   : > { %v5232_v50 = vpop.eup %4138  ;;  %v1769_v63 = vmul.f32 1.442695, %v1767_v59  ;;  %v1768_v0 = vsub.f32 %v5176_v47, %v1766_v60 }
 0x51b   : > { %v1511_v51 = vsel %vm1373_vm2, %v5232_v50, 0.0  ;;  %v5245_v6 = vpop.permute.xlu1 %1520 }
 0x51c   : > { %1512 = vadd.xlane.f32.xlu0 %v1511_v51  ;;  %4144 = vpow2.f32 %v1769_v63 }
 0x51e   : > { %v5247_v7 = vpop.eup %4140 }
 0x51f   : > { %v1641_v47 = vsel %vm1373_vm2, %v5247_v7, 0.0 }
 0x520   : > { %v5249_v44 = vpop.eup %4142 }
 0x521   : > { %v1901_v1 = vpop.xlane.xlu0 %1900  ;;  %v1644_v21 = vsel %vm1373_vm2, %v5249_v44, 0.0 }
 0x522   : > { %v1903_v3 = vsub.f32 %v5185_v57, %v1901_v1 }
 0x524   : > { %v1906_v36 = vmul.f32 1.442695, %v1903_v3 }
 0x526   : > { %v5253_v12 = vpop.eup %4144 }
 0x527   : > { %v1773_v23 = vsel %vm1373_vm2, %v5253_v12, 0.0 }
 0x529   : > { %1784 = vrot.lane.b32.xlu1 %v5130_v5, %s4575_s4  ;;  %v2023_v39 = vpop.xlane.xlu0 %2022 }
 0x52a   : > { %v2025_v57 = vsub.f32 %v5191_v2, %v2023_v39 }
 0x531   : > { %v2155_v8 = vpop.xlane.xlu0 %2154 }
 0x532   : > { %1652 = vrot.lane.b32.xlu0 %v5130_v5, %s4573_s16  ;;  %v1771_v5 = vmul.f32 1.442695, %v1768_v0  ;;  %v2157_v29 = vsub.f32 %v5199_v13, %v2155_v8 }
 0x534   : > { %4146 = vpow2.f32 %v1771_v5  ;;  %v2160_v34 = vmul.f32 1.442695, %v2157_v29 }
 0x535   : > { %4148 = vpow2.f32 %v1906_v36  ;;  %v1391_v27 = vpop.xlane.xlu0 %1390 }
 0x539   : > { %v2286_v35 = vpop.xlane.xlu0 %2285 }
 0x53a   : > { %v2288_v18 = vsub.f32 %v5209_v25, %v2286_v35 }
 0x53c   : > { %v2291_v45 = vmul.f32 1.442695, %v2288_v18 }
 0x53e   : > { %v5261_v24 = vpop.eup %4146 }
 0x53f   : > { %v1776_v32 = vsel %vm1373_vm2, %v5261_v24, 0.0  ;;  %v5267_v33 = vpop.eup %4148 }
 0x540   : > { %v1911_v38 = vsel %vm1373_vm2, %v5267_v33, 0.0 }
 0x54c   : > { %v1898_v11 = vpop.xlane.xlu1 %1897 }
 0x54d   : > { %v1902_v14 = vsub.f32 %v5183_v54, %v1898_v11  ;;  %1642 = vadd.xlane.f32.xlu1 %v1641_v47  ;;  %v2028_v54 = vmul.f32 1.442695, %v2025_v57 }
 0x54f   : > { %v1904_v15 = vmul.f32 1.442695, %v1902_v14 }
 0x550   : > { %v2020_v17 = vpop.xlane.xlu1 %2019 }
 0x551   : > { %4150 = vpow2.f32 %v1904_v15  ;;  %v2024_v26 = vsub.f32 %v5189_v61, %v2020_v17  ;;  %1645 = vadd.xlane.f32.xlu0 %v1644_v21  ;;  %1774 = vadd.xlane.f32.xlu1 %v1773_v23 }
 0x553   : > { %v2026_v2 = vmul.f32 1.442695, %v2024_v26 }
 0x554   : > { %v2152_v30 = vpop.xlane.xlu1 %2151 }
 0x555   : > { %4152 = vpow2.f32 %v2026_v2  ;;  %1777 = vadd.xlane.f32.xlu0 %v1776_v32  ;;  %v2156_v62 = vsub.f32 %v5197_v10, %v2152_v30 }
 0x556   : > { %4154 = vpow2.f32 %v2028_v54 }
 0x557   : > { %4156 = vrcp.f32 %v1391_v27  ;;  %v2158_v63 = vmul.f32 1.442695, %v2156_v62 }
 0x558   : > { %v1388_v61 = vpop.xlane.xlu1 %1387 }
 0x559   : > { %1912 = vadd.xlane.f32.xlu0 %v1911_v38  ;;  %4158 = vrcp.f32 %v1388_v61 }
 0x55a   : > { %4160 = vpow2.f32 %v2160_v34 }
 0x55b   : > { %v5271_v13 = vpop.eup %4150 }
 0x55c   : > { %v2283_v40 = vpop.xlane.xlu1 %2282  ;;  %v1908_v41 = vsel %vm1373_vm2, %v5271_v13, 0.0 }
 0x55d   : > { %v2287_v42 = vsub.f32 %v5205_v19, %v2283_v40  ;;  %1909 = vadd.xlane.f32.xlu1 %v1908_v41 }
 0x55f   : > { %v5277_v43 = vpop.eup %4152  ;;  %v2289_v46 = vmul.f32 1.442695, %v2287_v42 }
 0x560   : > { %v2030_v49 = vsel %vm1373_vm2, %v5277_v43, 0.0  ;;  %v5281_v51 = vpop.eup %4154 }
 0x561   : > { %4162 = vpow2.f32 %v2289_v46  ;;  %2031 = vadd.xlane.f32.xlu0 %v2030_v49  ;;  %v4157_v28 = vpop.eup %4156  ;;  %v2033_v31 = vsel %vm1373_vm2, %v5281_v51, 0.0 }
 0x562   : > { %4164 = vpow2.f32 %v2291_v45  ;;  %v1395_v19 = vmul.f32 %v4157_v28, %v5203_v16 }
 0x563   : > { %v4159_v25 = vpop.eup %4158  ;;  %4166 = vpow2.f32 %v2158_v63 }
 0x564   : > { %v5285_v53 = vpop.eup %4160  ;;  %v1394_v55 = vmul.f32 %v4159_v25, %v5220_v37 }
 0x565   : > { %2034 = vadd.xlane.f32.xlu0 %v2033_v31  ;;  %v2165_v58 = vsel %vm1373_vm2, %v5285_v53, 0.0 }
 0x566   : > { %v1396_v56 = vpack.c.bf16 %v1395_v19, %v1394_v55 }
 0x568   : > { %3790 = vmatmul.mubr.msk.bf16.vlgmr.msra.gmra.mrb[12].mxu0 %vm1373_vm2, %v1396_v56 }
 0x569   : > { %2166 = vadd.xlane.f32.xlu0 %v2165_v58  ;;  %3800 = vmatpush3.bf16.msra.mxu0 %v5245_v6 }
 0x56a   : > { %3801 = vmatprep.mubr.msk.bf16.mxu0 %vm4572_vm0, %v4571_v9  ;;  %3811 = vmatprep.subr.bf16.mxu0 %v4571_v9 }
 0x56b   : > { %v5295_v59 = vpop.eup %4162 }
 0x56c   : > { %v2293_v16 = vsel %vm1373_vm2, %v5295_v59, 0.0  ;;  %v5300_v37 = vpop.eup %4164 }
 0x56d   : > { %2294 = vadd.xlane.f32.xlu0 %v2293_v16  ;;  %v2296_v60 = vsel %vm1373_vm2, %v5300_v37, 0.0  ;;  %v5309_v0 = vpop.eup %4166 }
 0x56e   : > { %2042 = vrot.lane.b32.xlu1 %v5128_v4, %s4574_s0  ;;  %v2162_v1 = vsel %vm1373_vm2, %v5309_v0, 0.0 }
 0x571   : > { %2297 = vadd.xlane.f32.xlu0 %v2296_v60 }
 0x587   : > { %2173 = vrot.lane.b32.xlu0 %v5128_v4, %s4573_s16 }
 0x592   : > { %2163 = vadd.xlane.f32.xlu1 %v2162_v1 }
 0x5a3   : > { %2304 = vrot.lane.b32.xlu1 %v5128_v4, %s4575_s4 }
 0x5a5   : > { %v1510_v5 = vpop.xlane.xlu1 %1509 }
 0x5a6   : > { %4168 = vrcp.f32 %v1510_v5 }
 0x5a9   : > { %v1513_v3 = vpop.xlane.xlu0 %1512  ;;  %v1785_v47 = vpop.permute.xlu1 %1784 }
 0x5aa   : > { %4170 = vrcp.f32 %v1513_v3 }
 0x5ad   : > { %v1653_v11 = vpop.permute.xlu0 %1652 }
 0x5b0   : > { %v4169_v36 = vpop.eup %4168 }
 0x5b1   : > { %v1516_v6 = vmul.f32 %v4169_v36, %v5228_v48 }
 0x5b4   : > { %v4171_v10 = vpop.eup %4170 }
 0x5b5   : > { %v1517_v39 = vmul.f32 %v4171_v10, %v5232_v50 }
 0x5b7   : > { %v1518_v8 = vpack.c.bf16 %v1517_v39, %v1516_v6 }
 0x5b9   : > { %3802 = vmatmul.mubr.msk.bf16.vlgmr.msra.gmra.mrb[16].mxu0 %vm1373_vm2, %v1518_v8 }
 0x5ba   : > { %3812 = vmatpush3.bf16.msra.mxu0 %v1653_v11  ;;  %3813 = vmatprep.mubr.msk.bf16.mxu0 %vm4572_vm0, %v4571_v9 }
 0x5bb   : > { %3823 = vmatprep.subr.bf16.mxu0 %v4571_v9 }
 0x5da   : > { %v1643_v14 = vpop.xlane.xlu1 %1642 }
 0x5db   : > { %4172 = vrcp.f32 %v1643_v14  ;;  %v4084_v14 = vld [vmem:[%s4968_s24] sm:$0xff]  }
 0x5dc   : > { %3877 = vmatprep.subr.bf16.mxu1 %v4084_v14 }
 0x5dd   : > { %3878 = vmatpush3.bf16.msra.mxu1 %v4084_v14  ;;  %v4097_v14 = vld [vmem:[%s5013_s15 + $0x14] ss:$8 sps:$4 sm:$0xff]  }
 0x5de   : > { %v1646_v57 = vpop.xlane.xlu0 %1645  ;;  %v1775_v15 = vpop.xlane.xlu1 %1774 }
 0x5df   : > { %4174 = vrcp.f32 %v1646_v57  ;;  %v4085_v57 = vld [vmem:[%s4968_s24 + $0x8] sm:$0xff]  }
 0x5e0   : > { %3879 = vmatprep.subr.bf16.mxu1 %v4085_v57 }
 0x5e1   : > { %3880 = vmatpush3.bf16.msra.mxu1 %v4085_v57  ;;  %v4095_v57 = vld [vmem:[%s5013_s15 + $0x10] ss:$8 sps:$4 sm:$0xff]  }
 0x5e2   : > { %v1778_v17 = vpop.xlane.xlu0 %1777 }
 0x5e3   : > { %4176 = vrcp.f32 %v1778_v17 }
 0x5e4   : > { %4178 = vrcp.f32 %v1775_v15 }
 0x5e5   : > { %v4173_v48 = vpop.eup %4172 }
 0x5e6   : > { %v1649_v21 = vmul.f32 %v4173_v48, %v5247_v7  ;;  %v1913_v26 = vpop.xlane.xlu0 %1912 }
 0x5e9   : > { %v4175_v50 = vpop.eup %4174 }
 0x5ea   : > { %v1650_v23 = vmul.f32 %v4175_v50, %v5249_v44  ;;  %v1910_v27 = vpop.xlane.xlu1 %1909  ;;  %v4086_v50 = vld [vmem:[%s4968_s24 + $0x10] sm:$0xff]  }
 0x5eb   : > { %4180 = vrcp.f32 %v1910_v27  ;;  %3881 = vmatprep.subr.bf16.mxu1 %v4086_v50 }
 0x5ec   : > { %v1651_v54 = vpack.c.bf16 %v1650_v23, %v1649_v21  ;;  %4182 = vrcp.f32 %v1913_v26  ;;  %3882 = vmatpush3.bf16.msra.mxu1 %v4086_v50 }
 0x5ed   : > { %v4177_v29 = vpop.eup %4176 }
 0x5ee   : > { %v2032_v2 = vpop.xlane.xlu0 %2031  ;;  %3814 = vmatmul.mubr.msk.bf16.vlgmr.msra.gmra.mrb[20].mxu0 %vm1373_vm2, %v1651_v54  ;;  %v4179_v30 = vpop.eup %4178  ;;  %v1782_v32 = vmul.f32 %v4177_v29, %v5261_v24  ;;  %v4087_v29 = vld [vmem:[%s4968_s24 + $0x18] sm:$0xff]  }
 0x5ef   : > { %3824 = vmatpush3.bf16.msra.mxu0 %v1785_v47  ;;  %3825 = vmatprep.mubr.msk.bf16.mxu0 %vm4572_vm0, %v4571_v9  ;;  %v1781_v7 = vmul.f32 %v4179_v30, %v5253_v12  ;;  %v2043_v42 = vpop.permute.xlu1 %2042  ;;  %v4089_v30 = vld [vmem:[%s4968_s24 + $0x28] sm:$0xff]  }
 0x5f0   : > { %3835 = vmatprep.subr.bf16.mxu0 %v4571_v9  ;;  %3883 = vmatprep.subr.bf16.mxu1 %v4087_v29 }
 0x5f1   : > { %v1783_v34 = vpack.c.bf16 %v1782_v32, %v1781_v7  ;;  %3884 = vmatpush3.bf16.msra.mxu1 %v4087_v29  ;;  %v4090_v7 = vld [vmem:[%s4968_s24 + $0x30] sm:$0xff]  }
 0x5f2   : > { %v2035_v44 = vpop.xlane.xlu0 %2034 }
 0x5f3   : > { %4184 = vrcp.f32 %v2035_v44 }
 0x5f4   : > { %4186 = vrcp.f32 %v2032_v2  ;;  %v4088_v2 = vld [vmem:[%s4968_s24 + $0x20] sm:$0xff]  }
 0x5f5   : > { %v4181_v35 = vpop.eup %4180  ;;  %3885 = vmatprep.subr.bf16.mxu1 %v4088_v2 }
 0x5f6   : > { %v2167_v61 = vpop.xlane.xlu0 %2166  ;;  %3826 = vmatmul.mubr.msk.bf16.vlgmr.msra.gmra.mrb[24].mxu0 %vm1373_vm2, %v1783_v34  ;;  %v4183_v38 = vpop.eup %4182  ;;  %v1916_v24 = vmul.f32 %v4181_v35, %v5271_v13  ;;  %3886 = vmatpush3.bf16.msra.mxu1 %v4088_v2  ;;  %v4091_v34 = vld [vmem:[%s4968_s24 + $0x38] sm:$0xff]  }
 0x5f7   : > { %3836 = vmatpush3.bf16.msra.mxu0 %v5128_v4  ;;  %3837 = vmatprep.mubr.msk.bf16.mxu0 %vm4572_vm0, %v4571_v9  ;;  %v1917_v12 = vmul.f32 %v4183_v38, %v5267_v33  ;;  %4188 = vrcp.f32 %v2167_v61 }
 0x5f8   : > { %3847 = vmatprep.subr.bf16.mxu0 %v4571_v9  ;;  %3887 = vmatprep.subr.bf16.mxu1 %v4089_v30 }
 0x5f9   : > { %v1918_v40 = vpack.c.bf16 %v1917_v12, %v1916_v24 }
 0x5fa   : > { %v2295_v18 = vpop.xlane.xlu0 %2294  ;;  %3888 = vmatpush3.bf16.msra.mxu1 %v4089_v30 }
 0x5fb   : > { %3889 = vmatprep.subr.bf16.mxu1 %v4090_v7 }
 0x5fd   : > { %v4185_v41 = vpop.eup %4184 }
 0x5fe   : > { %3838 = vmatmul.mubr.msk.bf16.vlgmr.msra.gmra.mrb[28].mxu0 %vm1373_vm2, %v1918_v40  ;;  %v4187_v45 = vpop.eup %4186  ;;  %v2039_v4 = vmul.f32 %v4185_v41, %v5281_v51  ;;  %v2298_v46 = vpop.xlane.xlu0 %2297  ;;  %3890 = vmatpush3.bf16.msra.mxu1 %v4090_v7 }
 0x5ff   : > { %3848 = vmatpush3.bf16.msra.mxu0 %v2043_v42  ;;  %3849 = vmatprep.mubr.msk.bf16.mxu0 %vm4572_vm0, %v4571_v9  ;;  %v2038_v13 = vmul.f32 %v4187_v45, %v5277_v43 }
 0x600   : > { %3859 = vmatprep.subr.bf16.mxu0 %v4571_v9  ;;  %3891 = vmatprep.subr.bf16.mxu1 %v4091_v34 }
 0x601   : > { %v2040_v49 = vpack.c.bf16 %v2039_v4, %v2038_v13  ;;  %v4189_v51 = vpop.eup %4188 }
 0x602   : > { %v2174_v33 = vpop.permute.xlu0 %2173  ;;  %v2171_v31 = vmul.f32 %v4189_v51, %v5285_v53  ;;  %3892 = vmatpush3.bf16.msra.mxu1 %v4091_v34 }
 0x606   : > { %3850 = vmatmul.mubr.msk.bf16.vlgmr.msra.gmra.mrb[32].mxu0 %vm1373_vm2, %v2040_v49 }
 0x607   : > { %3860 = vmatpush3.bf16.msra.mxu0 %v2174_v33  ;;  %3861 = vmatprep.mubr.msk.bf16.mxu0 %vm4572_vm0, %v4571_v9 }
 0x608   : > { %3871 = vmatprep.subr.bf16.mxu0 %v4571_v9 }
 0x61f   : > { %v2164_v28 = vpop.xlane.xlu1 %2163 }
 0x620   : > { %4190 = vrcp.f32 %v2164_v28 }
 0x621   : > { %4192 = vrcp.f32 %v2298_v46 }
 0x622   : > { %4194 = vrcp.f32 %v2295_v18 }
 0x623   : > { %v2305_v56 = vpop.permute.xlu1 %2304 }
 0x62a   : > { %v4191_v25 = vpop.eup %4190 }
 0x62b   : > { %v2170_v43 = vmul.f32 %v4191_v25, %v5309_v0  ;;  %v4193_v55 = vpop.eup %4192 }
 0x62c   : > { %v4195_v58 = vpop.eup %4194  ;;  %v2302_v16 = vmul.f32 %v4193_v55, %v5300_v37 }
 0x62d   : > { %v2172_v19 = vpack.c.bf16 %v2171_v31, %v2170_v43  ;;  %v2301_v60 = vmul.f32 %v4195_v58, %v5295_v59 }
 0x62f   : > { %3862 = vmatmul.mubr.msk.bf16.vlgmr.msra.gmra.mrb[36].mxu0 %vm1373_vm2, %v2172_v19  ;;  %v2303_v62 = vpack.c.bf16 %v2302_v16, %v2301_v60  ;;  %v3587_v16 = vld [vmem:[%s5716_s9] ss:$0 sm:$0xff] }
 0x630   : > { %3872 = vmatpush3.bf16.msra.mxu0 %v2305_v56  ;;  %3873 = vmatprep.mubr.msk.bf16.mxu0 %vm4572_vm0, %v4571_v9 }
 0x637   : > { %3874 = vmatmul.mubr.msk.bf16.vlgmr.msra.gmra.mrb[40].mxu0 %vm1373_vm2, %v2303_v62 }
 0x638   : > { %2700 = vmatprep.mubr.bf16.mxu0 %v4570_v52 }
 0x63b   : > { %v1434_v53 = vpop.f32.mrb[12].mxu0 }
 0x63c   : > { %1441 = vst.msk [vmem:[#allocation2] sm:$0xff] %vm1325_vm1, %v1434_v53  ;;  %v3791_v63 = vpop.f32.mrb[13].mxu0 }
 0x63d   : > { %v1437_v0 = vpop.f32.mrb[14].mxu0 }
 0x63e   : > { %1442 = vst.msk [vmem:[#allocation2 + $0x8] sm:$0xff] %vm1325_vm1, %v1437_v0  ;;  %v3792_v1 = vpop.f32.mrb[15].mxu0 }
 0x68c   : > { %v1560_v5 = vpop.f32.mrb[16].mxu0 }
 0x68d   : > { %1569 = vrot.lane.b32.xlu1 %v1560_v5, %s4575_s4  ;;  %v3803_v9 = vpop.f32.mrb[17].mxu0 }
 0x68e   : > { %v1563_v37 = vpop.f32.mrb[18].mxu0  ;;  %v4228_v9 = vld [vmem:[#allocation14] sm:$0xff] }
 0x68f   : > { %v3804_v59 = vpop.f32.mrb[19].mxu0 }
 0x690   : > { %v4229_v59 = vld [vmem:[#allocation14 + $0x8] sm:$0xff] }
 0x691   : > { %1571 = vrot.lane.b32.xlu1 %v1563_v37, %s4575_s4 }
 0x6c1   : > { %v1692_v3 = vpop.f32.mrb[20].mxu0 }
 0x6c2   : > { %1701 = vrot.lane.b32.xlu1 %v1692_v3, %s4573_s16  ;;  %v3815_v36 = vpop.f32.mrb[21].mxu0 }
 0x6c3   : > { %v1695_v10 = vpop.f32.mrb[22].mxu0 }
 0x6c4   : > { %v3816_v6 = vpop.f32.mrb[23].mxu0 }
 0x6c6   : > { %1703 = vrot.lane.b32.xlu1 %v1695_v10, %s4573_s16  ;;  %v4230_v10 = vld [vmem:[#allocation14 + $0x10] sm:$0xff] }
 0x6c9   : > { %v1824_v39 = vpop.f32.mrb[24].mxu0 }
 0x6ca   : > { %1833 = vrot.lane.b32.xlu0 %v1824_v39, %s4574_s0  ;;  %v3827_v8 = vpop.f32.mrb[25].mxu0  ;;  %v4231_v39 = vld [vmem:[#allocation14 + $0x18] sm:$0xff] }
 0x6cb   : > { %v1827_v11 = vpop.f32.mrb[26].mxu0 }
 0x6cc   : > { %1835 = vrot.lane.b32.xlu1 %v1827_v11, %s4574_s0  ;;  %v3828_v47 = vpop.f32.mrb[27].mxu0  ;;  %v4092_v11 = vld [vmem:[%s5013_s15] ss:$8 sps:$4 sm:$0xff]  }
 0x6cd   : > { %v4094_v47 = vld [vmem:[%s5013_s15 + $0x4] ss:$8 sps:$4 sm:$0xff]  }
 0x6ce   : > { %2668 = vmatprep.subr.bf16.mxu0 %v4094_v47 }
 0x6cf   : > { %2669 = vmatpush1.bf16.msra.mxu0 %v4092_v11 }
 0x6d0   : > { %2670 = vmatprep.subr.bf16.mxu0 %v4097_v14 }
 0x6d1   : > { %v1956_v15 = vpop.f32.mrb[28].mxu0 }
 0x6d2   : > { %1963 = vst.msk [vmem:[#allocation2 + $0x10] sm:$0xff] %vm1325_vm1, %v1956_v15  ;;  %v3839_v17 = vpop.f32.mrb[29].mxu0 }
 0x6d3   : > { %v1959_v48 = vpop.f32.mrb[30].mxu0  ;;  %2671 = vmatpush1.bf16.msra.mxu0 %v4095_v57 }
 0x6d4   : > { %1964 = vst.msk [vmem:[#allocation2 + $0x18] sm:$0xff] %vm1325_vm1, %v1959_v48  ;;  %v3840_v21 = vpop.f32.mrb[31].mxu0 }
 0x6d9   : > { %v2082_v23 = vpop.f32.mrb[32].mxu0 }
 0x6da   : > { %2091 = vrot.lane.b32.xlu0 %v2082_v23, %s4575_s4  ;;  %v3851_v26 = vpop.f32.mrb[33].mxu0 }
 0x6db   : > { %v2085_v27 = vpop.f32.mrb[34].mxu0 }
 0x6dc   : > { %2093 = vrot.lane.b32.xlu1 %v2085_v27, %s4575_s4  ;;  %v3852_v54 = vpop.f32.mrb[35].mxu0 }
 0x6ff   : > { %v1570_v32 = vpop.permute.xlu1 %1569 }
 0x700   : > { %1576 = vst.msk [vmem:[#allocation2] sm:$0xff] %vm1575_vm3, %v1570_v32 }
 0x702   : > { %v2213_v44 = vpop.f32.mrb[36].mxu0 }
 0x703   : > { %v1572_v35 = vpop.permute.xlu1 %1571  ;;  %2222 = vrot.lane.b32.xlu0 %v2213_v44, %s4573_s16  ;;  %v3863_v61 = vpop.f32.mrb[37].mxu0 }
 0x704   : > { %1577 = vst.msk [vmem:[#allocation2 + $0x8] sm:$0xff] %vm1575_vm3, %v1572_v35  ;;  %v2216_v38 = vpop.f32.mrb[38].mxu0  ;;  %v4100_v35 = vld [vmem:[%s5013_s15 + $0x24] ss:$8 sps:$4 sm:$0xff]   ;;  %v4098_v61 = vld [vmem:[%s5013_s15 + $0x20] ss:$8 sps:$4 sm:$0xff]  }
 0x705   : > { %2224 = vrot.lane.b32.xlu1 %v2216_v38, %s4573_s16  ;;  %v3864_v24 = vpop.f32.mrb[39].mxu0  ;;  %2672 = vmatprep.subr.bf16.mxu0 %v4100_v35  ;;  %v4103_v38 = vld [vmem:[%s5013_s15 + $0x34] ss:$8 sps:$4 sm:$0xff]  }
 0x706   : > { %2673 = vmatpush1.bf16.msra.mxu0 %v4098_v61  ;;  %v4101_v24 = vld [vmem:[%s5013_s15 + $0x30] ss:$8 sps:$4 sm:$0xff]  }
 0x707   : > { %2674 = vmatprep.subr.bf16.mxu0 %v4103_v38 }
 0x70a   : > { %v2344_v12 = vpop.f32.mrb[40].mxu0  ;;  %2675 = vmatpush1.bf16.msra.mxu0 %v4101_v24 }
 0x70b   : > { %2353 = vrot.lane.b32.xlu0 %v2344_v12, %s4574_s0  ;;  %v3875_v18 = vpop.f32.mrb[41].mxu0  ;;  %v4106_v12 = vld [vmem:[%s5013_s15 + $0x44] ss:$8 sps:$4 sm:$0xff]  }
 0x70c   : > { %v2347_v40 = vpop.f32.mrb[42].mxu0  ;;  %v4104_v18 = vld [vmem:[%s5013_s15 + $0x40] ss:$8 sps:$4 sm:$0xff]   ;;  %2676 = vmatprep.subr.bf16.mxu0 %v4106_v12 }
 0x70d   : > { %2355 = vrot.lane.b32.xlu1 %v2347_v40, %s4574_s0  ;;  %v3876_v41 = vpop.f32.mrb[43].mxu0  ;;  %v4109_v40 = vld [vmem:[%s5013_s15 + $0x54] ss:$8 sps:$4 sm:$0xff]  }
 0x70e   : > { %2677 = vmatpush1.bf16.msra.mxu0 %v4104_v18  ;;  %v4107_v41 = vld [vmem:[%s5013_s15 + $0x50] ss:$8 sps:$4 sm:$0xff]  }
 0x70f   : > { %2678 = vmatprep.subr.bf16.mxu0 %v4109_v40 }
 0x712   : > { %2679 = vmatpush1.bf16.msra.mxu0 %v4107_v41 }
 0x734   : > { %v1702_v42 = vpop.permute.xlu1 %1701 }
 0x735   : > { %1708 = vst.msk [vmem:[#allocation2] sm:$0xff] %vm1707_vm4, %v1702_v42  ;;  %v4110_v42 = vld [vmem:[%s5013_s15 + $0x60] ss:$8 sps:$4 sm:$0xff]  }
 0x738   : > { %v1704_v45 = vpop.permute.xlu1 %1703 }
 0x739   : > { %1709 = vst.msk [vmem:[#allocation2 + $0x8] sm:$0xff] %vm1707_vm4, %v1704_v45  ;;  %v4112_v45 = vld [vmem:[%s5013_s15 + $0x64] ss:$8 sps:$4 sm:$0xff]  }
 0x73a   : > { %2680 = vmatprep.subr.bf16.mxu0 %v4112_v45 }
 0x73b   : > { %2681 = vmatpush1.bf16.msra.mxu0 %v4110_v42 }
 0x73c   : > { %v1834_v4 = vpop.permute.xlu0 %1833 }
 0x73d   : > { %1840 = vst.msk [vmem:[#allocation2] sm:$0xff] %vm1839_vm5, %v1834_v4  ;;  %v4115_v4 = vld [vmem:[%s5013_s15 + $0x74] ss:$8 sps:$4 sm:$0xff]  }
 0x73e   : > { %v1836_v46 = vpop.permute.xlu1 %1835  ;;  %2682 = vmatprep.subr.bf16.mxu0 %v4115_v4 }
 0x73f   : > { %1841 = vst.msk [vmem:[#allocation2 + $0x8] sm:$0xff] %vm1839_vm5, %v1836_v46  ;;  %v4113_v46 = vld [vmem:[%s5013_s15 + $0x70] ss:$8 sps:$4 sm:$0xff]  }
 0x740   : > { %2683 = vmatpush1.bf16.msra.mxu0 %v4113_v46 }
 0x744   : > { %v2361_v13 = vld [vmem:[#allocation2] sm:$0xff] }
 0x746   : > { %v2362_v49 = vld [vmem:[#allocation2 + $0x8] sm:$0xff] }
 0x747   : > { %v2365_v33 = vpack.c.bf16 %v2362_v49, %v2361_v13  ;;  %v4116_v13 = vld [vmem:[%s4975_s26 + $0x40] sm:$0xff]  }
 0x748   : > { %v4117_v49 = vld [vmem:[%s4975_s26] sm:$0xff]   ;;  %3715 = vmatprep.subr.bf16.mxu1 %v4116_v13 }
 0x749   : > { %3893 = vmatprep.mubr.bf16.mxu1 %v2365_v33  ;;  %v4118_v33 = vld [vmem:[%s4975_s26 + $0x48] sm:$0xff]  }
 0x74c   : > { %v2092_v28 = vpop.permute.xlu0 %2091 }
 0x74d   : > { %2097 = vst.msk [vmem:[#allocation2 + $0x10] sm:$0xff] %vm1575_vm3, %v2092_v28  ;;  %v4119_v28 = vld [vmem:[%s4975_s26 + $0x8] sm:$0xff]  }
 0x74e   : > { %v2094_v51 = vpop.permute.xlu1 %2093 }
 0x74f   : > { %2098 = vst.msk [vmem:[#allocation2 + $0x18] sm:$0xff] %vm1575_vm3, %v2094_v51 }
 0x775   : > { %v2223_v25 = vpop.permute.xlu0 %2222 }
 0x776   : > { %2228 = vst.msk [vmem:[#allocation2 + $0x10] sm:$0xff] %vm1707_vm4, %v2223_v25 }
 0x777   : > { %v2225_v31 = vpop.permute.xlu1 %2224 }
 0x778   : > { %2229 = vst.msk [vmem:[#allocation2 + $0x18] sm:$0xff] %vm1707_vm4, %v2225_v31 }
 0x77d   : > { %v2354_v43 = vpop.permute.xlu0 %2353 }
 0x77e   : > { %2359 = vst.msk [vmem:[#allocation2 + $0x10] sm:$0xff] %vm1839_vm5, %v2354_v43 }
 0x77f   : > { %v2356_v19 = vpop.permute.xlu1 %2355 }
 0x780   : > { %2360 = vst.msk [vmem:[#allocation2 + $0x18] sm:$0xff] %vm1839_vm5, %v2356_v19 }
 0x785   : > { %v2363_v55 = vld [vmem:[#allocation2 + $0x10] sm:$0xff] }
 0x787   : > { %v2364_v56 = vld [vmem:[#allocation2 + $0x18] sm:$0xff] }
 0x788   : > { %v2366_v58 = vpack.c.bf16 %v2364_v56, %v2363_v55 }
 0x78a   : > { %3894 = vmatmul.mubr.bf16.vlgmr.msra.gmra.mrb[32].mxu1 %v2366_v58 }
 0x78b   : > { %3716 = vmatpush3.bf16.msra.mxu1 %v4117_v49 }
 0x78c   : > { %3717 = vmatprep.subr.bf16.mxu1 %v4118_v33 }
 0x78f   : > { %3718 = vmatpush3.bf16.msra.mxu1 %v4119_v28 }
 0x85d   : > { %v3895_v60 = vpop.f32.mrb[32].mxu1 }
 0x85e   : > { %v2472_v62 = vpop.f32.mrb[33].mxu1  ;;  %v2481_v1 = vadd.f32 %v3895_v60, %v3587_v16 }
 0x85f   : > { %v2473_v53 = vadd.f32 %v3587_v16, %v2472_v62  ;;  %v3896_v63 = vpop.f32.mrb[34].mxu1 }
 0x860   : > { %v2475_v0 = vpop.f32.mrb[35].mxu1  ;;  %v2484_v36 = vadd.f32 %v3896_v63, %v3587_v16  ;;  %v2489_v6 = vadd.f32 %v4230_v10, %v2481_v1 }
 0x861   : > { %v2476_v5 = vadd.f32 %v3587_v16, %v2475_v0  ;;  %v2487_v37 = vadd.f32 %v4228_v9, %v2473_v53  ;;  %v3596_v0 = vld [vmem:[%s5717_s27] ss:$0 sm:$0xff] }
 0x862   : > { %v2490_v8 = vadd.f32 %v4231_v39, %v2484_v36 }
 0x863   : > { %2493 = vadd.xlane.f32.xlu0 %v2487_v37  ;;  %v2488_v3 = vadd.f32 %v4229_v59, %v2476_v5 }
 0x865   : > { %2495 = vadd.xlane.f32.xlu1 %v2488_v3 }
 0x867   : > { %2497 = vadd.xlane.f32.xlu0 %v2489_v6 }
 0x86b   : > { %2499 = vadd.xlane.f32.xlu0 %v2490_v8 }
 0x8f0   : > { %v2494_v15 = vpop.xlane.xlu0 %2493 }
 0x8f1   : > { %v2502_v17 = vmul.f32 0.0078125, %v2494_v15 }
 0x8f2   : > { %v2496_v48 = vpop.xlane.xlu1 %2495 }
 0x8f3   : > { %v5400_v50 = vsub.f32 %v2487_v37, %v2502_v17  ;;  %v2503_v21 = vmul.f32 0.0078125, %v2496_v48 }
 0x8f4   : > { %v2498_v23 = vpop.xlane.xlu0 %2497 }
 0x8f5   : > { %v5402_v26 = vsub.f32 %v2488_v3, %v2503_v21  ;;  %v2504_v27 = vmul.f32 0.0078125, %v2498_v23  ;;  %v2510_v54 = vmul.f32 %v5400_v50, %v5400_v50  ;;  %v3597_v3 = vld [vmem:[%s939_s5] ss:$0 sm:$0xff]  ;;  %v4121_v21 = vld [vmem:[%s4975_s26 + $0x10] sm:$0xff]  }
 0x8f6   : > { %v4122_v23 = vld [vmem:[%s4975_s26 + $0x58] sm:$0xff]  }
 0x8f7   : > { %v5406_v29 = vsub.f32 %v2489_v6, %v2504_v27  ;;  %2514 = vadd.xlane.f32.xlu1 %v2510_v54  ;;  %v2511_v2 = vmul.f32 %v5402_v26, %v5402_v26  ;;  %v4125_v27 = vld [vmem:[%s4975_s26 + $0x20] sm:$0xff]   ;;  %v4126_v54 = vld [vmem:[%s4975_s26 + $0x68] sm:$0xff]  }
 0x8f8   : > { %v2500_v30 = vpop.xlane.xlu0 %2499 }
 0x8f9   : > { %v2505_v32 = vmul.f32 0.0078125, %v2500_v30  ;;  %2516 = vadd.xlane.f32.xlu0 %v2511_v2  ;;  %v2512_v7 = vmul.f32 %v5406_v29, %v5406_v29  ;;  %v4128_v2 = vld [vmem:[%s4975_s26 + $0x70] sm:$0xff]  }
 0x8fa   : > { %v4129_v30 = vld [vmem:[%s4975_s26 + $0x30] sm:$0xff]  }
 0x8fb   : > { %v5412_v44 = vsub.f32 %v2490_v8, %v2505_v32  ;;  %2518 = vadd.xlane.f32.xlu1 %v2512_v7  ;;  %v4130_v32 = vld [vmem:[%s4975_s26 + $0x78] sm:$0xff]  }
 0x8fc   : > { %v4131_v7 = vld [vmem:[%s4975_s26 + $0x38] sm:$0xff]  }
 0x8fd   : > { %v2513_v34 = vmul.f32 %v5412_v44, %v5412_v44 }
 0x8ff   : > { %2520 = vadd.xlane.f32.xlu0 %v2513_v34 }
 0x984   : > { %v2515_v51 = vpop.xlane.xlu1 %2514 }
 0x985   : > { %v2522_v25 = vmul.f32 0.0078125, %v2515_v51 }
 0x986   : > { %v2517_v31 = vpop.xlane.xlu0 %2516 }
 0x987   : > { %v2526_v43 = vadd.f32 1e-12, %v2522_v25  ;;  %v2523_v19 = vmul.f32 0.0078125, %v2517_v31 }
 0x988   : > { %v2519_v55 = vpop.xlane.xlu1 %2518 }
 0x989   : > { %4196 = vrsqrt.f32 %v2526_v43  ;;  %v2527_v56 = vadd.f32 1e-12, %v2523_v19  ;;  %v2524_v58 = vmul.f32 0.0078125, %v2519_v55 }
 0x98b   : > { %4198 = vrsqrt.f32 %v2527_v56  ;;  %v2528_v16 = vadd.f32 1e-12, %v2524_v58 }
 0x98c   : > { %v2521_v60 = vpop.xlane.xlu0 %2520 }
 0x98d   : > { %4200 = vrsqrt.f32 %v2528_v16  ;;  %v2525_v62 = vmul.f32 0.0078125, %v2521_v60 }
 0x98f   : > { %v2529_v53 = vadd.f32 1e-12, %v2525_v62 }
 0x991   : > { %4202 = vrsqrt.f32 %v2529_v53 }
 0x993   : > { %v4197_v63 = vpop.eup %4196 }
 0x994   : > { %v2534_v1 = vmul.f32 %v4197_v63, %v5400_v50  ;;  %v4120_v50 = vld [vmem:[%s4975_s26 + $0x50] sm:$0xff]  }
 0x995   : > { %v4199_v5 = vpop.eup %4198  ;;  %3719 = vmatprep.subr.bf16.mxu1 %v4120_v50 }
 0x996   : > { %v2535_v9 = vmul.f32 %v4199_v5, %v5402_v26  ;;  %v2544_v37 = vmul.f32 %v3596_v0, %v2534_v1  ;;  %3720 = vmatpush3.bf16.msra.mxu1 %v4121_v21  ;;  %v4123_v26 = vld [vmem:[%s4975_s26 + $0x18] sm:$0xff]  }
 0x997   : > { %v4201_v59 = vpop.eup %4200  ;;  %3721 = vmatprep.subr.bf16.mxu1 %v4122_v23 }
 0x998   : > { %v2545_v36 = vmul.f32 %v3596_v0, %v2535_v9  ;;  %v5444_v10 = vadd.f32 %v3597_v3, %v2544_v37  ;;  %v2536_v39 = vmul.f32 %v4201_v59, %v5406_v29  ;;  %v4127_v29 = vld [vmem:[%s4975_s26 + $0x28] sm:$0xff]  }
 0x99a   : > { %v5446_v6 = vadd.f32 %v3597_v3, %v2545_v36  ;;  %v2546_v14 = vmul.f32 %v3596_v0, %v2536_v39  ;;  %3722 = vmatpush3.bf16.msra.mxu1 %v4123_v26 }
 0x99b   : > { %v4203_v8 = vpop.eup %4202 }
 0x99c   : > { %v2558_v11 = vpack.c.bf16 %v5446_v6, %v5444_v10  ;;  %v2537_v47 = vmul.f32 %v4203_v8, %v5412_v44  ;;  %v5455_v17 = vadd.f32 %v3597_v3, %v2546_v14  ;;  %v2576_v44 = vld [vmem:[%s5019_s29] sm:$0x3] }
 0x99d   : > { %v2581_v34 = vrot.slane %v2576_v44, %v5080_v20  ;;  %v2585_v35 = vrot.slane %v2576_v44, %v5086_v22 }
 0x99e   : > { %2701 = vmatmul.mubr.bf16.vlgmr.msra.gmra.mrb[44].mxu0 %v2558_v11  ;;  %v2547_v57 = vmul.f32 %v3596_v0, %v2537_v47 }
 0x99f   : > { %2710 = vmatprep.mubr.bf16.mxu0 %v4570_v52  ;;  %v4124_v52 = vld [vmem:[%s4975_s26 + $0x60] sm:$0xff]  }
 0x9a0   : > { %v5453_v15 = vadd.f32 %v3597_v3, %v2547_v57  ;;  %3723 = vmatprep.subr.bf16.mxu1 %v4124_v52 }
 0x9a1   : > { %3724 = vmatpush3.bf16.msra.mxu1 %v4125_v27 }
 0x9a2   : > { %v2559_v48 = vpack.c.bf16 %v5453_v15, %v5455_v17  ;;  %3725 = vmatprep.subr.bf16.mxu1 %v4126_v54 }
 0x9a5   : > { %3726 = vmatpush3.bf16.msra.mxu1 %v4127_v29 }
 0x9a6   : > { %2711 = vmatmul.mubr.bf16.gmra.mrb[48].mxu0 %v2559_v48  ;;  %3727 = vmatprep.subr.bf16.mxu1 %v4128_v2 }
 0x9a9   : > { %3728 = vmatpush3.bf16.msra.mxu1 %v4129_v30 }
 0x9aa   : > { %3729 = vmatprep.subr.bf16.mxu1 %v4130_v32 }
 0x9ad   : > { %3730 = vmatpush3.bf16.msra.mxu1 %v4131_v7 }
 0xa71   : > { %v2702_v61 = vpop.f32.mrb[44].mxu0 }
 0xa72   : > { %v2703_v38 = vadd.f32 %v2702_v61, %v2581_v34  ;;  %v2704_v24 = vpop.f32.mrb[45].mxu0 }
 0xa73   : > { %v2705_v12 = vadd.f32 %v2704_v24, %v2585_v35  ;;  %v2706_v18 = vpop.f32.mrb[46].mxu0 }
 0xa74   : > { %v2729_v40 = vmul.f32 0.70710677, %v2703_v38  ;;  %v2707_v41 = vadd.f32 %v2706_v18, %v2581_v34  ;;  %v2708_v42 = vpop.f32.mrb[47].mxu0  ;;  %v2721_v0 = vmul.f32 0.5, %v2703_v38  ;;  %v3614_v38 = vld [vmem:[%s951_s14] ss:$0 sm:$0xff] }
 0xa75   : > { %v2730_v45 = vmul.f32 0.70710677, %v2705_v12  ;;  %v2709_v4 = vadd.f32 %v2708_v42, %v2585_v35  ;;  %v2722_v9 = vmul.f32 0.5, %v2705_v12  ;;  %s5721_s14 = scalar_lea.vmem [#allocation11], %s4956_s20 }
 0xa76   : > { %4204 = verf.f32 %v2729_v40  ;;  %v2731_v46 = vmul.f32 0.70710677, %v2707_v41  ;;  %v2723_v1 = vmul.f32 0.5, %v2707_v41 }
 0xa77   : > { %4206 = verf.f32 %v2730_v45  ;;  %v2732_v13 = vmul.f32 0.70710677, %v2709_v4  ;;  %v2724_v37 = vmul.f32 0.5, %v2709_v4 }
 0xa78   : > { %4208 = verf.f32 %v2731_v46 }
 0xa79   : > { %4210 = verf.f32 %v2732_v13  ;;  %v2712_v49 = vpop.f32.mrb[48].mxu0 }
 0xa7a   : > { %v2713_v20 = vadd.f32 %v2712_v49, %v2581_v34  ;;  %v2714_v33 = vpop.f32.mrb[49].mxu0 }
 0xa7b   : > { %v2715_v22 = vadd.f32 %v2714_v33, %v2585_v35  ;;  %v2716_v28 = vpop.f32.mrb[50].mxu0 }
 0xa7c   : > { %v2733_v51 = vmul.f32 0.70710677, %v2713_v20  ;;  %v2717_v25 = vadd.f32 %v2716_v28, %v2581_v34  ;;  %v2718_v31 = vpop.f32.mrb[51].mxu0  ;;  %v2725_v26 = vmul.f32 0.5, %v2713_v20 }
 0xa7d   : > { %v2734_v43 = vmul.f32 0.70710677, %v2715_v22  ;;  %v2719_v19 = vadd.f32 %v2718_v31, %v2585_v35  ;;  %v2726_v54 = vmul.f32 0.5, %v2715_v22 }
 0xa7e   : > { %4212 = verf.f32 %v2733_v51  ;;  %v2735_v55 = vmul.f32 0.70710677, %v2717_v25  ;;  %v2727_v52 = vmul.f32 0.5, %v2717_v25 }
 0xa7f   : > { %4214 = verf.f32 %v2734_v43  ;;  %v2736_v56 = vmul.f32 0.70710677, %v2719_v19  ;;  %v2728_v29 = vmul.f32 0.5, %v2719_v19 }
 0xa80   : > { %v4205_v58 = vpop.eup %4204  ;;  %4216 = verf.f32 %v2735_v55 }
 0xa81   : > { %v4207_v16 = vpop.eup %4206  ;;  %v2745_v60 = vadd.f32 1.0, %v4205_v58  ;;  %4218 = verf.f32 %v2736_v56 }
 0xa82   : > { %v4209_v62 = vpop.eup %4208  ;;  %v2746_v53 = vadd.f32 1.0, %v4207_v16 }
 0xa83   : > { %v4211_v63 = vpop.eup %4210  ;;  %v2747_v5 = vadd.f32 1.0, %v4209_v62  ;;  %v2753_v3 = vmul.f32 %v2745_v60, %v2721_v0 }
 0xa84   : > { %v2748_v59 = vadd.f32 1.0, %v4211_v63  ;;  %v2754_v39 = vmul.f32 %v2746_v53, %v2722_v9 }
 0xa85   : > { %v2755_v36 = vmul.f32 %v2747_v5, %v2723_v1 }
 0xa86   : > { %v2756_v8 = vmul.f32 %v2748_v59, %v2724_v37 }
 0xa87   : > { %v2761_v11 = vpack.c.bf16 %v2755_v36, %v2753_v3 }
 0xa88   : > { %v4213_v47 = vpop.eup %4212  ;;  %v2762_v14 = vpack.c.bf16 %v2756_v8, %v2754_v39 }
 0xa89   : > { %v4215_v57 = vpop.eup %4214  ;;  %v2749_v48 = vadd.f32 1.0, %v4213_v47 }
 0xa8a   : > { %v4217_v50 = vpop.eup %4216  ;;  %v2750_v21 = vadd.f32 1.0, %v4215_v57  ;;  %2932 = vmatprep.mubr.bf16.mxu1 %v2762_v14 }
 0xa8b   : > { %v4219_v23 = vpop.eup %4218  ;;  %v2751_v27 = vadd.f32 1.0, %v4217_v50  ;;  %2933 = vmatmul.mubr.bf16.vlgmr.msra.gmra.mrb[36].mxu1 %v2761_v11  ;;  %v2757_v30 = vmul.f32 %v2749_v48, %v2725_v26 }
 0xa8c   : > { %v2752_v2 = vadd.f32 1.0, %v4219_v23  ;;  %v2758_v7 = vmul.f32 %v2750_v21, %v2726_v54  ;;  %v3631_v21 = vld [vmem:[%s5720_s3] ss:$0 sm:$0xff] }
 0xa8d   : > { %v2759_v32 = vmul.f32 %v2751_v27, %v2727_v52  ;;  %v3632_v52 = vld [vmem:[%s5721_s14] ss:$0 sm:$0xff] }
 0xa8e   : > { %v2760_v44 = vmul.f32 %v2752_v2, %v2728_v29 }
 0xa8f   : > { %v2763_v34 = vpack.c.bf16 %v2759_v32, %v2757_v30 }
 0xa90   : > { %v2764_v35 = vpack.c.bf16 %v2760_v44, %v2758_v7 }
 0xa92   : > { %2940 = vmatprep.mubr.bf16.mxu1 %v2764_v35 }
 0xa93   : > { %2941 = vmatmul.mubr.bf16.gmra.mrb[40].mxu1 %v2763_v34 }
 0xb5e   : > { %v3731_v61 = vpop.f32.mrb[36].mxu1 }
 0xb5f   : > { %v3732_v24 = vpop.f32.mrb[37].mxu1 }
 0xb60   : > { %v3733_v12 = vadd.f32 %v3732_v24, %v3731_v61  ;;  %v3734_v18 = vpop.f32.mrb[38].mxu1 }
 0xb61   : > { %v3735_v40 = vpop.f32.mrb[39].mxu1 }
 0xb62   : > { %v2935_v41 = vadd.f32 %v3733_v12, %v3614_v38  ;;  %v3736_v42 = vadd.f32 %v3735_v40, %v3734_v18  ;;  %v4232_v12 = vld [vmem:[%s5722_s13] sm:$0xff] (!%p3633_p8)   ;;  %v4576_v18 = vmov (!%p3633_p8), 0.0   ;;  %v4233_v40 = vld [vmem:[%s5722_s13 + $0x8] sm:$0xff] (!%p3633_p8)  }
 0xb63   : > { %3897 = vmatprep.subr.bf16.mxu0 (!%p3633_p8), %v4576_v18  ;;  %3917 = vmatprep.subr.bf16.mxu1 (!%p3633_p8), %v4576_v18 }
 0xb64   : > { %v2938_v45 = vadd.f32 %v3736_v42, %v3614_v38  ;;  %v2949_v4 = vadd.f32 %v2935_v41, %v5444_v10  ;;  %3898 = vmatpush3.bf16.msra.mxu0 (!%p3633_p8), %v4232_v12  ;;  %3913 = vmatprep.mubr.msk.bf16.mxu0 (!%p3633_p8), %vm4577_vm6, %v4576_v18  ;;  %v4234_v41 = vld [vmem:[%s5722_s13 + $0x10] sm:$0xff] (!%p3633_p8)   ;;  %v4240_v42 = vld [vmem:[%s5723_s12] sm:$0xff] (!%p3633_p8)  }
 0xb65   : > { %3899 = vmatprep.subr.bf16.mxu0 (!%p3633_p8), %v4576_v18  ;;  %3933 = vmatprep.mubr.msk.bf16.mxu1 (!%p3633_p8), %vm4577_vm6, %v4576_v18 }
 0xb66   : > { %v3737_v46 = vpop.f32.mrb[40].mxu1  ;;  %2955 = vadd.xlane.f32.xlu1 %v2949_v4  ;;  %v2950_v13 = vadd.f32 %v2938_v45, %v5446_v6  ;;  %v4235_v45 = vld [vmem:[%s5722_s13 + $0x18] sm:$0xff] (!%p3633_p8)   ;;  %3918 = vmatpush3.bf16.msra.mxu1 (!%p3633_p8), %v4240_v42 }
 0xb67   : > { %v3738_v49 = vpop.f32.mrb[41].mxu1  ;;  %3919 = vmatprep.subr.bf16.mxu1 (!%p3633_p8), %v4576_v18 }
 0xb68   : > { %v3739_v20 = vadd.f32 %v3738_v49, %v3737_v46  ;;  %v3740_v33 = vpop.f32.mrb[42].mxu1  ;;  %2957 = vadd.xlane.f32.xlu0 %v2950_v13  ;;  %3900 = vmatpush3.bf16.msra.mxu0 (!%p3633_p8), %v4233_v40  ;;  %v4236_v46 = vld [vmem:[%s5722_s13 + $0x20] sm:$0xff] (!%p3633_p8)   ;;  %v4237_v49 = vld [vmem:[%s5722_s13 + $0x28] sm:$0xff] (!%p3633_p8)  }
 0xb69   : > { %v3741_v22 = vpop.f32.mrb[43].mxu1  ;;  %3901 = vmatprep.subr.bf16.mxu0 (!%p3633_p8), %v4576_v18 }
 0xb6a   : > { %v2943_v28 = vadd.f32 %v3739_v20, %v3614_v38  ;;  %v3742_v51 = vadd.f32 %v3741_v22, %v3740_v33  ;;  %v4243_v20 = vld [vmem:[%s5723_s12 + $0x18] sm:$0xff] (!%p3633_p8)   ;;  %v4238_v33 = vld [vmem:[%s5722_s13 + $0x30] sm:$0xff] (!%p3633_p8)  }
 0xb6c   : > { %v2946_v25 = vadd.f32 %v3742_v51, %v3614_v38  ;;  %v2951_v31 = vadd.f32 %v2943_v28, %v5455_v17  ;;  %3902 = vmatpush3.bf16.msra.mxu0 (!%p3633_p8), %v4234_v41  ;;  %v4239_v28 = vld [vmem:[%s5722_s13 + $0x38] sm:$0xff] (!%p3633_p8)  }
 0xb6d   : > { %3903 = vmatprep.subr.bf16.mxu0 (!%p3633_p8), %v4576_v18 }
 0xb6e   : > { %2959 = vadd.xlane.f32.xlu1 %v2951_v31  ;;  %v2952_v43 = vadd.f32 %v2946_v25, %v5453_v15 }
 0xb70   : > { %2961 = vadd.xlane.f32.xlu0 %v2952_v43  ;;  %3904 = vmatpush3.bf16.msra.mxu0 (!%p3633_p8), %v4235_v45 }
 0xb71   : > { %3905 = vmatprep.subr.bf16.mxu0 (!%p3633_p8), %v4576_v18 }
 0xb74   : > { %3906 = vmatpush3.bf16.msra.mxu0 (!%p3633_p8), %v4236_v46 }
 0xb75   : > { %3907 = vmatprep.subr.bf16.mxu0 (!%p3633_p8), %v4576_v18 }
 0xb78   : > { %3908 = vmatpush3.bf16.msra.mxu0 (!%p3633_p8), %v4237_v49 }
 0xb79   : > { %3909 = vmatprep.subr.bf16.mxu0 (!%p3633_p8), %v4576_v18 }
 0xb7c   : > { %3910 = vmatpush3.bf16.msra.mxu0 (!%p3633_p8), %v4238_v33 }
 0xb7d   : > { %3911 = vmatprep.subr.bf16.mxu0 (!%p3633_p8), %v4576_v18 }
 0xb80   : > { %3912 = vmatpush3.bf16.msra.mxu0 (!%p3633_p8), %v4239_v28 }
 0xbf3   : > { %v2956_v19 = vpop.xlane.xlu1 %2955 }
 0xbf4   : > { %v2963_v10 = vmul.f32 0.0078125, %v2956_v19  ;;  %v4246_v19 = vld [vmem:[%s5723_s12 + $0x30] sm:$0xff] (!%p3633_p8)  }
 0xbf5   : > { %v2958_v55 = vpop.xlane.xlu0 %2957 }
 0xbf6   : > { %v2967_v56 = vsub.f32 %v2949_v4, %v2963_v10  ;;  %v2964_v58 = vmul.f32 0.0078125, %v2958_v55  ;;  %v4241_v4 = vld [vmem:[%s5723_s12 + $0x8] sm:$0xff] (!%p3633_p8)   ;;  %v4247_v10 = vld [vmem:[%s5723_s12 + $0x38] sm:$0xff] (!%p3633_p8)  }
 0xbf7   : > { %3920 = vmatpush3.bf16.msra.mxu1 (!%p3633_p8), %v4241_v4  ;;  %v3634_v55 = vld [vmem:[#allocation12] ss:$0 sm:$0xff] (!%p3633_p8) }
 0xbf8   : > { %v2968_v6 = vsub.f32 %v2950_v13, %v2964_v58  ;;  %v2971_v16 = vmul.f32 %v2967_v56, %v2967_v56  ;;  %v4242_v13 = vld [vmem:[%s5723_s12 + $0x10] sm:$0xff] (!%p3633_p8)   ;;  %3921 = vmatprep.subr.bf16.mxu1 (!%p3633_p8), %v4576_v18 }
 0xbfa   : > { %2975 = vadd.xlane.f32.xlu1 %v2971_v16  ;;  %v2972_v60 = vmul.f32 %v2968_v6, %v2968_v6 }
 0xbfb   : > { %v2960_v62 = vpop.xlane.xlu1 %2959  ;;  %3922 = vmatpush3.bf16.msra.mxu1 (!%p3633_p8), %v4242_v13 }
 0xbfc   : > { %v2965_v53 = vmul.f32 0.0078125, %v2960_v62  ;;  %2977 = vadd.xlane.f32.xlu0 %v2972_v60  ;;  %3923 = vmatprep.subr.bf16.mxu1 (!%p3633_p8), %v4576_v18 }
 0xbfd   : > { %v2962_v63 = vpop.xlane.xlu0 %2961 }
 0xbfe   : > { %v2969_v0 = vsub.f32 %v2951_v31, %v2965_v53  ;;  %v2966_v1 = vmul.f32 0.0078125, %v2962_v63  ;;  %v4244_v31 = vld [vmem:[%s5723_s12 + $0x20] sm:$0xff] (!%p3633_p8)  }
 0xbff   : > { %3924 = vmatpush3.bf16.msra.mxu1 (!%p3633_p8), %v4243_v20  ;;  %v3643_v63 = vld [vmem:[%s5724_s6] ss:$0 sm:$0xff] (!%p3633_p8) }
 0xc00   : > { %v2970_v17 = vsub.f32 %v2952_v43, %v2966_v1  ;;  %v2973_v5 = vmul.f32 %v2969_v0, %v2969_v0  ;;  %3925 = vmatprep.subr.bf16.mxu1 (!%p3633_p8), %v4576_v18  ;;  %v4245_v43 = vld [vmem:[%s5723_s12 + $0x28] sm:$0xff] (!%p3633_p8)  }
 0xc02   : > { %2979 = vadd.xlane.f32.xlu1 %v2973_v5  ;;  %v2974_v15 = vmul.f32 %v2970_v17, %v2970_v17 }
 0xc03   : > { %3926 = vmatpush3.bf16.msra.mxu1 (!%p3633_p8), %v4244_v31 }
 0xc04   : > { %2981 = vadd.xlane.f32.xlu0 %v2974_v15  ;;  %3927 = vmatprep.subr.bf16.mxu1 (!%p3633_p8), %v4576_v18 }
 0xc07   : > { %3928 = vmatpush3.bf16.msra.mxu1 (!%p3633_p8), %v4245_v43 }
 0xc08   : > { %3929 = vmatprep.subr.bf16.mxu1 (!%p3633_p8), %v4576_v18 }
 0xc0b   : > { %3930 = vmatpush3.bf16.msra.mxu1 (!%p3633_p8), %v4246_v19 }
 0xc0c   : > { %3931 = vmatprep.subr.bf16.mxu1 (!%p3633_p8), %v4576_v18 }
 0xc0f   : > { %3932 = vmatpush3.bf16.msra.mxu1 (!%p3633_p8), %v4247_v10 }
 0xc87   : > { %v2976_v9 = vpop.xlane.xlu1 %2975 }
 0xc88   : > { %v2983_v37 = vmul.f32 0.0078125, %v2976_v9 }
 0xc89   : > { %v2978_v59 = vpop.xlane.xlu0 %2977 }
 0xc8a   : > { %v2987_v3 = vadd.f32 1e-12, %v2983_v37  ;;  %v2984_v36 = vmul.f32 0.0078125, %v2978_v59 }
 0xc8c   : > { %4220 = vrsqrt.f32 %v2987_v3  ;;  %v2988_v39 = vadd.f32 1e-12, %v2984_v36 }
 0xc8e   : > { %4222 = vrsqrt.f32 %v2988_v39 }
 0xc8f   : > { %v2980_v8 = vpop.xlane.xlu1 %2979 }
 0xc90   : > { %v2985_v11 = vmul.f32 0.0078125, %v2980_v8 }
 0xc91   : > { %v2982_v47 = vpop.xlane.xlu0 %2981 }
 0xc92   : > { %v2989_v14 = vadd.f32 1e-12, %v2985_v11  ;;  %v2986_v57 = vmul.f32 0.0078125, %v2982_v47 }
 0xc94   : > { %4224 = vrsqrt.f32 %v2989_v14  ;;  %v2990_v48 = vadd.f32 1e-12, %v2986_v57 }
 0xc96   : > { %v4221_v50 = vpop.eup %4220  ;;  %4226 = vrsqrt.f32 %v2990_v48 }
 0xc97   : > { %v2995_v23 = vmul.f32 %v4221_v50, %v2967_v56 }
 0xc98   : > { %v4223_v26 = vpop.eup %4222 }
 0xc99   : > { %v3005_v27 = vmul.f32 %v3631_v21, %v2995_v23  ;;  %v2996_v54 = vmul.f32 %v4223_v26, %v2968_v6 }
 0xc9b   : > { %v3015_v29 = vadd.f32 %v3632_v52, %v3005_v27  ;;  %v3006_v2 = vmul.f32 %v3631_v21, %v2996_v54 }
 0xc9d   : > { %3019 = vst [vmem:[#allocation14] sm:$0xff] %v3015_v29  ;;  %v3016_v30 = vadd.f32 %v3632_v52, %v3006_v2 }
 0xc9e   : > { %v4225_v32 = vpop.eup %4224 }
 0xc9f   : > { %3020 = vst [vmem:[#allocation14 + $0x8] sm:$0xff] %v3016_v30  ;;  %v2997_v7 = vmul.f32 %v4225_v32, %v2969_v0 }
 0xca0   : > { %v4227_v44 = vpop.eup %4226 }
 0xca1   : > { %v3007_v34 = vmul.f32 %v3631_v21, %v2997_v7  ;;  %v2998_v35 = vmul.f32 %v4227_v44, %v2970_v17  ;;  %3026 = sbr.rel (%p3633_p8) target bundleno = 3684 (0xe64), region = 132 }
 0xca3   : > { %v3017_v61 = vadd.f32 %v3632_v52, %v3007_v34  ;;  %v3008_v38 = vmul.f32 %v3631_v21, %v2998_v35 }
 0xca5   : > { %3021 = vst [vmem:[#allocation14 + $0x10] sm:$0xff] %v3017_v61  ;;  %v3018_v24 = vadd.f32 %v3632_v52, %v3008_v38  ;;  %v3028_v22 = vrot.slane (!%p3633_p8), %v3017_v61, 7 }
 0xca7   : > { %3022 = vst [vmem:[#allocation14 + $0x18] sm:$0xff] %v3018_v24  ;;  %v3031_v51 = vsel (!%p3633_p8), %vm3030_vm7, %v3015_v29, %v3028_v22 }
 0xca8   : > { %v3032_v25 = vpack.c.bf16 %v3031_v51, %v3031_v51 }
 0xcaa   : > { %3914 = vmatmul.mubr.bf16.vlgmr.msra.gmra.mrb[0].mxu0 %v3032_v25 }
 0xd7d   : > { %v3138_v56 = vpop.f32.mrb[0].mxu0 }
 0xd7e   : > { %v3139_v58 = vadd.f32 %v3634_v55, %v3138_v56  ;;  %v3915_v6 = vpop.f32.mrb[1].mxu0 }
 0xd7f   : > { %v3141_v16 = vpop.f32.mrb[2].mxu0 }
 0xd80   : > { %4248 = vtanh.f32 %v3139_v58  ;;  %v3916_v60 = vpop.f32.mrb[3].mxu0 }
 0xd8a   : > { %v4249_v62 = vpop.eup %4248 }
 0xd8b   : > { %3257 = vst [vmem:[#allocation15] sm:$0x3] %v4249_v62  ;;  %v3145_v53 = vpack.c.bf16 %v4249_v62, %v4249_v62 }
 0xd8d   : > { %3934 = vmatmul.mubr.bf16.vlgmr.msra.gmra.mrb[0].mxu1 %v3145_v53 }
 0xe60   : > { %v3251_v0 = vpop.f32.mrb[0].mxu1 }
 0xe61   : > { %v3252_v1 = vadd.f32 %v3643_v63, %v3251_v0  ;;  %v3935_v17 = vpop.f32.mrb[1].mxu1 }
 0xe62   : > { %v3254_v5 = vpop.f32.mrb[2].mxu1 }
 0xe63   : > { %3258 = vst [vmem:[#allocation17] sm:$0x3] %v3252_v1  ;;  %v3936_v15 = vpop.f32.mrb[3].mxu1 }
 0xe64 PF: > { %p3990_p11 = scmp.eq.s32.totalorder %s4822_s23, 1  ;;  %s4578_s27 = smov [#allocation15]  }
 0xe65   : > { %s3279_s18 = sshll.u32 %s4578_s27, 4  ;;  %s4579_s11 = smov [#allocation14]   ;;  %s3280_s18 = int_to_ptr.vmem [resolvable:$true] %s3279_s18 }
 0xe66   : > { %s3265_s30 = sshll.u32 %s4579_s11, 4  ;;  %s4428_s26 = scalar_lea.vmem %s3280_s18, 32  ;;  %s3266_s30 = int_to_ptr.vmem [resolvable:$true] %s3265_s30 }
 0xe67   : > { %p4429_p12 = scmp.ne.s32.totalorder %s3280_s18, %s4428_s26  ;;  %p4435_p5 = scmp.lt.s32.totalorder %s3280_s18, %s3280_s18 }
 0xe68   : > { %p4436_p3 = scmp.lt.s32.totalorder %s4428_s26, %s4428_s26 }
 0xe69   : > { %p4430_p0 = pnand %p4429_p12, %p3990_p11 }
 0xe6a   : > { %p4437_p10 = por %p4436_p3, %p4435_p5 }
 0xe6b   : > { %p4431_p9 = pneg %p4430_p0 }
 0xe6d   : > { %p4438_p2 = pnand %p4437_p10, %p4431_p9 }
 0xe6f   : > { %4441 = shalt.err (!%p4438_p2)
}
 0xe70   : > { %s5725_s3 = sld [smem:[#allocation45_spill]] }
 0xe76   : > { %s5726_s14 = smov %s5725_s3  ;;  %s4442_s20 = scalar_lea.hbm %s5725_s3, 32 }
 0xe77   : > { %p4443_p1 = scmp.ne.s32.totalorder %s5726_s14, %s4442_s20  ;;  %p4448_p13 = scmp.lt.u32.totalorder %s4442_s20, %s5726_s14 }
 0xe79   : > { %p4444_p4 = pnand %p4443_p1, %p3990_p11 }
 0xe7b   : > { %p4445_p7 = pneg %p4444_p4 }
 0xe7d   : > { %p4450_p6 = pnand %p4448_p13, %p4445_p7 }
 0xe7f   : > { %4453 = shalt.err (!%p4450_p6)
}
 0xe80   : > { %3958 = dma.vmem_to_hbm [thread:$0]  (%p3990_p11), %s3280_s18, 32, %s5726_s14, [#allocation16]  }
 0xe81   : > { %s4454_s21 = scalar_lea.vmem %s3266_s30, 512  ;;  %p4461_p9 = scmp.lt.s32.totalorder %s3266_s30, %s3266_s30 }
 0xe82   : > { %p4455_p8 = scmp.ne.s32.totalorder %s3266_s30, %s4454_s21  ;;  %p4462_p5 = scmp.lt.s32.totalorder %s4454_s21, %s4454_s21 }
 0xe84   : > { %p4456_p12 = pnand %p4455_p8, %p3990_p11  ;;  %p4463_p3 = por %p4462_p5, %p4461_p9 }
 0xe86   : > { %p4457_p0 = pneg %p4456_p12 }
 0xe88   : > { %p4464_p10 = pnand %p4463_p3, %p4457_p0 }
 0xe8a   : > { %4467 = shalt.err (!%p4464_p10)
}
 0xe8b   : > { %s5727_s9 = sld [smem:[#allocation44_spill]] }
 0xe91   : > { %s4468_s15 = scalar_lea.hbm %s5727_s9, 512 }
 0xe92   : > { %p4469_p2 = scmp.ne.s32.totalorder %s5727_s9, %s4468_s15  ;;  %p4474_p7 = scmp.lt.u32.totalorder %s4468_s15, %s5727_s9 }
 0xe94   : > { %p4470_p1 = pnand %p4469_p2, %p3990_p11 }
 0xe96   : > { %p4471_p4 = pneg %p4470_p1 }
 0xe98   : > { %p4476_p13 = pnand %p4474_p7, %p4471_p4 }
 0xe9a   : > { %4479 = shalt.err (!%p4476_p13)
}
 0xe9b   : > { %s4580_s26 = smov 128   ;;  %s4581_s5 = smov 8  }
 0xe9c   : > { %3956 = dma.vmem_to_hbm [thread:$0]  (%p3990_p11), %s3266_s30, 512, %s5727_s9, [#allocation5], %s4580_s26, %s4580_s26, %s4581_s5  }
 0xe9d   : > { %s4582_s20 = smov [#allocation17]  }
 0xe9e   : > { %s3290_s2 = sshll.u32 %s4582_s20, 4  ;;  %s3291_s2 = int_to_ptr.vmem [resolvable:$true] %s3290_s2 }
 0xe9f   : > { %s4480_s1 = scalar_lea.vmem %s3291_s2, 32  ;;  %p4487_p0 = scmp.lt.s32.totalorder %s3291_s2, %s3291_s2 }
 0xea0   : > { %p4481_p6 = scmp.ne.s32.totalorder %s3291_s2, %s4480_s1  ;;  %p4488_p9 = scmp.lt.s32.totalorder %s4480_s1, %s4480_s1 }
 0xea2   : > { %p4482_p8 = pnand %p4481_p6, %p3990_p11  ;;  %p4489_p5 = por %p4488_p9, %p4487_p0 }
 0xea4   : > { %p4483_p12 = pneg %p4482_p8 }
 0xea6   : > { %p4490_p3 = pnand %p4489_p5, %p4483_p12 }
 0xea8   : > { %4493 = shalt.err (!%p4490_p3)
}
 0xea9   : > { %s5728_s4 = sld [smem:[#allocation46_spill]] }
 0xeaf   : > { %s4494_s19 = scalar_lea.hbm %s5728_s4, 32 }
 0xeb0   : > { %p4495_p10 = scmp.ne.s32.totalorder %s5728_s4, %s4494_s19  ;;  %p4500_p4 = scmp.lt.u32.totalorder %s4494_s19, %s5728_s4 }
 0xeb2   : > { %p4496_p2 = pnand %p4495_p10, %p3990_p11 }
 0xeb4   : > { %p4497_p1 = pneg %p4496_p2 }
 0xeb6   : > { %p4502_p7 = pnand %p4500_p4, %p4497_p1 }
 0xeb8   : > { %4505 = shalt.err (!%p4502_p7)
}
 0xeb9   : > { %3960 = dma.vmem_to_hbm [thread:$0]  (%p3990_p11), %s3291_s2, 32, %s5728_s4, [#allocation16]  }
 0xeba   : > { %4539 = dma.done.wait (%p3990_p11), [#allocation5], 512  }
 0xebb   : > { %4541 = vsyncadd (%p3990_p11), [#allocation5], 4294966784 }
 0xebc   : > { %4543 = dma.done.wait (%p3990_p11), [#allocation16], 64  }
 0xebd   : > { %4545 = vsyncadd (%p3990_p11), [#allocation16], 4294967232 }
 0xebe PF: > { %s5729_s30 = sld [smem:[#allocation25_spill]]  ;;  %s5730_s27 = sld [smem:[#allocation24_spill]] }
 0xebf   : > { %s5731_s29 = sld [smem:[#allocation26_spill]]  ;;  %s5732_s3 = smov %s4552_s28 }
 0xec4   : > { %p42_p13 = scmp.ge.s32.totalorder %s5729_s30, 4   ;;  %s5733_s28 = smov %s5730_s27 }
 0xec6   :  { %44 = sbr.rel (!%p42_p13) target bundleno = 31 (0x1f), region = 234 }
 0xecd   :  { %3311 = vsyncpa [#allocation4], 1 }
 0xece   :  { %3313 = vsyncpa [#allocation4 + $0x1], 1 }
 0xecf   :  { %3314 = vsyncpa [#allocation7], 1 }
 0xed0   :  { %3316 = vsyncpa [#allocation7 + $0x1], 1 }
 0xed1   :  { %3317 = vsyncpa [#allocation10], 1 }
 0xed2   :  { %3319 = vsyncpa [#allocation10 + $0x1], 1 }
 0xed3   :  { %3320 = vsyncpa [#allocation13], 1 }
 0xed4   :  { %3321 = vsyncpa [#allocation5], 1 }
 0xed5   :  { %3323 = vsyncpa [#allocation5 + $0x1], 1 }
 0xed6   :  { %3324 = vsyncpa [#allocation16], 1 }

</bundles_post_ra>
